<compile_context>
chip_gen: v7x
topology: tpu7x:2x2x1
jax: 0.10.0
libtpu: 0.0.40
codegen_flags: <defaults>
</compile_context>

<pallas_src>
import functools

import jax
import jax.numpy as jnp
from jax.experimental import pallas as pl
from jax.experimental.pallas import tpu as pltpu


def fused_lstm_fc_kernel(*refs, num_layers, hidden_size, seq_len, batch_pad):
    """refs = [x, (w_ih, w_hh, b) * L, fc_w, fc_b, out].

    x:    (Bp, T, I)   batch_first, batch padded to Bp (multiple of 8)
    w_ih: (in, 4H), w_hh: (H, 4H), b: (1, 4H)   gate order [i, f, o, g]
    fc_w: (H, C), fc_b: (1, C)
    out:  (L, Bp, C)   fc applied to each layer's final hidden state
    """
    H = hidden_size
    T = seq_len
    Bp = batch_pad

    x_ref = refs[0]
    layer_refs = [refs[1 + 3 * l: 1 + 3 * (l + 1)] for l in range(num_layers)]
    fc_w_ref = refs[1 + 3 * num_layers]
    fc_b_ref = refs[2 + 3 * num_layers]
    out_ref = refs[3 + 3 * num_layers]

    fc_w = fc_w_ref[...]
    fc_b = fc_b_ref[...]

    def run_recurrence(gate_at, w_hh):
        """Serial LSTM recurrence; gate_at(t) -> (Bp, 4H) precomputed x-gates."""
        h = jnp.zeros((Bp, H), jnp.float32)
        c = jnp.zeros((Bp, H), jnp.float32)
        hs = []
        for t in range(T):  # static unroll (T is small): full LLO visibility
            g = gate_at(t) + jnp.dot(h, w_hh,
                                     preferred_element_type=jnp.float32)
            s = jax.nn.sigmoid(g[:, : 3 * H])      # [i | f | o] contiguous
            i_g = s[:, 0 * H:1 * H]
            f_g = s[:, 1 * H:2 * H]
            o_g = s[:, 2 * H:3 * H]
            g_g = jnp.tanh(g[:, 3 * H:])
            c = f_g * c + i_g * g_g
            h = o_g * jnp.tanh(c)
            hs.append(h)
        return h, hs

    # ---- Layer 0: hoisted input projection from the batch_first layout. ----
    w_ih0, w_hh0, b0 = layer_refs[0]
    in0 = x_ref.shape[2]
    x2d = x_ref[...].reshape(Bp * T, in0)                      # rows = (b, t)
    gx0 = (jnp.dot(x2d, w_ih0[...], preferred_element_type=jnp.float32)
           + b0[...]).reshape(Bp, T, 4 * H)                    # batch-major
    h_last, hs = run_recurrence(lambda t: gx0[:, t, :], w_hh0[...])
    out_ref[0] = (jnp.dot(h_last, fc_w, preferred_element_type=jnp.float32)
                  + fc_b).astype(out_ref.dtype)

    # ---- Layers 1..L-1: input is the previous layer's hidden sequence. ----
    for l in range(1, num_layers):
        w_ih, w_hh, b = layer_refs[l]
        seq = jnp.stack(hs, axis=0)                            # (T, Bp, H)
        gx = (jnp.dot(seq.reshape(T * Bp, H), w_ih[...],
                      preferred_element_type=jnp.float32)
              + b[...]).reshape(T, Bp, 4 * H)                  # time-major
        h_last, hs = run_recurrence(lambda t, gx=gx: gx[t], w_hh[...])
        out_ref[l] = (jnp.dot(h_last, fc_w, preferred_element_type=jnp.float32)
                      + fc_b).astype(out_ref.dtype)


def lstm_fc_pallas(x, pt_lstm_params, fc_w_pt, fc_b_pt):
    """Forward pass matching the PyTorch module: fc(h_out.view(-1, H)).

    x: (B, T, I) batch_first.
    pt_lstm_params: list of (w_ih (4H,in), w_hh (4H,H), b_ih (4H,), b_hh (4H,))
                    per layer, PyTorch gate order [i, f, g, o].
    fc_w_pt: (C, H), fc_b_pt: (C,).
    Returns (L*B, C).
    """
    B, T, I = x.shape
    H = pt_lstm_params[0][1].shape[1]
    L = len(pt_lstm_params)
    C = fc_w_pt.shape[0]
    Bp = max(8, ((B + 7) // 8) * 8)          # pad batch to >= 8 sublanes

    def reorder_gates(w):                    # [i,f,g,o] -> [i,f,o,g] columns
        i, f, g, o = jnp.split(w, 4, axis=-1)
        return jnp.concatenate([i, f, o, g], axis=-1)

    flat_w = []
    for (w_ih, w_hh, b_ih, b_hh) in pt_lstm_params:
        flat_w += [
            reorder_gates(w_ih.T.astype(jnp.float32)),                # (in, 4H)
            reorder_gates(w_hh.T.astype(jnp.float32)),                # (H, 4H)
            reorder_gates((b_ih + b_hh).astype(jnp.float32).reshape(1, 4 * H)),
        ]
    fc_w = fc_w_pt.T.astype(jnp.float32)                              # (H, C)
    fc_b = fc_b_pt.astype(jnp.float32).reshape(1, C)

    x_p = jnp.zeros((Bp, T, I), jnp.float32).at[:B].set(x.astype(jnp.float32))

    kernel = functools.partial(
        fused_lstm_fc_kernel,
        num_layers=L, hidden_size=H, seq_len=T, batch_pad=Bp)

    in_specs = [pl.BlockSpec((Bp, T, I), lambda i: (0, 0, 0))]
    for l in range(L):
        in_dim = I if l == 0 else H
        in_specs += [
            pl.BlockSpec((in_dim, 4 * H), lambda i: (0, 0)),
            pl.BlockSpec((H, 4 * H), lambda i: (0, 0)),
            pl.BlockSpec((1, 4 * H), lambda i: (0, 0)),
        ]
    in_specs += [
        pl.BlockSpec((H, C), lambda i: (0, 0)),
        pl.BlockSpec((1, C), lambda i: (0, 0)),
    ]

    out = pl.pallas_call(
        kernel,
        out_shape=jax.ShapeDtypeStruct((L, Bp, C), jnp.float32),
        grid_spec=pltpu.PrefetchScalarGridSpec(
            num_scalar_prefetch=0,
            grid=(1,),                       # single invocation: whole model
            in_specs=in_specs,
            out_specs=pl.BlockSpec((L, Bp, C), lambda i: (0, 0, 0)),
        ),
        compiler_params=pltpu.CompilerParams(
            dimension_semantics=("arbitrary",),
            vmem_limit_bytes=32 * 1024 * 1024,
        ),
    )(x_p, *flat_w, fc_w, fc_b)

    # h_out.view(-1, H) ordering: layer-major, then batch.
    return out[:, :B, :].reshape(L * B, C)


def lstm_forward_ref(x, pt_lstm_params, fc_w_pt, fc_b_pt):
    """Pure-JAX (lax.scan) reference with identical PyTorch semantics."""
    B = x.shape[0]
    H = pt_lstm_params[0][1].shape[1]
    layer_in = x.astype(jnp.float32)
    h_finals = []
    for (w_ih, w_hh, b_ih, b_hh) in pt_lstm_params:
        def step(carry, x_t, w_ih=w_ih, w_hh=w_hh, b=b_ih + b_hh):
            h, c = carry
            gates = x_t @ w_ih.T + h @ w_hh.T + b
            i = jax.nn.sigmoid(gates[:, 0 * H:1 * H])
            f = jax.nn.sigmoid(gates[:, 1 * H:2 * H])
            g = jnp.tanh(gates[:, 2 * H:3 * H])
            o = jax.nn.sigmoid(gates[:, 3 * H:4 * H])
            c = f * c + i * g
            h = o * jnp.tanh(c)
            return (h, c), h
        init = (jnp.zeros((B, H), jnp.float32), jnp.zeros((B, H), jnp.float32))
        (h_f, _), seq = jax.lax.scan(step, init, jnp.transpose(layer_in, (1, 0, 2)))
        h_finals.append(h_f)
        layer_in = jnp.transpose(seq, (1, 0, 2))
    h_out = jnp.stack(h_finals, axis=0).reshape(-1, H)
    return h_out @ fc_w_pt.T + fc_b_pt


if __name__ == "__main__":
    # Model hyperparameters consistent with the module.
    num_classes = 1
    input_size = 4
    hidden_size = 32
    num_layers = 2
    seq_length = 8
    batch = 2

    key = jax.random.PRNGKey(0)
    k_x, k_p = jax.random.split(key)
    x = jax.random.normal(k_x, (batch, seq_length, input_size), jnp.float32)

    # PyTorch-layout parameters, uniform(-1/sqrt(H), 1/sqrt(H)) like nn.LSTM.
    bound = 1.0 / float(hidden_size) ** 0.5
    pt_params = []
    for layer in range(num_layers):
        in_dim = input_size if layer == 0 else hidden_size
        k_p, k1, k2, k3, k4 = jax.random.split(k_p, 5)
        w_ih = jax.random.uniform(k1, (4 * hidden_size, in_dim), jnp.float32,
                                  -bound, bound)
        w_hh = jax.random.uniform(k2, (4 * hidden_size, hidden_size), jnp.float32,
                                  -bound, bound)
        b_ih = jax.random.uniform(k3, (4 * hidden_size,), jnp.float32, -bound, bound)
        b_hh = jax.random.uniform(k4, (4 * hidden_size,), jnp.float32, -bound, bound)
        pt_params.append((w_ih, w_hh, b_ih, b_hh))
    k_p, k5, k6 = jax.random.split(k_p, 3)
    fc_w = jax.random.uniform(k5, (num_classes, hidden_size), jnp.float32,
                              -bound, bound)
    fc_b = jax.random.uniform(k6, (num_classes,), jnp.float32, -bound, bound)

    out = jax.block_until_ready(lstm_fc_pallas(x, pt_params, fc_w, fc_b))
    ref = jax.block_until_ready(lstm_forward_ref(x, pt_params, fc_w, fc_b))

    assert out.shape == (num_layers * batch, num_classes), out.shape
    assert jnp.allclose(out, ref, atol=2e-5, rtol=2e-5), (out, ref)

    print("KERNEL_OK")
</pallas_src>

<mosaic_0001>
module attributes {stable_mosaic.version = 11 : i64} {
  func.func @fused_lstm_fc_kernel(%arg0: i32, %arg1: memref<8x8x4xf32, #tpu.memory_space<vmem>>, %arg2: memref<4x128xf32, #tpu.memory_space<vmem>>, %arg3: memref<32x128xf32, #tpu.memory_space<vmem>>, %arg4: memref<1x128xf32, #tpu.memory_space<vmem>>, %arg5: memref<32x128xf32, #tpu.memory_space<vmem>>, %arg6: memref<32x128xf32, #tpu.memory_space<vmem>>, %arg7: memref<1x128xf32, #tpu.memory_space<vmem>>, %arg8: memref<32x1xf32, #tpu.memory_space<vmem>>, %arg9: memref<1x1xf32, #tpu.memory_space<vmem>>, %arg10: memref<2x8x1xf32, #tpu.memory_space<vmem>>) attributes {dimension_semantics = [#tpu.dimension_semantics<arbitrary>], iteration_bounds = array<i64: 1>, scalar_prefetch = 0 : i64, scratch_operands = 0 : i64, tpu.core_type = #tpu.core_type<tc>, window_params = [{pipeline_mode = #tpu.pipeline_mode<synchronous>, transform_indices = @transform_0, window_bounds = array<i64: 8, 8, 4>}, {pipeline_mode = #tpu.pipeline_mode<synchronous>, transform_indices = @transform_1, window_bounds = array<i64: 4, 128>}, {pipeline_mode = #tpu.pipeline_mode<synchronous>, transform_indices = @transform_2, window_bounds = array<i64: 32, 128>}, {pipeline_mode = #tpu.pipeline_mode<synchronous>, transform_indices = @transform_3, window_bounds = array<i64: 1, 128>}, {pipeline_mode = #tpu.pipeline_mode<synchronous>, transform_indices = @transform_4, window_bounds = array<i64: 32, 128>}, {pipeline_mode = #tpu.pipeline_mode<synchronous>, transform_indices = @transform_5, window_bounds = array<i64: 32, 128>}, {pipeline_mode = #tpu.pipeline_mode<synchronous>, transform_indices = @transform_6, window_bounds = array<i64: 1, 128>}, {pipeline_mode = #tpu.pipeline_mode<synchronous>, transform_indices = @transform_7, window_bounds = array<i64: 32, 1>}, {pipeline_mode = #tpu.pipeline_mode<synchronous>, transform_indices = @transform_8, window_bounds = array<i64: 1, 1>}, {pipeline_mode = #tpu.pipeline_mode<synchronous>, transform_indices = @transform_9, window_bounds = array<i64: 2, 8, 1>}]} {
    %c0 = arith.constant 0 : index
    %c0_0 = arith.constant 0 : index
    %0 = vector.load %arg8[%c0, %c0_0] : memref<32x1xf32, #tpu.memory_space<vmem>>, vector<32x1xf32>
    %c0_1 = arith.constant 0 : index
    %c0_2 = arith.constant 0 : index
    %1 = vector.load %arg9[%c0_1, %c0_2] : memref<1x1xf32, #tpu.memory_space<vmem>>, vector<1x1xf32>
    %c0_3 = arith.constant 0 : index
    %c0_4 = arith.constant 0 : index
    %c0_5 = arith.constant 0 : index
    %2 = vector.load %arg1[%c0_3, %c0_4, %c0_5] : memref<8x8x4xf32, #tpu.memory_space<vmem>>, vector<8x8x4xf32>
    %3 = vector.shape_cast %2 : vector<8x8x4xf32> to vector<64x4xf32>
    %c0_6 = arith.constant 0 : index
    %c0_7 = arith.constant 0 : index
    %4 = vector.load %arg2[%c0_6, %c0_7] : memref<4x128xf32, #tpu.memory_space<vmem>>, vector<4x128xf32>
    %cst = arith.constant dense<0.000000e+00> : vector<64x128xf32>
    %5 = tpu.matmul %3, %4, %cst {dimension_numbers = #tpu.dot_dimension_numbers<[1], [0], [0], [1], [0, 0, 1, 1], [], []>} : vector<64x4xf32>, vector<4x128xf32>, vector<64x128xf32> -> vector<64x128xf32>
    %c0_8 = arith.constant 0 : index
    %c0_9 = arith.constant 0 : index
    %6 = vector.load %arg4[%c0_8, %c0_9] : memref<1x128xf32, #tpu.memory_space<vmem>>, vector<1x128xf32>
    %7 = vector.broadcast %6 : vector<1x128xf32> to vector<64x128xf32>
    %8 = arith.addf %5, %7 : vector<64x128xf32>
    %9 = vector.shape_cast %8 : vector<64x128xf32> to vector<8x8x128xf32>
    %c0_10 = arith.constant 0 : index
    %c0_11 = arith.constant 0 : index
    %10 = vector.load %arg3[%c0_10, %c0_11] : memref<32x128xf32, #tpu.memory_space<vmem>>, vector<32x128xf32>
    %cst_12 = arith.constant 0.000000e+00 : f32
    %11 = vector.broadcast %cst_12 : f32 to vector<8x32xf32>
    %cst_13 = arith.constant 0.000000e+00 : f32
    %12 = vector.broadcast %cst_13 : f32 to vector<8x32xf32>
    %13 = vector.extract_strided_slice %9 {offsets = [0, 0, 0], sizes = [8, 1, 128], strides = [1, 1, 1]} : vector<8x8x128xf32> to vector<8x1x128xf32>
    %14 = vector.shape_cast %13 : vector<8x1x128xf32> to vector<8x128xf32>
    %cst_14 = arith.constant dense<0.000000e+00> : vector<8x128xf32>
    %15 = tpu.matmul %11, %10, %cst_14 {dimension_numbers = #tpu.dot_dimension_numbers<[1], [0], [0], [1], [0, 0, 1, 1], [], []>} : vector<8x32xf32>, vector<32x128xf32>, vector<8x128xf32> -> vector<8x128xf32>
    %16 = arith.addf %14, %15 : vector<8x128xf32>
    %17 = vector.extract_strided_slice %16 {offsets = [0, 0], sizes = [8, 96], strides = [1, 1]} : vector<8x128xf32> to vector<8x96xf32>
    %18 = arith.negf %17 : vector<8x96xf32>
    %19 = math.exp %18 : vector<8x96xf32>
    %cst_15 = arith.constant 1.000000e+00 : f32
    %20 = vector.broadcast %cst_15 : f32 to vector<8x96xf32>
    %21 = arith.addf %20, %19 : vector<8x96xf32>
    %22 = arith.divf %20, %21 : vector<8x96xf32>
    %23 = vector.extract_strided_slice %22 {offsets = [0, 0], sizes = [8, 32], strides = [1, 1]} : vector<8x96xf32> to vector<8x32xf32>
    %24 = vector.extract_strided_slice %22 {offsets = [0, 32], sizes = [8, 32], strides = [1, 1]} : vector<8x96xf32> to vector<8x32xf32>
    %25 = vector.extract_strided_slice %22 {offsets = [0, 64], sizes = [8, 32], strides = [1, 1]} : vector<8x96xf32> to vector<8x32xf32>
    %26 = vector.extract_strided_slice %16 {offsets = [0, 96], sizes = [8, 32], strides = [1, 1]} : vector<8x128xf32> to vector<8x32xf32>
    %27 = math.tanh %26 : vector<8x32xf32>
    %28 = arith.mulf %24, %12 : vector<8x32xf32>
    %29 = arith.mulf %23, %27 : vector<8x32xf32>
    %30 = arith.addf %28, %29 : vector<8x32xf32>
    %31 = math.tanh %30 : vector<8x32xf32>
    %32 = arith.mulf %25, %31 : vector<8x32xf32>
    %33 = vector.extract_strided_slice %9 {offsets = [0, 1, 0], sizes = [8, 1, 128], strides = [1, 1, 1]} : vector<8x8x128xf32> to vector<8x1x128xf32>
    %34 = vector.shape_cast %33 : vector<8x1x128xf32> to vector<8x128xf32>
    %cst_16 = arith.constant dense<0.000000e+00> : vector<8x128xf32>
    %35 = tpu.matmul %32, %10, %cst_16 {dimension_numbers = #tpu.dot_dimension_numbers<[1], [0], [0], [1], [0, 0, 1, 1], [], []>} : vector<8x32xf32>, vector<32x128xf32>, vector<8x128xf32> -> vector<8x128xf32>
    %36 = arith.addf %34, %35 : vector<8x128xf32>
    %37 = vector.extract_strided_slice %36 {offsets = [0, 0], sizes = [8, 96], strides = [1, 1]} : vector<8x128xf32> to vector<8x96xf32>
    %38 = arith.negf %37 : vector<8x96xf32>
    %39 = math.exp %38 : vector<8x96xf32>
    %cst_17 = arith.constant 1.000000e+00 : f32
    %40 = vector.broadcast %cst_17 : f32 to vector<8x96xf32>
    %41 = arith.addf %40, %39 : vector<8x96xf32>
    %42 = arith.divf %40, %41 : vector<8x96xf32>
    %43 = vector.extract_strided_slice %42 {offsets = [0, 0], sizes = [8, 32], strides = [1, 1]} : vector<8x96xf32> to vector<8x32xf32>
    %44 = vector.extract_strided_slice %42 {offsets = [0, 32], sizes = [8, 32], strides = [1, 1]} : vector<8x96xf32> to vector<8x32xf32>
    %45 = vector.extract_strided_slice %42 {offsets = [0, 64], sizes = [8, 32], strides = [1, 1]} : vector<8x96xf32> to vector<8x32xf32>
    %46 = vector.extract_strided_slice %36 {offsets = [0, 96], sizes = [8, 32], strides = [1, 1]} : vector<8x128xf32> to vector<8x32xf32>
    %47 = math.tanh %46 : vector<8x32xf32>
    %48 = arith.mulf %44, %30 : vector<8x32xf32>
    %49 = arith.mulf %43, %47 : vector<8x32xf32>
    %50 = arith.addf %48, %49 : vector<8x32xf32>
    %51 = math.tanh %50 : vector<8x32xf32>
    %52 = arith.mulf %45, %51 : vector<8x32xf32>
    %53 = vector.extract_strided_slice %9 {offsets = [0, 2, 0], sizes = [8, 1, 128], strides = [1, 1, 1]} : vector<8x8x128xf32> to vector<8x1x128xf32>
    %54 = vector.shape_cast %53 : vector<8x1x128xf32> to vector<8x128xf32>
    %cst_18 = arith.constant dense<0.000000e+00> : vector<8x128xf32>
    %55 = tpu.matmul %52, %10, %cst_18 {dimension_numbers = #tpu.dot_dimension_numbers<[1], [0], [0], [1], [0, 0, 1, 1], [], []>} : vector<8x32xf32>, vector<32x128xf32>, vector<8x128xf32> -> vector<8x128xf32>
    %56 = arith.addf %54, %55 : vector<8x128xf32>
    %57 = vector.extract_strided_slice %56 {offsets = [0, 0], sizes = [8, 96], strides = [1, 1]} : vector<8x128xf32> to vector<8x96xf32>
    %58 = arith.negf %57 : vector<8x96xf32>
    %59 = math.exp %58 : vector<8x96xf32>
    %cst_19 = arith.constant 1.000000e+00 : f32
    %60 = vector.broadcast %cst_19 : f32 to vector<8x96xf32>
    %61 = arith.addf %60, %59 : vector<8x96xf32>
    %62 = arith.divf %60, %61 : vector<8x96xf32>
    %63 = vector.extract_strided_slice %62 {offsets = [0, 0], sizes = [8, 32], strides = [1, 1]} : vector<8x96xf32> to vector<8x32xf32>
    %64 = vector.extract_strided_slice %62 {offsets = [0, 32], sizes = [8, 32], strides = [1, 1]} : vector<8x96xf32> to vector<8x32xf32>
    %65 = vector.extract_strided_slice %62 {offsets = [0, 64], sizes = [8, 32], strides = [1, 1]} : vector<8x96xf32> to vector<8x32xf32>
    %66 = vector.extract_strided_slice %56 {offsets = [0, 96], sizes = [8, 32], strides = [1, 1]} : vector<8x128xf32> to vector<8x32xf32>
    %67 = math.tanh %66 : vector<8x32xf32>
    %68 = arith.mulf %64, %50 : vector<8x32xf32>
    %69 = arith.mulf %63, %67 : vector<8x32xf32>
    %70 = arith.addf %68, %69 : vector<8x32xf32>
    %71 = math.tanh %70 : vector<8x32xf32>
    %72 = arith.mulf %65, %71 : vector<8x32xf32>
    %73 = vector.extract_strided_slice %9 {offsets = [0, 3, 0], sizes = [8, 1, 128], strides = [1, 1, 1]} : vector<8x8x128xf32> to vector<8x1x128xf32>
    %74 = vector.shape_cast %73 : vector<8x1x128xf32> to vector<8x128xf32>
    %cst_20 = arith.constant dense<0.000000e+00> : vector<8x128xf32>
    %75 = tpu.matmul %72, %10, %cst_20 {dimension_numbers = #tpu.dot_dimension_numbers<[1], [0], [0], [1], [0, 0, 1, 1], [], []>} : vector<8x32xf32>, vector<32x128xf32>, vector<8x128xf32> -> vector<8x128xf32>
    %76 = arith.addf %74, %75 : vector<8x128xf32>
    %77 = vector.extract_strided_slice %76 {offsets = [0, 0], sizes = [8, 96], strides = [1, 1]} : vector<8x128xf32> to vector<8x96xf32>
    %78 = arith.negf %77 : vector<8x96xf32>
    %79 = math.exp %78 : vector<8x96xf32>
    %cst_21 = arith.constant 1.000000e+00 : f32
    %80 = vector.broadcast %cst_21 : f32 to vector<8x96xf32>
    %81 = arith.addf %80, %79 : vector<8x96xf32>
    %82 = arith.divf %80, %81 : vector<8x96xf32>
    %83 = vector.extract_strided_slice %82 {offsets = [0, 0], sizes = [8, 32], strides = [1, 1]} : vector<8x96xf32> to vector<8x32xf32>
    %84 = vector.extract_strided_slice %82 {offsets = [0, 32], sizes = [8, 32], strides = [1, 1]} : vector<8x96xf32> to vector<8x32xf32>
    %85 = vector.extract_strided_slice %82 {offsets = [0, 64], sizes = [8, 32], strides = [1, 1]} : vector<8x96xf32> to vector<8x32xf32>
    %86 = vector.extract_strided_slice %76 {offsets = [0, 96], sizes = [8, 32], strides = [1, 1]} : vector<8x128xf32> to vector<8x32xf32>
    %87 = math.tanh %86 : vector<8x32xf32>
    %88 = arith.mulf %84, %70 : vector<8x32xf32>
    %89 = arith.mulf %83, %87 : vector<8x32xf32>
    %90 = arith.addf %88, %89 : vector<8x32xf32>
    %91 = math.tanh %90 : vector<8x32xf32>
    %92 = arith.mulf %85, %91 : vector<8x32xf32>
    %93 = vector.extract_strided_slice %9 {offsets = [0, 4, 0], sizes = [8, 1, 128], strides = [1, 1, 1]} : vector<8x8x128xf32> to vector<8x1x128xf32>
    %94 = vector.shape_cast %93 : vector<8x1x128xf32> to vector<8x128xf32>
    %cst_22 = arith.constant dense<0.000000e+00> : vector<8x128xf32>
    %95 = tpu.matmul %92, %10, %cst_22 {dimension_numbers = #tpu.dot_dimension_numbers<[1], [0], [0], [1], [0, 0, 1, 1], [], []>} : vector<8x32xf32>, vector<32x128xf32>, vector<8x128xf32> -> vector<8x128xf32>
    %96 = arith.addf %94, %95 : vector<8x128xf32>
    %97 = vector.extract_strided_slice %96 {offsets = [0, 0], sizes = [8, 96], strides = [1, 1]} : vector<8x128xf32> to vector<8x96xf32>
    %98 = arith.negf %97 : vector<8x96xf32>
    %99 = math.exp %98 : vector<8x96xf32>
    %cst_23 = arith.constant 1.000000e+00 : f32
    %100 = vector.broadcast %cst_23 : f32 to vector<8x96xf32>
    %101 = arith.addf %100, %99 : vector<8x96xf32>
    %102 = arith.divf %100, %101 : vector<8x96xf32>
    %103 = vector.extract_strided_slice %102 {offsets = [0, 0], sizes = [8, 32], strides = [1, 1]} : vector<8x96xf32> to vector<8x32xf32>
    %104 = vector.extract_strided_slice %102 {offsets = [0, 32], sizes = [8, 32], strides = [1, 1]} : vector<8x96xf32> to vector<8x32xf32>
    %105 = vector.extract_strided_slice %102 {offsets = [0, 64], sizes = [8, 32], strides = [1, 1]} : vector<8x96xf32> to vector<8x32xf32>
    %106 = vector.extract_strided_slice %96 {offsets = [0, 96], sizes = [8, 32], strides = [1, 1]} : vector<8x128xf32> to vector<8x32xf32>
    %107 = math.tanh %106 : vector<8x32xf32>
    %108 = arith.mulf %104, %90 : vector<8x32xf32>
    %109 = arith.mulf %103, %107 : vector<8x32xf32>
    %110 = arith.addf %108, %109 : vector<8x32xf32>
    %111 = math.tanh %110 : vector<8x32xf32>
    %112 = arith.mulf %105, %111 : vector<8x32xf32>
    %113 = vector.extract_strided_slice %9 {offsets = [0, 5, 0], sizes = [8, 1, 128], strides = [1, 1, 1]} : vector<8x8x128xf32> to vector<8x1x128xf32>
    %114 = vector.shape_cast %113 : vector<8x1x128xf32> to vector<8x128xf32>
    %cst_24 = arith.constant dense<0.000000e+00> : vector<8x128xf32>
    %115 = tpu.matmul %112, %10, %cst_24 {dimension_numbers = #tpu.dot_dimension_numbers<[1], [0], [0], [1], [0, 0, 1, 1], [], []>} : vector<8x32xf32>, vector<32x128xf32>, vector<8x128xf32> -> vector<8x128xf32>
    %116 = arith.addf %114, %115 : vector<8x128xf32>
    %117 = vector.extract_strided_slice %116 {offsets = [0, 0], sizes = [8, 96], strides = [1, 1]} : vector<8x128xf32> to vector<8x96xf32>
    %118 = arith.negf %117 : vector<8x96xf32>
    %119 = math.exp %118 : vector<8x96xf32>
    %cst_25 = arith.constant 1.000000e+00 : f32
    %120 = vector.broadcast %cst_25 : f32 to vector<8x96xf32>
    %121 = arith.addf %120, %119 : vector<8x96xf32>
    %122 = arith.divf %120, %121 : vector<8x96xf32>
    %123 = vector.extract_strided_slice %122 {offsets = [0, 0], sizes = [8, 32], strides = [1, 1]} : vector<8x96xf32> to vector<8x32xf32>
    %124 = vector.extract_strided_slice %122 {offsets = [0, 32], sizes = [8, 32], strides = [1, 1]} : vector<8x96xf32> to vector<8x32xf32>
    %125 = vector.extract_strided_slice %122 {offsets = [0, 64], sizes = [8, 32], strides = [1, 1]} : vector<8x96xf32> to vector<8x32xf32>
    %126 = vector.extract_strided_slice %116 {offsets = [0, 96], sizes = [8, 32], strides = [1, 1]} : vector<8x128xf32> to vector<8x32xf32>
    %127 = math.tanh %126 : vector<8x32xf32>
    %128 = arith.mulf %124, %110 : vector<8x32xf32>
    %129 = arith.mulf %123, %127 : vector<8x32xf32>
    %130 = arith.addf %128, %129 : vector<8x32xf32>
    %131 = math.tanh %130 : vector<8x32xf32>
    %132 = arith.mulf %125, %131 : vector<8x32xf32>
    %133 = vector.extract_strided_slice %9 {offsets = [0, 6, 0], sizes = [8, 1, 128], strides = [1, 1, 1]} : vector<8x8x128xf32> to vector<8x1x128xf32>
    %134 = vector.shape_cast %133 : vector<8x1x128xf32> to vector<8x128xf32>
    %cst_26 = arith.constant dense<0.000000e+00> : vector<8x128xf32>
    %135 = tpu.matmul %132, %10, %cst_26 {dimension_numbers = #tpu.dot_dimension_numbers<[1], [0], [0], [1], [0, 0, 1, 1], [], []>} : vector<8x32xf32>, vector<32x128xf32>, vector<8x128xf32> -> vector<8x128xf32>
    %136 = arith.addf %134, %135 : vector<8x128xf32>
    %137 = vector.extract_strided_slice %136 {offsets = [0, 0], sizes = [8, 96], strides = [1, 1]} : vector<8x128xf32> to vector<8x96xf32>
    %138 = arith.negf %137 : vector<8x96xf32>
    %139 = math.exp %138 : vector<8x96xf32>
    %cst_27 = arith.constant 1.000000e+00 : f32
    %140 = vector.broadcast %cst_27 : f32 to vector<8x96xf32>
    %141 = arith.addf %140, %139 : vector<8x96xf32>
    %142 = arith.divf %140, %141 : vector<8x96xf32>
    %143 = vector.extract_strided_slice %142 {offsets = [0, 0], sizes = [8, 32], strides = [1, 1]} : vector<8x96xf32> to vector<8x32xf32>
    %144 = vector.extract_strided_slice %142 {offsets = [0, 32], sizes = [8, 32], strides = [1, 1]} : vector<8x96xf32> to vector<8x32xf32>
    %145 = vector.extract_strided_slice %142 {offsets = [0, 64], sizes = [8, 32], strides = [1, 1]} : vector<8x96xf32> to vector<8x32xf32>
    %146 = vector.extract_strided_slice %136 {offsets = [0, 96], sizes = [8, 32], strides = [1, 1]} : vector<8x128xf32> to vector<8x32xf32>
    %147 = math.tanh %146 : vector<8x32xf32>
    %148 = arith.mulf %144, %130 : vector<8x32xf32>
    %149 = arith.mulf %143, %147 : vector<8x32xf32>
    %150 = arith.addf %148, %149 : vector<8x32xf32>
    %151 = math.tanh %150 : vector<8x32xf32>
    %152 = arith.mulf %145, %151 : vector<8x32xf32>
    %153 = vector.extract_strided_slice %9 {offsets = [0, 7, 0], sizes = [8, 1, 128], strides = [1, 1, 1]} : vector<8x8x128xf32> to vector<8x1x128xf32>
    %154 = vector.shape_cast %153 : vector<8x1x128xf32> to vector<8x128xf32>
    %cst_28 = arith.constant dense<0.000000e+00> : vector<8x128xf32>
    %155 = tpu.matmul %152, %10, %cst_28 {dimension_numbers = #tpu.dot_dimension_numbers<[1], [0], [0], [1], [0, 0, 1, 1], [], []>} : vector<8x32xf32>, vector<32x128xf32>, vector<8x128xf32> -> vector<8x128xf32>
    %156 = arith.addf %154, %155 : vector<8x128xf32>
    %157 = vector.extract_strided_slice %156 {offsets = [0, 0], sizes = [8, 96], strides = [1, 1]} : vector<8x128xf32> to vector<8x96xf32>
    %158 = arith.negf %157 : vector<8x96xf32>
    %159 = math.exp %158 : vector<8x96xf32>
    %cst_29 = arith.constant 1.000000e+00 : f32
    %160 = vector.broadcast %cst_29 : f32 to vector<8x96xf32>
    %161 = arith.addf %160, %159 : vector<8x96xf32>
    %162 = arith.divf %160, %161 : vector<8x96xf32>
    %163 = vector.extract_strided_slice %162 {offsets = [0, 0], sizes = [8, 32], strides = [1, 1]} : vector<8x96xf32> to vector<8x32xf32>
    %164 = vector.extract_strided_slice %162 {offsets = [0, 32], sizes = [8, 32], strides = [1, 1]} : vector<8x96xf32> to vector<8x32xf32>
    %165 = vector.extract_strided_slice %162 {offsets = [0, 64], sizes = [8, 32], strides = [1, 1]} : vector<8x96xf32> to vector<8x32xf32>
    %166 = vector.extract_strided_slice %156 {offsets = [0, 96], sizes = [8, 32], strides = [1, 1]} : vector<8x128xf32> to vector<8x32xf32>
    %167 = math.tanh %166 : vector<8x32xf32>
    %168 = arith.mulf %164, %150 : vector<8x32xf32>
    %169 = arith.mulf %163, %167 : vector<8x32xf32>
    %170 = arith.addf %168, %169 : vector<8x32xf32>
    %171 = math.tanh %170 : vector<8x32xf32>
    %172 = arith.mulf %165, %171 : vector<8x32xf32>
    %cst_30 = arith.constant dense<0.000000e+00> : vector<8x1xf32>
    %173 = tpu.matmul %172, %0, %cst_30 {dimension_numbers = #tpu.dot_dimension_numbers<[1], [0], [0], [1], [0, 0, 1, 1], [], []>} : vector<8x32xf32>, vector<32x1xf32>, vector<8x1xf32> -> vector<8x1xf32>
    %174 = vector.broadcast %1 : vector<1x1xf32> to vector<8x1xf32>
    %175 = arith.addf %173, %174 : vector<8x1xf32>
    %c0_31 = arith.constant 0 : index
    %c0_32 = arith.constant 0 : index
    %c0_33 = arith.constant 0 : index
    %176 = vector.load %arg10[%c0_31, %c0_32, %c0_33] : memref<2x8x1xf32, #tpu.memory_space<vmem>>, vector<1x8x1xf32>
    %177 = vector.shape_cast %176 : vector<1x8x1xf32> to vector<8x1xf32>
    %178 = vector.shape_cast %175 : vector<8x1xf32> to vector<1x8x1xf32>
    tpu.vector_store %arg10[%c0_31, %c0_32, %c0_33], %178 {strides = array<i32>} : memref<2x8x1xf32, #tpu.memory_space<vmem>>, vector<1x8x1xf32>,
    %179 = vector.shape_cast %32 : vector<8x32xf32> to vector<1x8x32xf32>
    %180 = vector.shape_cast %52 : vector<8x32xf32> to vector<1x8x32xf32>
    %181 = vector.shape_cast %72 : vector<8x32xf32> to vector<1x8x32xf32>
    %182 = vector.shape_cast %92 : vector<8x32xf32> to vector<1x8x32xf32>
    %183 = vector.shape_cast %112 : vector<8x32xf32> to vector<1x8x32xf32>
    %184 = vector.shape_cast %132 : vector<8x32xf32> to vector<1x8x32xf32>
    %185 = vector.shape_cast %152 : vector<8x32xf32> to vector<1x8x32xf32>
    %186 = vector.shape_cast %172 : vector<8x32xf32> to vector<1x8x32xf32>
    %187 = tpu.concatenate %179, %180, %181, %182, %183, %184, %185, %186 in 0 : vector<1x8x32xf32>, vector<1x8x32xf32>, vector<1x8x32xf32>, vector<1x8x32xf32>, vector<1x8x32xf32>, vector<1x8x32xf32>, vector<1x8x32xf32>, vector<1x8x32xf32> -> vector<8x8x32xf32>
    %188 = vector.shape_cast %187 : vector<8x8x32xf32> to vector<64x32xf32>
    %c0_34 = arith.constant 0 : index
    %c0_35 = arith.constant 0 : index
    %189 = vector.load %arg5[%c0_34, %c0_35] : memref<32x128xf32, #tpu.memory_space<vmem>>, vector<32x128xf32>
    %cst_36 = arith.constant dense<0.000000e+00> : vector<64x128xf32>
    %190 = tpu.matmul %188, %189, %cst_36 {dimension_numbers = #tpu.dot_dimension_numbers<[1], [0], [0], [1], [0, 0, 1, 1], [], []>} : vector<64x32xf32>, vector<32x128xf32>, vector<64x128xf32> -> vector<64x128xf32>
    %c0_37 = arith.constant 0 : index
    %c0_38 = arith.constant 0 : index
    %191 = vector.load %arg7[%c0_37, %c0_38] : memref<1x128xf32, #tpu.memory_space<vmem>>, vector<1x128xf32>
    %192 = vector.broadcast %191 : vector<1x128xf32> to vector<64x128xf32>
    %193 = arith.addf %190, %192 : vector<64x128xf32>
    %194 = vector.shape_cast %193 : vector<64x128xf32> to vector<8x8x128xf32>
    %c0_39 = arith.constant 0 : index
    %c0_40 = arith.constant 0 : index
    %195 = vector.load %arg6[%c0_39, %c0_40] : memref<32x128xf32, #tpu.memory_space<vmem>>, vector<32x128xf32>
    %cst_41 = arith.constant 0.000000e+00 : f32
    %196 = vector.broadcast %cst_41 : f32 to vector<8x32xf32>
    %cst_42 = arith.constant 0.000000e+00 : f32
    %197 = vector.broadcast %cst_42 : f32 to vector<8x32xf32>
    %198 = vector.extract_strided_slice %194 {offsets = [0, 0, 0], sizes = [1, 8, 128], strides = [1, 1, 1]} : vector<8x8x128xf32> to vector<1x8x128xf32>
    %199 = vector.shape_cast %198 : vector<1x8x128xf32> to vector<8x128xf32>
    %cst_43 = arith.constant dense<0.000000e+00> : vector<8x128xf32>
    %200 = tpu.matmul %196, %195, %cst_43 {dimension_numbers = #tpu.dot_dimension_numbers<[1], [0], [0], [1], [0, 0, 1, 1], [], []>} : vector<8x32xf32>, vector<32x128xf32>, vector<8x128xf32> -> vector<8x128xf32>
    %201 = arith.addf %199, %200 : vector<8x128xf32>
    %202 = vector.extract_strided_slice %201 {offsets = [0, 0], sizes = [8, 96], strides = [1, 1]} : vector<8x128xf32> to vector<8x96xf32>
    %203 = arith.negf %202 : vector<8x96xf32>
    %204 = math.exp %203 : vector<8x96xf32>
    %cst_44 = arith.constant 1.000000e+00 : f32
    %205 = vector.broadcast %cst_44 : f32 to vector<8x96xf32>
    %206 = arith.addf %205, %204 : vector<8x96xf32>
    %207 = arith.divf %205, %206 : vector<8x96xf32>
    %208 = vector.extract_strided_slice %207 {offsets = [0, 0], sizes = [8, 32], strides = [1, 1]} : vector<8x96xf32> to vector<8x32xf32>
    %209 = vector.extract_strided_slice %207 {offsets = [0, 32], sizes = [8, 32], strides = [1, 1]} : vector<8x96xf32> to vector<8x32xf32>
    %210 = vector.extract_strided_slice %207 {offsets = [0, 64], sizes = [8, 32], strides = [1, 1]} : vector<8x96xf32> to vector<8x32xf32>
    %211 = vector.extract_strided_slice %201 {offsets = [0, 96], sizes = [8, 32], strides = [1, 1]} : vector<8x128xf32> to vector<8x32xf32>
    %212 = math.tanh %211 : vector<8x32xf32>
    %213 = arith.mulf %209, %197 : vector<8x32xf32>
    %214 = arith.mulf %208, %212 : vector<8x32xf32>
    %215 = arith.addf %213, %214 : vector<8x32xf32>
    %216 = math.tanh %215 : vector<8x32xf32>
    %217 = arith.mulf %210, %216 : vector<8x32xf32>
    %218 = vector.extract_strided_slice %194 {offsets = [1, 0, 0], sizes = [1, 8, 128], strides = [1, 1, 1]} : vector<8x8x128xf32> to vector<1x8x128xf32>
    %219 = vector.shape_cast %218 : vector<1x8x128xf32> to vector<8x128xf32>
    %cst_45 = arith.constant dense<0.000000e+00> : vector<8x128xf32>
    %220 = tpu.matmul %217, %195, %cst_45 {dimension_numbers = #tpu.dot_dimension_numbers<[1], [0], [0], [1], [0, 0, 1, 1], [], []>} : vector<8x32xf32>, vector<32x128xf32>, vector<8x128xf32> -> vector<8x128xf32>
    %221 = arith.addf %219, %220 : vector<8x128xf32>
    %222 = vector.extract_strided_slice %221 {offsets = [0, 0], sizes = [8, 96], strides = [1, 1]} : vector<8x128xf32> to vector<8x96xf32>
    %223 = arith.negf %222 : vector<8x96xf32>
    %224 = math.exp %223 : vector<8x96xf32>
    %cst_46 = arith.constant 1.000000e+00 : f32
    %225 = vector.broadcast %cst_46 : f32 to vector<8x96xf32>
    %226 = arith.addf %225, %224 : vector<8x96xf32>
    %227 = arith.divf %225, %226 : vector<8x96xf32>
    %228 = vector.extract_strided_slice %227 {offsets = [0, 0], sizes = [8, 32], strides = [1, 1]} : vector<8x96xf32> to vector<8x32xf32>
    %229 = vector.extract_strided_slice %227 {offsets = [0, 32], sizes = [8, 32], strides = [1, 1]} : vector<8x96xf32> to vector<8x32xf32>
    %230 = vector.extract_strided_slice %227 {offsets = [0, 64], sizes = [8, 32], strides = [1, 1]} : vector<8x96xf32> to vector<8x32xf32>
    %231 = vector.extract_strided_slice %221 {offsets = [0, 96], sizes = [8, 32], strides = [1, 1]} : vector<8x128xf32> to vector<8x32xf32>
    %232 = math.tanh %231 : vector<8x32xf32>
    %233 = arith.mulf %229, %215 : vector<8x32xf32>
    %234 = arith.mulf %228, %232 : vector<8x32xf32>
    %235 = arith.addf %233, %234 : vector<8x32xf32>
    %236 = math.tanh %235 : vector<8x32xf32>
    %237 = arith.mulf %230, %236 : vector<8x32xf32>
    %238 = vector.extract_strided_slice %194 {offsets = [2, 0, 0], sizes = [1, 8, 128], strides = [1, 1, 1]} : vector<8x8x128xf32> to vector<1x8x128xf32>
    %239 = vector.shape_cast %238 : vector<1x8x128xf32> to vector<8x128xf32>
    %cst_47 = arith.constant dense<0.000000e+00> : vector<8x128xf32>
    %240 = tpu.matmul %237, %195, %cst_47 {dimension_numbers = #tpu.dot_dimension_numbers<[1], [0], [0], [1], [0, 0, 1, 1], [], []>} : vector<8x32xf32>, vector<32x128xf32>, vector<8x128xf32> -> vector<8x128xf32>
    %241 = arith.addf %239, %240 : vector<8x128xf32>
    %242 = vector.extract_strided_slice %241 {offsets = [0, 0], sizes = [8, 96], strides = [1, 1]} : vector<8x128xf32> to vector<8x96xf32>
    %243 = arith.negf %242 : vector<8x96xf32>
    %244 = math.exp %243 : vector<8x96xf32>
    %cst_48 = arith.constant 1.000000e+00 : f32
    %245 = vector.broadcast %cst_48 : f32 to vector<8x96xf32>
    %246 = arith.addf %245, %244 : vector<8x96xf32>
    %247 = arith.divf %245, %246 : vector<8x96xf32>
    %248 = vector.extract_strided_slice %247 {offsets = [0, 0], sizes = [8, 32], strides = [1, 1]} : vector<8x96xf32> to vector<8x32xf32>
    %249 = vector.extract_strided_slice %247 {offsets = [0, 32], sizes = [8, 32], strides = [1, 1]} : vector<8x96xf32> to vector<8x32xf32>
    %250 = vector.extract_strided_slice %247 {offsets = [0, 64], sizes = [8, 32], strides = [1, 1]} : vector<8x96xf32> to vector<8x32xf32>
    %251 = vector.extract_strided_slice %241 {offsets = [0, 96], sizes = [8, 32], strides = [1, 1]} : vector<8x128xf32> to vector<8x32xf32>
    %252 = math.tanh %251 : vector<8x32xf32>
    %253 = arith.mulf %249, %235 : vector<8x32xf32>
    %254 = arith.mulf %248, %252 : vector<8x32xf32>
    %255 = arith.addf %253, %254 : vector<8x32xf32>
    %256 = math.tanh %255 : vector<8x32xf32>
    %257 = arith.mulf %250, %256 : vector<8x32xf32>
    %258 = vector.extract_strided_slice %194 {offsets = [3, 0, 0], sizes = [1, 8, 128], strides = [1, 1, 1]} : vector<8x8x128xf32> to vector<1x8x128xf32>
    %259 = vector.shape_cast %258 : vector<1x8x128xf32> to vector<8x128xf32>
    %cst_49 = arith.constant dense<0.000000e+00> : vector<8x128xf32>
    %260 = tpu.matmul %257, %195, %cst_49 {dimension_numbers = #tpu.dot_dimension_numbers<[1], [0], [0], [1], [0, 0, 1, 1], [], []>} : vector<8x32xf32>, vector<32x128xf32>, vector<8x128xf32> -> vector<8x128xf32>
    %261 = arith.addf %259, %260 : vector<8x128xf32>
    %262 = vector.extract_strided_slice %261 {offsets = [0, 0], sizes = [8, 96], strides = [1, 1]} : vector<8x128xf32> to vector<8x96xf32>
    %263 = arith.negf %262 : vector<8x96xf32>
    %264 = math.exp %263 : vector<8x96xf32>
    %cst_50 = arith.constant 1.000000e+00 : f32
    %265 = vector.broadcast %cst_50 : f32 to vector<8x96xf32>
    %266 = arith.addf %265, %264 : vector<8x96xf32>
    %267 = arith.divf %265, %266 : vector<8x96xf32>
    %268 = vector.extract_strided_slice %267 {offsets = [0, 0], sizes = [8, 32], strides = [1, 1]} : vector<8x96xf32> to vector<8x32xf32>
    %269 = vector.extract_strided_slice %267 {offsets = [0, 32], sizes = [8, 32], strides = [1, 1]} : vector<8x96xf32> to vector<8x32xf32>
    %270 = vector.extract_strided_slice %267 {offsets = [0, 64], sizes = [8, 32], strides = [1, 1]} : vector<8x96xf32> to vector<8x32xf32>
    %271 = vector.extract_strided_slice %261 {offsets = [0, 96], sizes = [8, 32], strides = [1, 1]} : vector<8x128xf32> to vector<8x32xf32>
    %272 = math.tanh %271 : vector<8x32xf32>
    %273 = arith.mulf %269, %255 : vector<8x32xf32>
    %274 = arith.mulf %268, %272 : vector<8x32xf32>
    %275 = arith.addf %273, %274 : vector<8x32xf32>
    %276 = math.tanh %275 : vector<8x32xf32>
    %277 = arith.mulf %270, %276 : vector<8x32xf32>
    %278 = vector.extract_strided_slice %194 {offsets = [4, 0, 0], sizes = [1, 8, 128], strides = [1, 1, 1]} : vector<8x8x128xf32> to vector<1x8x128xf32>
    %279 = vector.shape_cast %278 : vector<1x8x128xf32> to vector<8x128xf32>
    %cst_51 = arith.constant dense<0.000000e+00> : vector<8x128xf32>
    %280 = tpu.matmul %277, %195, %cst_51 {dimension_numbers = #tpu.dot_dimension_numbers<[1], [0], [0], [1], [0, 0, 1, 1], [], []>} : vector<8x32xf32>, vector<32x128xf32>, vector<8x128xf32> -> vector<8x128xf32>
    %281 = arith.addf %279, %280 : vector<8x128xf32>
    %282 = vector.extract_strided_slice %281 {offsets = [0, 0], sizes = [8, 96], strides = [1, 1]} : vector<8x128xf32> to vector<8x96xf32>
    %283 = arith.negf %282 : vector<8x96xf32>
    %284 = math.exp %283 : vector<8x96xf32>
    %cst_52 = arith.constant 1.000000e+00 : f32
    %285 = vector.broadcast %cst_52 : f32 to vector<8x96xf32>
    %286 = arith.addf %285, %284 : vector<8x96xf32>
    %287 = arith.divf %285, %286 : vector<8x96xf32>
    %288 = vector.extract_strided_slice %287 {offsets = [0, 0], sizes = [8, 32], strides = [1, 1]} : vector<8x96xf32> to vector<8x32xf32>
    %289 = vector.extract_strided_slice %287 {offsets = [0, 32], sizes = [8, 32], strides = [1, 1]} : vector<8x96xf32> to vector<8x32xf32>
    %290 = vector.extract_strided_slice %287 {offsets = [0, 64], sizes = [8, 32], strides = [1, 1]} : vector<8x96xf32> to vector<8x32xf32>
    %291 = vector.extract_strided_slice %281 {offsets = [0, 96], sizes = [8, 32], strides = [1, 1]} : vector<8x128xf32> to vector<8x32xf32>
    %292 = math.tanh %291 : vector<8x32xf32>
    %293 = arith.mulf %289, %275 : vector<8x32xf32>
    %294 = arith.mulf %288, %292 : vector<8x32xf32>
    %295 = arith.addf %293, %294 : vector<8x32xf32>
    %296 = math.tanh %295 : vector<8x32xf32>
    %297 = arith.mulf %290, %296 : vector<8x32xf32>
    %298 = vector.extract_strided_slice %194 {offsets = [5, 0, 0], sizes = [1, 8, 128], strides = [1, 1, 1]} : vector<8x8x128xf32> to vector<1x8x128xf32>
    %299 = vector.shape_cast %298 : vector<1x8x128xf32> to vector<8x128xf32>
    %cst_53 = arith.constant dense<0.000000e+00> : vector<8x128xf32>
    %300 = tpu.matmul %297, %195, %cst_53 {dimension_numbers = #tpu.dot_dimension_numbers<[1], [0], [0], [1], [0, 0, 1, 1], [], []>} : vector<8x32xf32>, vector<32x128xf32>, vector<8x128xf32> -> vector<8x128xf32>
    %301 = arith.addf %299, %300 : vector<8x128xf32>
    %302 = vector.extract_strided_slice %301 {offsets = [0, 0], sizes = [8, 96], strides = [1, 1]} : vector<8x128xf32> to vector<8x96xf32>
    %303 = arith.negf %302 : vector<8x96xf32>
    %304 = math.exp %303 : vector<8x96xf32>
    %cst_54 = arith.constant 1.000000e+00 : f32
    %305 = vector.broadcast %cst_54 : f32 to vector<8x96xf32>
    %306 = arith.addf %305, %304 : vector<8x96xf32>
    %307 = arith.divf %305, %306 : vector<8x96xf32>
    %308 = vector.extract_strided_slice %307 {offsets = [0, 0], sizes = [8, 32], strides = [1, 1]} : vector<8x96xf32> to vector<8x32xf32>
    %309 = vector.extract_strided_slice %307 {offsets = [0, 32], sizes = [8, 32], strides = [1, 1]} : vector<8x96xf32> to vector<8x32xf32>
    %310 = vector.extract_strided_slice %307 {offsets = [0, 64], sizes = [8, 32], strides = [1, 1]} : vector<8x96xf32> to vector<8x32xf32>
    %311 = vector.extract_strided_slice %301 {offsets = [0, 96], sizes = [8, 32], strides = [1, 1]} : vector<8x128xf32> to vector<8x32xf32>
    %312 = math.tanh %311 : vector<8x32xf32>
    %313 = arith.mulf %309, %295 : vector<8x32xf32>
    %314 = arith.mulf %308, %312 : vector<8x32xf32>
    %315 = arith.addf %313, %314 : vector<8x32xf32>
    %316 = math.tanh %315 : vector<8x32xf32>
    %317 = arith.mulf %310, %316 : vector<8x32xf32>
    %318 = vector.extract_strided_slice %194 {offsets = [6, 0, 0], sizes = [1, 8, 128], strides = [1, 1, 1]} : vector<8x8x128xf32> to vector<1x8x128xf32>
    %319 = vector.shape_cast %318 : vector<1x8x128xf32> to vector<8x128xf32>
    %cst_55 = arith.constant dense<0.000000e+00> : vector<8x128xf32>
    %320 = tpu.matmul %317, %195, %cst_55 {dimension_numbers = #tpu.dot_dimension_numbers<[1], [0], [0], [1], [0, 0, 1, 1], [], []>} : vector<8x32xf32>, vector<32x128xf32>, vector<8x128xf32> -> vector<8x128xf32>
    %321 = arith.addf %319, %320 : vector<8x128xf32>
    %322 = vector.extract_strided_slice %321 {offsets = [0, 0], sizes = [8, 96], strides = [1, 1]} : vector<8x128xf32> to vector<8x96xf32>
    %323 = arith.negf %322 : vector<8x96xf32>
    %324 = math.exp %323 : vector<8x96xf32>
    %cst_56 = arith.constant 1.000000e+00 : f32
    %325 = vector.broadcast %cst_56 : f32 to vector<8x96xf32>
    %326 = arith.addf %325, %324 : vector<8x96xf32>
    %327 = arith.divf %325, %326 : vector<8x96xf32>
    %328 = vector.extract_strided_slice %327 {offsets = [0, 0], sizes = [8, 32], strides = [1, 1]} : vector<8x96xf32> to vector<8x32xf32>
    %329 = vector.extract_strided_slice %327 {offsets = [0, 32], sizes = [8, 32], strides = [1, 1]} : vector<8x96xf32> to vector<8x32xf32>
    %330 = vector.extract_strided_slice %327 {offsets = [0, 64], sizes = [8, 32], strides = [1, 1]} : vector<8x96xf32> to vector<8x32xf32>
    %331 = vector.extract_strided_slice %321 {offsets = [0, 96], sizes = [8, 32], strides = [1, 1]} : vector<8x128xf32> to vector<8x32xf32>
    %332 = math.tanh %331 : vector<8x32xf32>
    %333 = arith.mulf %329, %315 : vector<8x32xf32>
    %334 = arith.mulf %328, %332 : vector<8x32xf32>
    %335 = arith.addf %333, %334 : vector<8x32xf32>
    %336 = math.tanh %335 : vector<8x32xf32>
    %337 = arith.mulf %330, %336 : vector<8x32xf32>
    %338 = vector.extract_strided_slice %194 {offsets = [7, 0, 0], sizes = [1, 8, 128], strides = [1, 1, 1]} : vector<8x8x128xf32> to vector<1x8x128xf32>
    %339 = vector.shape_cast %338 : vector<1x8x128xf32> to vector<8x128xf32>
    %cst_57 = arith.constant dense<0.000000e+00> : vector<8x128xf32>
    %340 = tpu.matmul %337, %195, %cst_57 {dimension_numbers = #tpu.dot_dimension_numbers<[1], [0], [0], [1], [0, 0, 1, 1], [], []>} : vector<8x32xf32>, vector<32x128xf32>, vector<8x128xf32> -> vector<8x128xf32>
    %341 = arith.addf %339, %340 : vector<8x128xf32>
    %342 = vector.extract_strided_slice %341 {offsets = [0, 0], sizes = [8, 96], strides = [1, 1]} : vector<8x128xf32> to vector<8x96xf32>
    %343 = arith.negf %342 : vector<8x96xf32>
    %344 = math.exp %343 : vector<8x96xf32>
    %cst_58 = arith.constant 1.000000e+00 : f32
    %345 = vector.broadcast %cst_58 : f32 to vector<8x96xf32>
    %346 = arith.addf %345, %344 : vector<8x96xf32>
    %347 = arith.divf %345, %346 : vector<8x96xf32>
    %348 = vector.extract_strided_slice %347 {offsets = [0, 0], sizes = [8, 32], strides = [1, 1]} : vector<8x96xf32> to vector<8x32xf32>
    %349 = vector.extract_strided_slice %347 {offsets = [0, 32], sizes = [8, 32], strides = [1, 1]} : vector<8x96xf32> to vector<8x32xf32>
    %350 = vector.extract_strided_slice %347 {offsets = [0, 64], sizes = [8, 32], strides = [1, 1]} : vector<8x96xf32> to vector<8x32xf32>
    %351 = vector.extract_strided_slice %341 {offsets = [0, 96], sizes = [8, 32], strides = [1, 1]} : vector<8x128xf32> to vector<8x32xf32>
    %352 = math.tanh %351 : vector<8x32xf32>
    %353 = arith.mulf %349, %335 : vector<8x32xf32>
    %354 = arith.mulf %348, %352 : vector<8x32xf32>
    %355 = arith.addf %353, %354 : vector<8x32xf32>
    %356 = math.tanh %355 : vector<8x32xf32>
    %357 = arith.mulf %350, %356 : vector<8x32xf32>
    %cst_59 = arith.constant dense<0.000000e+00> : vector<8x1xf32>
    %358 = tpu.matmul %357, %0, %cst_59 {dimension_numbers = #tpu.dot_dimension_numbers<[1], [0], [0], [1], [0, 0, 1, 1], [], []>} : vector<8x32xf32>, vector<32x1xf32>, vector<8x1xf32> -> vector<8x1xf32>
    %359 = vector.broadcast %1 : vector<1x1xf32> to vector<8x1xf32>
    %360 = arith.addf %358, %359 : vector<8x1xf32>
    %c1 = arith.constant 1 : index
    %c0_60 = arith.constant 0 : index
    %c0_61 = arith.constant 0 : index
    %361 = vector.load %arg10[%c1, %c0_60, %c0_61] : memref<2x8x1xf32, #tpu.memory_space<vmem>>, vector<1x8x1xf32>
    %362 = vector.shape_cast %361 : vector<1x8x1xf32> to vector<8x1xf32>
    %363 = vector.shape_cast %360 : vector<8x1xf32> to vector<1x8x1xf32>
    tpu.vector_store %arg10[%c1, %c0_60, %c0_61], %363 {strides = array<i32>} : memref<2x8x1xf32, #tpu.memory_space<vmem>>, vector<1x8x1xf32>,
    return
  }
  func.func @transform_0(%arg0: i32) -> (i32, i32, i32) {
    %c0_i32 = arith.constant 0 : i32
    %c0_i32_0 = arith.constant 0 : i32
    %c0_i32_1 = arith.constant 0 : i32
    %c0_i32_2 = arith.constant 0 : i32
    return %c0_i32, %c0_i32_0, %c0_i32_1 : i32, i32, i32
  }
  func.func @transform_1(%arg0: i32) -> (i32, i32) {
    %c0_i32 = arith.constant 0 : i32
    %c0_i32_0 = arith.constant 0 : i32
    %c0_i32_1 = arith.constant 0 : i32
    return %c0_i32, %c0_i32_0 : i32, i32
  }
  func.func @transform_2(%arg0: i32) -> (i32, i32) {
    %c0_i32 = arith.constant 0 : i32
    %c0_i32_0 = arith.constant 0 : i32
    %c0_i32_1 = arith.constant 0 : i32
    return %c0_i32, %c0_i32_0 : i32, i32
  }
  func.func @transform_3(%arg0: i32) -> (i32, i32) {
    %c0_i32 = arith.constant 0 : i32
    %c0_i32_0 = arith.constant 0 : i32
    %c0_i32_1 = arith.constant 0 : i32
    return %c0_i32, %c0_i32_0 : i32, i32
  }
  func.func @transform_4(%arg0: i32) -> (i32, i32) {
    %c0_i32 = arith.constant 0 : i32
    %c0_i32_0 = arith.constant 0 : i32
    %c0_i32_1 = arith.constant 0 : i32
    return %c0_i32, %c0_i32_0 : i32, i32
  }
  func.func @transform_5(%arg0: i32) -> (i32, i32) {
    %c0_i32 = arith.constant 0 : i32
    %c0_i32_0 = arith.constant 0 : i32
    %c0_i32_1 = arith.constant 0 : i32
    return %c0_i32, %c0_i32_0 : i32, i32
  }
  func.func @transform_6(%arg0: i32) -> (i32, i32) {
    %c0_i32 = arith.constant 0 : i32
    %c0_i32_0 = arith.constant 0 : i32
    %c0_i32_1 = arith.constant 0 : i32
    return %c0_i32, %c0_i32_0 : i32, i32
  }
  func.func @transform_7(%arg0: i32) -> (i32, i32) {
    %c0_i32 = arith.constant 0 : i32
    %c0_i32_0 = arith.constant 0 : i32
    %c0_i32_1 = arith.constant 0 : i32
    return %c0_i32, %c0_i32_0 : i32, i32
  }
  func.func @transform_8(%arg0: i32) -> (i32, i32) {
    %c0_i32 = arith.constant 0 : i32
    %c0_i32_0 = arith.constant 0 : i32
    %c0_i32_1 = arith.constant 0 : i32
    return %c0_i32, %c0_i32_0 : i32, i32
  }
  func.func @transform_9(%arg0: i32) -> (i32, i32, i32) {
    %c0_i32 = arith.constant 0 : i32
    %c0_i32_0 = arith.constant 0 : i32
    %c0_i32_1 = arith.constant 0 : i32
    %c0_i32_2 = arith.constant 0 : i32
    return %c0_i32, %c0_i32_0, %c0_i32_1 : i32, i32, i32
  }
}

</mosaic_0001>

<bundles_post_ra>
// kernel: tpu_custom_call.1
= control target key start
LH: loop header
LB: loop body
LE: loop exit
PB: predicated region body
PF: predicated region fallthrough
CT: control target
= control target key end

     0   :  { %vm80_vm0 = vcmask 1043456   ;;  %vm55_vm1 = vcmask 31744   ;;  %v5315_v2 = vmov 0.0|0.0   ;;  %vm5316_vm2 = vmmov 0   ;;  %s5319_s13 = smov 64   ;;  %s6629_s1 = inlined_call_operand.vmem [shape: f32[4,128], index: 1, kind: input, shape index: {}]   ;;  %s6630_s0 = inlined_call_operand.vmem [shape: f32[8,8,4], index: 0, kind: input, shape index: {}]   ;;  %s6631_s2 = inlined_call_operand.vmem [shape: f32[32,128], index: 2, kind: input, shape index: {}]   ;;  %s6632_s3 = inlined_call_operand.vmem [shape: f32[1,128], index: 3, kind: input, shape index: {}]   ;;  %s6633_s4 = inlined_call_operand.vmem [shape: f32[32,128], index: 4, kind: input, shape index: {}]   ;;  %s6634_s7 = inlined_call_operand.vmem [shape: f32[32,1], index: 7, kind: input, shape index: {}]   ;;  %s6635_s5 = inlined_call_operand.vmem [shape: f32[32,128], index: 5, kind: input, shape index: {}]   ;;  %s6636_s8 = inlined_call_operand.<no memory space> [shape: f32[1,1], index: 8, kind: input, shape index: {}]   ;;  %s6637_s9 = inlined_call_operand.vmem [shape: f32[2,8,1], index: 9, kind: output, shape index: {}]   ;;  %s6638_s6 = inlined_call_operand.vmem [shape: f32[1,128], index: 6, kind: input, shape index: {}]  }
   0x1   :  { %v47_v0 = vld [vmem:[%s6629_s1] sm:$0xf]  ;;  %4618 = vmatprep.subr.bf16.mxu1 %v5315_v2  ;;  %v40_v3 = vld [vmem:[%s6630_s0 + $0x8] sm:$0xff]  ;;  %v41_v6 = vld [vmem:[%s6630_s0 + $0x10] sm:$0xff]  ;;  %v5317_v10 = vmov 0.0   ;;  %vm492_vm3 = vcmask 1041409  }
   0x2   :  { %v39_v1 = vld [vmem:[%s6630_s0] sm:$0xff]  ;;  %4386 = vmatprep.subr.msk.mxu0 %vm80_vm0, %v47_v0  ;;  %v190_v5 = vld [vmem:[%s6631_s2 + $0x8] sm:$0xff]  ;;  %v191_v8 = vld [vmem:[%s6631_s2 + $0x10] sm:$0xff]  ;;  %4408 = vmatprep.mubr.msk.f32.mxu1 %vm5316_vm2, %v5317_v10  ;;  %vm495_vm4 = vcmask 1042434   ;;  %vm498_vm5 = vcmask 1043459   ;;  %vm501_vm6 = vcmask 1044484  }
   0x3   :  { %4388 = vmatprep.mubr.msk.f32.mxu0 %vm55_vm1, %v39_v1  ;;  %v189_v4 = vld [vmem:[%s6631_s2] sm:$0xff]  ;;  %4387 = vmatpush3.msk.msra.mxu0 %vm80_vm0, %v47_v0  ;;  %v192_v9 = vld [vmem:[%s6631_s2 + $0x18] sm:$0xff]  ;;  %v44_v14 = vld [vmem:[%s6630_s0 + $0x28] sm:$0xff]  ;;  %vm504_vm7 = vcmask 1045509   ;;  %vm507_vm8 = vcmask 1046534   ;;  %vm510_vm9 = vcmask 1047559  }
   0x4   :  { %v5390_v7 = vpack.c.bf16 %v190_v5, %v189_v4  ;;  %4389 = vmatmul.mubr.msk.f32.vlgmr.msra.gmra.mrb[0].mxu0 %vm55_vm1, %v40_v3  ;;  %4630 = vmatprep.subr.bf16.mxu0 %v5315_v2  ;;  %v42_v11 = vld [vmem:[%s6630_s0 + $0x18] sm:$0xff]  ;;  %v5407_v12 = vpack.c.bf16 %v192_v9, %v191_v8  ;;  %v43_v13 = vld [vmem:[%s6630_s0 + $0x20] sm:$0xff]  ;;  %v45_v15 = vld [vmem:[%s6630_s0 + $0x30] sm:$0xff]  ;;  %vm193_vm10 = vcmask 261120   ;;  %vm2944_vm11 = vcmask 7168  }
   0x5   :  { %4391 = vmatprep.mubr.msk.f32.mxu0 %vm55_vm1, %v41_v6  ;;  %v46_v16 = vld [vmem:[%s6630_s0 + $0x38] sm:$0xff]  ;;  %v4117_v21 = vld [vmem:[%s6632_s3] ss:$0 sm:$0xff]  ;;  %s5318_s3 = smov 32  }
   0x6   :  { %4620 = vmatpush3.bf16.msra.mxu1 %v5390_v7  ;;  %4632 = vmatpush3.bf16.msra.mxu0 %v5390_v7 }
   0x7   :  { %4621 = vmatprep.subr.bf16.mxu1 %v5315_v2  ;;  %4633 = vmatprep.subr.bf16.mxu0 %v5315_v2 }
   0x8   :  { %4392 = vmatmul.mubr.msk.f32.gmra.mrb[2].mxu0 %vm55_vm1, %v42_v11 }
   0x9   :  { %4394 = vmatprep.mubr.msk.f32.mxu0 %vm55_vm1, %v43_v13 }
   0xa   :  { %4623 = vmatpush3.bf16.msra.mxu1 %v5407_v12  ;;  %4635 = vmatpush3.bf16.msra.mxu0 %v5407_v12 }
   0xb   :  { %4624 = vmatprep.subr.bf16.mxu1 %v5315_v2  ;;  %4642 = vmatprep.subr.bf16.mxu0 %v5315_v2 }
   0xc   :  { %4395 = vmatmul.mubr.msk.f32.gmra.mrb[4].mxu0 %vm55_vm1, %v44_v14 }
   0xd   :  { %4409 = vmatmul.mubr.f32.vlgmr.msra.gmra.mrb[0].mxu1 %v5317_v10  ;;  %4397 = vmatprep.mubr.msk.f32.mxu0 %vm55_vm1, %v45_v15 }
   0xe   :  { %4626 = vmatpush3.bf16.msra.mxu1 %v5390_v7  ;;  %4419 = vmatprep.mubr.msk.f32.mxu1 %vm5316_vm2, %v5317_v10 }
   0xf   :  { %4627 = vmatprep.subr.bf16.mxu1 %v5315_v2 }
  0x10   :  { %4398 = vmatmul.mubr.msk.f32.gmra.mrb[6].mxu0 %vm55_vm1, %v46_v16 }
  0x11   :  { %4430 = vmatprep.mubr.msk.f32.mxu0 %vm5316_vm2, %v5317_v10 }
  0x12   :  { %4629 = vmatpush3.bf16.msra.mxu1 %v5407_v12 }
  0x13   :  { %4636 = vmatprep.subr.bf16.mxu1 %v5315_v2 }
  0xd7   :  { %v4390_v17 = vpop.f32.mrb[0].mxu0 }
  0xd8   :  { %v150_v18 = vpop.f32.mrb[1].mxu0  ;;  %v5447_v27 = vadd.f32 %v4390_v17, %v4117_v21 }
  0xd9   :  { %v5445_v24 = vadd.f32 %v4117_v21, %v150_v18 }
  0xdb   :  { %v4393_v19 = vpop.f32.mrb[2].mxu0 }
  0xdc   :  { %v160_v20 = vpop.f32.mrb[3].mxu0  ;;  %v5449_v30 = vadd.f32 %v4393_v19, %v4117_v21 }
  0xdd   :  { %v5452_v34 = vadd.f32 %v4117_v21, %v160_v20 }
  0xdf   :  { %v4396_v23 = vpop.f32.mrb[4].mxu0 }
  0xe0   :  { %v263_v22 = vpop.f32.mrb[0].mxu1  ;;  %v170_v26 = vpop.f32.mrb[5].mxu0  ;;  %v5456_v39 = vadd.f32 %v4396_v23, %v4117_v21 }
  0xe1   :  { %v4410_v25 = vpop.f32.mrb[1].mxu1  ;;  %v268_v28 = vrot.slane %v263_v22, 1  ;;  %v270_v31 = vrot.slane %v263_v22, 3  ;;  %v283_v33 = vadd.f32 %v263_v22, %v5445_v24  ;;  %v269_v35 = vrot.slane %v263_v22, 2 }
  0xe2   :  { %v272_v37 = vrot.slane %v263_v22, 5  ;;  %v5459_v41 = vadd.f32 %v4117_v21, %v170_v26  ;;  %v271_v42 = vrot.slane %v263_v22, 4  ;;  %v274_v45 = vrot.slane %v263_v22, 7 }
  0xe3   :  { %v4399_v29 = vpop.f32.mrb[6].mxu0  ;;  %v284_v36 = vadd.f32 %v268_v28, %v5447_v27  ;;  %v286_v38 = vadd.f32 %v270_v31, %v5449_v30  ;;  %4739 = vtanh.f32 %v283_v33  ;;  %v285_v40 = vadd.f32 %v269_v35, %v5452_v34 }
  0xe4   :  { %v180_v32 = vpop.f32.mrb[7].mxu0  ;;  %v5461_v43 = vadd.f32 %v4399_v29, %v4117_v21  ;;  %v288_v44 = vadd.f32 %v272_v37, %v5456_v39  ;;  %v287_v47 = vadd.f32 %v271_v42, %v5459_v41  ;;  %v273_v48 = vrot.slane %v263_v22, 6 }
  0xe5   :  { %4741 = vtanh.f32 %v284_v36  ;;  %v5464_v46 = vadd.f32 %v4117_v21, %v180_v32  ;;  %v4127_v59 = vmul.f32 -1.442695, %v283_v33  ;;  %v4128_v60 = vmul.f32 -1.442695, %v284_v36 }
  0xe6   :  { %4743 = vtanh.f32 %v286_v38  ;;  %v290_v49 = vadd.f32 %v274_v45, %v5461_v43  ;;  %v4129_v61 = vmul.f32 -1.442695, %v285_v40  ;;  %v4130_v62 = vmul.f32 -1.442695, %v286_v38 }
  0xe7   :  { %4745 = vtanh.f32 %v285_v40  ;;  %v289_v51 = vadd.f32 %v273_v48, %v5464_v46  ;;  %v4131_v63 = vmul.f32 -1.442695, %v287_v47  ;;  %v4132_v0 = vmul.f32 -1.442695, %v288_v44 }
  0xe8   :  { %4747 = vtanh.f32 %v288_v44  ;;  %v4134_v6 = vmul.f32 -1.442695, %v290_v49 }
  0xe9   :  { %4749 = vtanh.f32 %v287_v47  ;;  %v4133_v3 = vmul.f32 -1.442695, %v289_v51 }
  0xea   :  { %4751 = vtanh.f32 %v290_v49 }
  0xeb   :  { %4753 = vtanh.f32 %v289_v51 }
  0xec   :  { %4755 = vpow2.f32 %v4127_v59 }
  0xed   :  { %v4740_v50 = vpop.eup %4739  ;;  %4757 = vpow2.f32 %v4128_v60 }
  0xee   :  { %363 = vrot.lane.b32.xlu1 %v4740_v50, %s5318_s3  ;;  %4759 = vpow2.f32 %v4129_v61 }
  0xef   :  { %v4742_v52 = vpop.eup %4741  ;;  %4761 = vpow2.f32 %v4130_v62 }
  0xf0   :  { %365 = vrot.lane.b32.xlu0 %v4742_v52, %s5318_s3  ;;  %v4744_v53 = vpop.eup %4743  ;;  %4763 = vpow2.f32 %v4131_v63 }
  0xf1   :  { %v4746_v54 = vpop.eup %4745  ;;  %4765 = vpow2.f32 %v4132_v0 }
  0xf2   :  { %369 = vrot.lane.b32.xlu1 %v4744_v53, %s5318_s3  ;;  %v4748_v55 = vpop.eup %4747  ;;  %4767 = vpow2.f32 %v4133_v3 }
  0xf3   :  { %v4750_v56 = vpop.eup %4749 }
  0xf4   :  { %367 = vrot.lane.b32.xlu0 %v4746_v54, %s5318_s3  ;;  %v4752_v57 = vpop.eup %4751 }
  0xf5   :  { %v4754_v58 = vpop.eup %4753 }
  0xf6   :  { %373 = vrot.lane.b32.xlu1 %v4748_v55, %s5318_s3  ;;  %v4756_v1 = vpop.eup %4755 }
  0xf7   :  { %v315_v4 = vadd.f32 1.0, %v4756_v1  ;;  %v4758_v5 = vpop.eup %4757 }
  0xf8   :  { %371 = vrot.lane.b32.xlu0 %v4750_v56, %s5318_s3  ;;  %v4760_v8 = vpop.eup %4759  ;;  %v316_v9 = vadd.f32 1.0, %v4758_v5 }
  0xf9   :  { %4769 = vrcp.f32 %v315_v4  ;;  %v4762_v11 = vpop.eup %4761  ;;  %v317_v13 = vadd.f32 1.0, %v4760_v8 }
  0xfa   :  { %377 = vrot.lane.b32.xlu1 %v4752_v57, %s5318_s3  ;;  %4771 = vpow2.f32 %v4134_v6  ;;  %v4764_v14 = vpop.eup %4763  ;;  %v318_v15 = vadd.f32 1.0, %v4762_v11 }
  0xfb   :  { %4773 = vrcp.f32 %v316_v9  ;;  %v4766_v16 = vpop.eup %4765  ;;  %v319_v17 = vadd.f32 1.0, %v4764_v14 }
  0xfc   :  { %375 = vrot.lane.b32.xlu0 %v4754_v58, %s5318_s3  ;;  %4775 = vrcp.f32 %v317_v13  ;;  %v4768_v18 = vpop.eup %4767  ;;  %v320_v19 = vadd.f32 1.0, %v4766_v16 }
  0xfd   :  { %4777 = vrcp.f32 %v318_v15  ;;  %v321_v22 = vadd.f32 1.0, %v4768_v18 }
  0xfe   :  { %4779 = vrcp.f32 %v319_v17 }
  0xff   :  { %4781 = vrcp.f32 %v320_v19 }
 0x100   :  { %4783 = vrcp.f32 %v321_v22 }
 0x103   :  { %v5477_v20 = vpop.eup %4769 }
 0x104   :  { %v4772_v23 = vpop.eup %4771  ;;  %v347_v55 = vmul.f32 0.0, %v5477_v20 }
 0x105   :  { %v5481_v28 = vpop.eup %4773  ;;  %v322_v31 = vadd.f32 1.0, %v4772_v23 }
 0x106   :  { %v5484_v33 = vpop.eup %4775  ;;  %v348_v58 = vmul.f32 0.0, %v5481_v28 }
 0x107   :  { %4785 = vrcp.f32 %v322_v31  ;;  %v5488_v37 = vpop.eup %4777  ;;  %v349_v61 = vmul.f32 0.0, %v5484_v33 }
 0x108   :  { %v5491_v38 = vpop.eup %4779  ;;  %v350_v0 = vmul.f32 0.0, %v5488_v37 }
 0x109   :  { %v5495_v47 = vpop.eup %4781  ;;  %v351_v1 = vmul.f32 0.0, %v5491_v38 }
 0x10a   :  { %v5499_v48 = vpop.eup %4783  ;;  %v352_v9 = vmul.f32 0.0, %v5495_v47 }
 0x10b   :  { %v353_v11 = vmul.f32 0.0, %v5499_v48 }
 0x111   :  { %v5505_v53 = vpop.eup %4785 }
 0x112   :  { %v354_v18 = vmul.f32 0.0, %v5505_v53 }
 0x160   :  { %v364_v21 = vpop.permute.xlu1 %363 }
 0x161   :  { %v387_v25 = vmul.f32 %v5477_v20, %v364_v21 }
 0x162   :  { %v366_v26 = vpop.permute.xlu0 %365 }
 0x163   :  { %403 = vrot.lane.b32.xlu0 %v387_v25, %s5318_s3  ;;  %v388_v32 = vmul.f32 %v5481_v28, %v366_v26 }
 0x164   :  { %v370_v29 = vpop.permute.xlu1 %369 }
 0x165   :  { %v390_v44 = vmul.f32 %v5488_v37, %v370_v29 }
 0x166   :  { %v368_v35 = vpop.permute.xlu0 %367 }
 0x167   :  { %v389_v36 = vmul.f32 %v5484_v33, %v368_v35  ;;  %405 = vrot.lane.b32.xlu0 %v388_v32, %s5318_s3 }
 0x168   :  { %v374_v40 = vpop.permute.xlu1 %373 }
 0x169   :  { %407 = vrot.lane.b32.xlu1 %v389_v36, %s5318_s3  ;;  %v392_v50 = vmul.f32 %v5495_v47, %v374_v40 }
 0x16a   :  { %v372_v42 = vpop.permute.xlu0 %371 }
 0x16b   :  { %v391_v45 = vmul.f32 %v5491_v38, %v372_v42 }
 0x16c   :  { %v378_v52 = vpop.permute.xlu1 %377 }
 0x16d   :  { %409 = vrot.lane.b32.xlu1 %v390_v44, %s5318_s3  ;;  %411 = vrot.lane.b32.xlu0 %v391_v45, %s5318_s3  ;;  %v394_v54 = vmul.f32 %v5505_v53, %v378_v52 }
 0x16e   :  { %v376_v49 = vpop.permute.xlu0 %375 }
 0x16f   :  { %v393_v51 = vmul.f32 %v5499_v48, %v376_v49 }
 0x171   :  { %413 = vrot.lane.b32.xlu1 %v392_v50, %s5318_s3  ;;  %415 = vrot.lane.b32.xlu0 %v393_v51, %s5318_s3 }
 0x175   :  { %417 = vrot.lane.b32.xlu1 %v394_v54, %s5318_s3 }
 0x1d5   :  { %v404_v56 = vpop.permute.xlu0 %403 }
 0x1d6   :  { %v5510_v57 = vadd.f32 %v404_v56, %v347_v55 }
 0x1d8   :  { %4787 = vtanh.f32 %v5510_v57 }
 0x1d9   :  { %v406_v59 = vpop.permute.xlu0 %405 }
 0x1da   :  { %v5514_v60 = vadd.f32 %v406_v59, %v348_v58 }
 0x1db   :  { %v408_v62 = vpop.permute.xlu1 %407 }
 0x1dc   :  { %4789 = vtanh.f32 %v5514_v60  ;;  %v5518_v63 = vadd.f32 %v408_v62, %v349_v61 }
 0x1de   :  { %4791 = vtanh.f32 %v5518_v63 }
 0x1df   :  { %v410_v3 = vpop.permute.xlu1 %409  ;;  %v412_v4 = vpop.permute.xlu0 %411 }
 0x1e0   :  { %v5523_v5 = vadd.f32 %v410_v3, %v350_v0  ;;  %v5525_v6 = vadd.f32 %v412_v4, %v351_v1 }
 0x1e2   :  { %v4788_v8 = vpop.eup %4787  ;;  %4793 = vtanh.f32 %v5523_v5 }
 0x1e3   :  { %4795 = vtanh.f32 %v5525_v6  ;;  %v414_v13 = vpop.permute.xlu1 %413  ;;  %v416_v14 = vpop.permute.xlu0 %415  ;;  %451 = vrot.lane.b32.xlu0 %v4788_v8, %s5318_s3 }
 0x1e4   :  { %v5532_v15 = vadd.f32 %v414_v13, %v352_v9  ;;  %v5534_v16 = vadd.f32 %v416_v14, %v353_v11 }
 0x1e6   :  { %v4790_v17 = vpop.eup %4789  ;;  %4797 = vtanh.f32 %v5532_v15 }
 0x1e7   :  { %4799 = vtanh.f32 %v5534_v16  ;;  %v418_v19 = vpop.permute.xlu1 %417  ;;  %453 = vrot.lane.b32.xlu0 %v4790_v17, %s5318_s3 }
 0x1e8   :  { %v4792_v21 = vpop.eup %4791  ;;  %v5540_v22 = vadd.f32 %v418_v19, %v354_v18 }
 0x1e9   :  { %455 = vrot.lane.b32.xlu1 %v4792_v21, %s5318_s3 }
 0x1ea   :  { %4801 = vtanh.f32 %v5540_v22 }
 0x1ec   :  { %v4794_v23 = vpop.eup %4793 }
 0x1ed   :  { %v4796_v25 = vpop.eup %4795  ;;  %457 = vrot.lane.b32.xlu1 %v4794_v23, %s5318_s3 }
 0x1ee   :  { %459 = vrot.lane.b32.xlu0 %v4796_v25, %s5318_s3 }
 0x1f0   :  { %v4798_v26 = vpop.eup %4797 }
 0x1f1   :  { %v4800_v29 = vpop.eup %4799  ;;  %461 = vrot.lane.b32.xlu1 %v4798_v26, %s5318_s3 }
 0x1f2   :  { %463 = vrot.lane.b32.xlu0 %v4800_v29, %s5318_s3 }
 0x1f4   :  { %v4802_v31 = vpop.eup %4801 }
 0x1f5   :  { %465 = vrot.lane.b32.xlu1 %v4802_v31, %s5318_s3 }
 0x255   :  { %v452_v32 = vpop.permute.xlu0 %451 }
 0x256   :  { %v475_v45 = vmul.f32 %v5477_v20, %v452_v32 }
 0x259   :  { %v454_v35 = vpop.permute.xlu0 %453 }
 0x25a   :  { %v476_v36 = vmul.f32 %v5481_v28, %v454_v35 }
 0x25b   :  { %v456_v40 = vpop.permute.xlu1 %455 }
 0x25c   :  { %v491_v42 = vrot.slane %v476_v36, 7  ;;  %v477_v44 = vmul.f32 %v5484_v33, %v456_v40 }
 0x25e   :  { %v494_v49 = vrot.slane %v477_v44, 6  ;;  %v493_v51 = vsel %vm492_vm3, %v491_v42, %v475_v45 }
 0x25f   :  { %v458_v50 = vpop.permute.xlu1 %457 }
 0x260   :  { %v478_v52 = vmul.f32 %v5488_v37, %v458_v50  ;;  %v460_v54 = vpop.permute.xlu0 %459  ;;  %v496_v28 = vsel %vm495_vm4, %v494_v49, %v493_v51 }
 0x261   :  { %v479_v55 = vmul.f32 %v5491_v38, %v460_v54 }
 0x262   :  { %v497_v56 = vrot.slane %v478_v52, 5 }
 0x263   :  { %v500_v58 = vrot.slane %v479_v55, 4  ;;  %v462_v59 = vpop.permute.xlu1 %461 }
 0x264   :  { %v499_v33 = vsel %vm498_vm5, %v497_v56, %v496_v28  ;;  %v480_v20 = vmul.f32 %v5495_v47, %v462_v59  ;;  %v464_v61 = vpop.permute.xlu0 %463 }
 0x265   :  { %v481_v62 = vmul.f32 %v5499_v48, %v464_v61  ;;  %v502_v37 = vsel %vm501_vm6, %v500_v58, %v499_v33 }
 0x266   :  { %v503_v0 = vrot.slane %v480_v20, 3 }
 0x267   :  { %v506_v1 = vrot.slane %v481_v62, 2  ;;  %v466_v3 = vpop.permute.xlu1 %465 }
 0x268   :  { %v482_v38 = vmul.f32 %v5505_v53, %v466_v3  ;;  %v505_v4 = vsel %vm504_vm7, %v503_v0, %v502_v37 }
 0x269   :  { %v508_v9 = vsel %vm507_vm8, %v506_v1, %v505_v4 }
 0x26a   :  { %v509_v8 = vrot.slane %v482_v38, 1 }
 0x26c   :  { %v511_v47 = vsel %vm510_vm9, %v509_v8, %v508_v9 }
 0x26d   :  { %512 = vrot.lane.b32.xlu0 %v511_v47, %s5319_s13 }
 0x2df   :  { %v5565_v48 = vpop.permute.xlu0 %512 }
 0x2e0   :  { %4420 = vmatmul.mubr.msk.f32.vlgmr.msra.gmra.mrb[2].mxu1 %vm193_vm10, %v5565_v48 }
 0x2e1   :  { %4638 = vmatpush3.bf16.msra.mxu1 %v5390_v7  ;;  %4441 = vmatprep.mubr.msk.f32.mxu1 %vm5316_vm2, %v5317_v10 }
 0x2e2   :  { %4639 = vmatprep.subr.bf16.mxu1 %v5315_v2 }
 0x2e5   :  { %4641 = vmatpush3.bf16.msra.mxu1 %v5407_v12 }
 0x2e6   :  { %4648 = vmatprep.subr.bf16.mxu1 %v5315_v2 }
 0x3b3   :  { %v582_v53 = vpop.f32.mrb[2].mxu1 }
 0x3b4   :  { %v4421_v11 = vpop.f32.mrb[3].mxu1  ;;  %v588_v13 = vrot.slane %v582_v53, 1  ;;  %v587_v14 = vrot.slane %v582_v53, 7  ;;  %v603_v17 = vadd.f32 %v582_v53, %v5447_v27  ;;  %v589_v18 = vrot.slane %v582_v53, 2 }
 0x3b5   :  { %v590_v21 = vrot.slane %v582_v53, 3  ;;  %v591_v25 = vrot.slane %v582_v53, 4  ;;  %v592_v29 = vrot.slane %v582_v53, 5  ;;  %v593_v32 = vrot.slane %v582_v53, 6 }
 0x3b6   :  { %v604_v19 = vadd.f32 %v588_v13, %v5452_v34  ;;  %v602_v23 = vadd.f32 %v587_v14, %v5445_v24  ;;  %4803 = vtanh.f32 %v603_v17  ;;  %v605_v26 = vadd.f32 %v589_v18, %v5449_v30 }
 0x3b7   :  { %v606_v31 = vadd.f32 %v590_v21, %v5459_v41  ;;  %v607_v35 = vadd.f32 %v591_v25, %v5456_v39  ;;  %v608_v36 = vadd.f32 %v592_v29, %v5464_v46  ;;  %v609_v40 = vadd.f32 %v593_v32, %v5461_v43 }
 0x3b8   :  { %4805 = vtanh.f32 %v604_v19  ;;  %v4137_v55 = vmul.f32 -1.442695, %v603_v17  ;;  %v4138_v56 = vmul.f32 -1.442695, %v604_v19  ;;  %v4136_v28 = vmul.f32 -1.442695, %v602_v23 }
 0x3b9   :  { %4807 = vtanh.f32 %v602_v23  ;;  %v4139_v58 = vmul.f32 -1.442695, %v605_v26  ;;  %v4140_v59 = vmul.f32 -1.442695, %v606_v31  ;;  %v4141_v33 = vmul.f32 -1.442695, %v607_v35 }
 0x3ba   :  { %4809 = vtanh.f32 %v605_v26  ;;  %v4142_v20 = vmul.f32 -1.442695, %v608_v36  ;;  %v4143_v61 = vmul.f32 -1.442695, %v609_v40 }
 0x3bb   :  { %4811 = vtanh.f32 %v606_v31 }
 0x3bc   :  { %4813 = vtanh.f32 %v607_v35 }
 0x3bd   :  { %4815 = vtanh.f32 %v608_v36 }
 0x3be   :  { %4817 = vtanh.f32 %v609_v40 }
 0x3bf   :  { %4819 = vpow2.f32 %v4137_v55 }
 0x3c0   :  { %v4804_v42 = vpop.eup %4803  ;;  %4821 = vpow2.f32 %v4138_v56 }
 0x3c1   :  { %708 = vrot.lane.b32.xlu1 %v4804_v42, %s5318_s3  ;;  %4823 = vpow2.f32 %v4136_v28 }
 0x3c2   :  { %v4806_v44 = vpop.eup %4805  ;;  %4825 = vpow2.f32 %v4139_v58 }
 0x3c3   :  { %710 = vrot.lane.b32.xlu0 %v4806_v44, %s5318_s3  ;;  %v4808_v45 = vpop.eup %4807  ;;  %4827 = vpow2.f32 %v4140_v59 }
 0x3c4   :  { %v4810_v49 = vpop.eup %4809  ;;  %4829 = vpow2.f32 %v4141_v33  ;;  %v675_v33 = vrot.slane %v5514_v60, 7 }
 0x3c5   :  { %706 = vrot.lane.b32.xlu1 %v4808_v45, %s5318_s3  ;;  %v4812_v50 = vpop.eup %4811  ;;  %4831 = vpow2.f32 %v4142_v20  ;;  %v676_v20 = vrot.slane %v5518_v63, 7 }
 0x3c6   :  { %v4814_v51 = vpop.eup %4813  ;;  %4833 = vpow2.f32 %v4143_v61 }
 0x3c7   :  { %712 = vrot.lane.b32.xlu0 %v4810_v49, %s5318_s3  ;;  %v4816_v52 = vpop.eup %4815 }
 0x3c8   :  { %v4818_v54 = vpop.eup %4817 }
 0x3c9   :  { %714 = vrot.lane.b32.xlu1 %v4812_v50, %s5318_s3  ;;  %v4820_v62 = vpop.eup %4819 }
 0x3ca   :  { %v4822_v0 = vpop.eup %4821  ;;  %v635_v37 = vadd.f32 1.0, %v4820_v62 }
 0x3cb   :  { %716 = vrot.lane.b32.xlu0 %v4814_v51, %s5318_s3  ;;  %v4824_v1 = vpop.eup %4823  ;;  %v636_v3 = vadd.f32 1.0, %v4822_v0 }
 0x3cc   :  { %v4826_v38 = vpop.eup %4825  ;;  %4835 = vrcp.f32 %v635_v37  ;;  %v634_v4 = vadd.f32 1.0, %v4824_v1  ;;  %v674_v37 = vrot.slane %v5510_v57, 7 }
 0x3cd   :  { %718 = vrot.lane.b32.xlu1 %v4816_v52, %s5318_s3  ;;  %v4828_v8 = vpop.eup %4827  ;;  %4837 = vrcp.f32 %v636_v3  ;;  %v637_v9 = vadd.f32 1.0, %v4826_v38  ;;  %v677_v38 = vrot.slane %v5523_v5, 7 }
 0x3ce   :  { %v4830_v47 = vpop.eup %4829  ;;  %4839 = vrcp.f32 %v634_v4  ;;  %v638_v53 = vadd.f32 1.0, %v4828_v8 }
 0x3cf   :  { %720 = vrot.lane.b32.xlu0 %v4818_v54, %s5318_s3  ;;  %v4832_v11 = vpop.eup %4831  ;;  %4841 = vrcp.f32 %v637_v9  ;;  %v639_v13 = vadd.f32 1.0, %v4830_v47  ;;  %v678_v9 = vrot.slane %v5525_v6, 7 }
 0x3d0   :  { %v4834_v14 = vpop.eup %4833  ;;  %4843 = vrcp.f32 %v638_v53  ;;  %v640_v17 = vadd.f32 1.0, %v4832_v11  ;;  %v679_v53 = vrot.slane %v5532_v15, 7 }
 0x3d1   :  { %4845 = vrcp.f32 %v639_v13  ;;  %v641_v18 = vadd.f32 1.0, %v4834_v14 }
 0x3d2   :  { %4847 = vrcp.f32 %v640_v17  ;;  %v680_v17 = vrot.slane %v5534_v16, 7 }
 0x3d3   :  { %4849 = vrcp.f32 %v641_v18 }
 0x3d6   :  { %v5591_v19 = vpop.eup %4835 }
 0x3d7   :  { %v5593_v23 = vpop.eup %4837  ;;  %v691_v61 = vmul.f32 %v5591_v19, %v675_v33 }
 0x3d8   :  { %v5598_v31 = vpop.eup %4839  ;;  %v692_v0 = vmul.f32 %v5593_v23, %v676_v20 }
 0x3d9   :  { %v5601_v35 = vpop.eup %4841  ;;  %v690_v60 = vmul.f32 %v5598_v31, %v674_v37 }
 0x3da   :  { %v5606_v44 = vpop.eup %4843  ;;  %v693_v8 = vmul.f32 %v5601_v35, %v677_v38 }
 0x3db   :  { %v5609_v49 = vpop.eup %4845  ;;  %v694_v5 = vmul.f32 %v5606_v44, %v678_v9 }
 0x3dc   :  { %v5614_v54 = vpop.eup %4847  ;;  %v695_v14 = vmul.f32 %v5609_v49, %v679_v53 }
 0x3dd   :  { %v5617_v56 = vpop.eup %4849  ;;  %v696_v15 = vmul.f32 %v5614_v54, %v680_v17 }
 0x433   :  { %v709_v21 = vpop.permute.xlu1 %708 }
 0x434   :  { %v731_v25 = vmul.f32 %v5591_v19, %v709_v21  ;;  %v681_v21 = vrot.slane %v5540_v22, 7 }
 0x435   :  { %v711_v26 = vpop.permute.xlu0 %710 }
 0x436   :  { %v732_v29 = vmul.f32 %v5593_v23, %v711_v26  ;;  %748 = vrot.lane.b32.xlu1 %v731_v25, %s5318_s3 }
 0x437   :  { %v707_v32 = vpop.permute.xlu1 %706 }
 0x438   :  { %750 = vrot.lane.b32.xlu0 %v732_v29, %s5318_s3  ;;  %v730_v36 = vmul.f32 %v5598_v31, %v707_v32  ;;  %v697_v29 = vmul.f32 %v5617_v56, %v681_v21 }
 0x439   :  { %v713_v40 = vpop.permute.xlu0 %712 }
 0x43a   :  { %v733_v42 = vmul.f32 %v5601_v35, %v713_v40  ;;  %746 = vrot.lane.b32.xlu1 %v730_v36, %s5318_s3 }
 0x43b   :  { %v715_v45 = vpop.permute.xlu1 %714 }
 0x43c   :  { %752 = vrot.lane.b32.xlu0 %v733_v42, %s5318_s3  ;;  %v734_v50 = vmul.f32 %v5606_v44, %v715_v45 }
 0x43d   :  { %v717_v51 = vpop.permute.xlu0 %716 }
 0x43e   :  { %v735_v52 = vmul.f32 %v5609_v49, %v717_v51  ;;  %754 = vrot.lane.b32.xlu1 %v734_v50, %s5318_s3 }
 0x43f   :  { %v719_v55 = vpop.permute.xlu1 %718 }
 0x440   :  { %756 = vrot.lane.b32.xlu0 %v735_v52, %s5318_s3  ;;  %v736_v28 = vmul.f32 %v5614_v54, %v719_v55 }
 0x441   :  { %v721_v58 = vpop.permute.xlu0 %720 }
 0x442   :  { %v737_v59 = vmul.f32 %v5617_v56, %v721_v58  ;;  %758 = vrot.lane.b32.xlu1 %v736_v28, %s5318_s3 }
 0x444   :  { %760 = vrot.lane.b32.xlu0 %v737_v59, %s5318_s3 }
 0x4a8   :  { %v749_v62 = vpop.permute.xlu1 %748 }
 0x4a9   :  { %v5628_v1 = vadd.f32 %v749_v62, %v691_v61 }
 0x4aa   :  { %v751_v3 = vpop.permute.xlu0 %750 }
 0x4ab   :  { %v5631_v4 = vadd.f32 %v751_v3, %v692_v0  ;;  %4851 = vtanh.f32 %v5628_v1 }
 0x4ac   :  { %v747_v63 = vpop.permute.xlu1 %746 }
 0x4ad   :  { %4853 = vtanh.f32 %v5631_v4  ;;  %v5638_v47 = vadd.f32 %v747_v63, %v690_v60 }
 0x4ae   :  { %v753_v57 = vpop.permute.xlu0 %752 }
 0x4af   :  { %v5641_v11 = vadd.f32 %v753_v57, %v693_v8  ;;  %4855 = vtanh.f32 %v5638_v47 }
 0x4b0   :  { %v755_v13 = vpop.permute.xlu1 %754 }
 0x4b1   :  { %4857 = vtanh.f32 %v5641_v11  ;;  %v5648_v18 = vadd.f32 %v755_v13, %v694_v5 }
 0x4b2   :  { %v757_v6 = vpop.permute.xlu0 %756 }
 0x4b3   :  { %v5651_v25 = vadd.f32 %v757_v6, %v695_v14  ;;  %4859 = vtanh.f32 %v5648_v18 }
 0x4b4   :  { %v759_v26 = vpop.permute.xlu1 %758 }
 0x4b5   :  { %4861 = vtanh.f32 %v5651_v25  ;;  %v4852_v32 = vpop.eup %4851  ;;  %v5657_v36 = vadd.f32 %v759_v26, %v696_v15 }
 0x4b6   :  { %v761_v16 = vpop.permute.xlu0 %760  ;;  %796 = vrot.lane.b32.xlu1 %v4852_v32, %s5318_s3 }
 0x4b7   :  { %v4854_v40 = vpop.eup %4853  ;;  %v5659_v42 = vadd.f32 %v761_v16, %v697_v29  ;;  %4863 = vtanh.f32 %v5657_v36 }
 0x4b8   :  { %798 = vrot.lane.b32.xlu0 %v4854_v40, %s5318_s3 }
 0x4b9   :  { %4865 = vtanh.f32 %v5659_v42  ;;  %v4856_v22 = vpop.eup %4855 }
 0x4ba   :  { %794 = vrot.lane.b32.xlu1 %v4856_v22, %s5318_s3 }
 0x4bb   :  { %v4858_v45 = vpop.eup %4857 }
 0x4bc   :  { %800 = vrot.lane.b32.xlu0 %v4858_v45, %s5318_s3 }
 0x4bd   :  { %v4860_v50 = vpop.eup %4859 }
 0x4be   :  { %802 = vrot.lane.b32.xlu1 %v4860_v50, %s5318_s3 }
 0x4bf   :  { %v4862_v51 = vpop.eup %4861 }
 0x4c0   :  { %804 = vrot.lane.b32.xlu0 %v4862_v51, %s5318_s3 }
 0x4c1   :  { %v4864_v52 = vpop.eup %4863 }
 0x4c2   :  { %806 = vrot.lane.b32.xlu1 %v4864_v52, %s5318_s3 }
 0x4c3   :  { %v4866_v55 = vpop.eup %4865 }
 0x4c4   :  { %808 = vrot.lane.b32.xlu0 %v4866_v55, %s5318_s3 }
 0x528   :  { %v797_v28 = vpop.permute.xlu1 %796 }
 0x529   :  { %v819_v0 = vmul.f32 %v5591_v19, %v797_v28 }
 0x52a   :  { %v799_v58 = vpop.permute.xlu0 %798 }
 0x52b   :  { %v820_v59 = vmul.f32 %v5593_v23, %v799_v58 }
 0x52c   :  { %v795_v33 = vpop.permute.xlu1 %794 }
 0x52d   :  { %v818_v20 = vmul.f32 %v5598_v31, %v795_v33  ;;  %v836_v3 = vrot.slane %v820_v59, 7 }
 0x52e   :  { %v801_v61 = vpop.permute.xlu0 %800 }
 0x52f   :  { %v821_v62 = vmul.f32 %v5601_v35, %v801_v61  ;;  %v834_v37 = vrot.slane %v818_v20, 1 }
 0x530   :  { %v803_v60 = vpop.permute.xlu1 %802 }
 0x531   :  { %v838_v38 = vrot.slane %v821_v62, 6  ;;  %v835_v63 = vsel %vm492_vm3, %v819_v0, %v834_v37  ;;  %v822_v8 = vmul.f32 %v5606_v44, %v803_v60 }
 0x532   :  { %v805_v9 = vpop.permute.xlu0 %804  ;;  %v837_v57 = vsel %vm495_vm4, %v836_v3, %v835_v63 }
 0x533   :  { %v823_v23 = vmul.f32 %v5609_v49, %v805_v9  ;;  %v839_v31 = vsel %vm498_vm5, %v838_v38, %v837_v57  ;;  %v840_v53 = vrot.slane %v822_v8, 5 }
 0x534   :  { %v807_v35 = vpop.permute.xlu1 %806 }
 0x535   :  { %v842_v5 = vrot.slane %v823_v23, 4  ;;  %v841_v19 = vsel %vm501_vm6, %v840_v53, %v839_v31  ;;  %v824_v13 = vmul.f32 %v5614_v54, %v807_v35 }
 0x536   :  { %v809_v14 = vpop.permute.xlu0 %808 }
 0x537   :  { %v825_v17 = vmul.f32 %v5617_v56, %v809_v14  ;;  %v843_v6 = vsel %vm504_vm7, %v842_v5, %v841_v19  ;;  %v844_v44 = vrot.slane %v824_v13, 3 }
 0x539   :  { %v846_v21 = vrot.slane %v825_v17, 2  ;;  %v845_v15 = vsel %vm507_vm8, %v844_v44, %v843_v6 }
 0x53b   :  { %v5686_v49 = vsel %vm510_vm9, %v846_v21, %v845_v15 }
 0x53c   :  { %848 = vrot.lane.b32.xlu1 %v5686_v49, %s5319_s13 }
 0x5ae   :  { %v849_v26 = vpop.permute.xlu1 %848 }
 0x5af   :  { %4431 = vmatmul.mubr.msk.f32.vlgmr.msra.gmra.mrb[8].mxu0 %vm193_vm10, %v849_v26 }
 0x5b0   :  { %4644 = vmatpush3.bf16.msra.mxu0 %v5390_v7  ;;  %4452 = vmatprep.mubr.msk.f32.mxu0 %vm5316_vm2, %v5317_v10 }
 0x5b1   :  { %4645 = vmatprep.subr.bf16.mxu0 %v5315_v2 }
 0x5b4   :  { %4647 = vmatpush3.bf16.msra.mxu0 %v5407_v12 }
 0x5b5   :  { %4654 = vmatprep.subr.bf16.mxu0 %v5315_v2 }
 0x682   :  { %v918_v54 = vpop.f32.mrb[8].mxu0 }
 0x683   :  { %v923_v56 = vrot.slane %v918_v54, 6  ;;  %v4432_v29 = vpop.f32.mrb[9].mxu0  ;;  %v925_v16 = vrot.slane %v918_v54, 1  ;;  %v924_v40 = vrot.slane %v918_v54, 7  ;;  %v940_v22 = vadd.f32 %v918_v54, %v5452_v34 }
 0x684   :  { %v926_v45 = vrot.slane %v918_v54, 2  ;;  %v927_v52 = vrot.slane %v918_v54, 3  ;;  %v928_v28 = vrot.slane %v918_v54, 4  ;;  %v929_v59 = vrot.slane %v918_v54, 5 }
 0x685   :  { %v938_v32 = vadd.f32 %v923_v56, %v5445_v24  ;;  %v941_v50 = vadd.f32 %v925_v16, %v5449_v30  ;;  %v939_v55 = vadd.f32 %v924_v40, %v5447_v27  ;;  %v4147_v9 = vmul.f32 -1.442695, %v940_v22 }
 0x686   :  { %v942_v58 = vadd.f32 %v926_v45, %v5459_v41  ;;  %v943_v33 = vadd.f32 %v927_v52, %v5456_v39  ;;  %v944_v20 = vadd.f32 %v928_v28, %v5464_v46  ;;  %v945_v61 = vadd.f32 %v929_v59, %v5461_v43 }
 0x687   :  { %4867 = vtanh.f32 %v938_v32  ;;  %v4145_v8 = vmul.f32 -1.442695, %v938_v32  ;;  %v4148_v57 = vmul.f32 -1.442695, %v941_v50  ;;  %v4146_v31 = vmul.f32 -1.442695, %v939_v55 }
 0x688   :  { %4869 = vtanh.f32 %v940_v22  ;;  %v4149_v53 = vmul.f32 -1.442695, %v942_v58  ;;  %v4150_v35 = vmul.f32 -1.442695, %v943_v33  ;;  %v4151_v19 = vmul.f32 -1.442695, %v944_v20 }
 0x689   :  { %4871 = vtanh.f32 %v941_v50  ;;  %v4152_v13 = vmul.f32 -1.442695, %v945_v61 }
 0x68a   :  { %4873 = vtanh.f32 %v939_v55 }
 0x68b   :  { %4875 = vtanh.f32 %v942_v58 }
 0x68c   :  { %4877 = vtanh.f32 %v943_v33 }
 0x68d   :  { %4879 = vtanh.f32 %v944_v20 }
 0x68e   :  { %4881 = vtanh.f32 %v945_v61 }
 0x68f   :  { %4883 = vpow2.f32 %v4145_v8 }
 0x690   :  { %4885 = vpow2.f32 %v4147_v9 }
 0x691   :  { %v4868_v51 = vpop.eup %4867  ;;  %4887 = vpow2.f32 %v4148_v57 }
 0x692   :  { %1042 = vrot.lane.b32.xlu0 %v4868_v51, %s5318_s3  ;;  %v4870_v62 = vpop.eup %4869  ;;  %4889 = vpow2.f32 %v4146_v31 }
 0x693   :  { %v4872_v0 = vpop.eup %4871  ;;  %1046 = vrot.lane.b32.xlu1 %v4870_v62, %s5318_s3  ;;  %4891 = vpow2.f32 %v4149_v53 }
 0x694   :  { %v4874_v37 = vpop.eup %4873 }
 0x695   :  { %v4876_v3 = vpop.eup %4875 }
 0x696   :  { %1048 = vrot.lane.b32.xlu0 %v4872_v0, %s5318_s3  ;;  %v4878_v38 = vpop.eup %4877 }
 0x697   :  { %1044 = vrot.lane.b32.xlu1 %v4874_v37, %s5318_s3  ;;  %v4880_v60 = vpop.eup %4879 }
 0x698   :  { %v4882_v63 = vpop.eup %4881 }
 0x699   :  { %v4884_v23 = vpop.eup %4883 }
 0x69a   :  { %1050 = vrot.lane.b32.xlu0 %v4876_v3, %s5318_s3  ;;  %v970_v5 = vadd.f32 1.0, %v4884_v23  ;;  %v4886_v14 = vpop.eup %4885 }
 0x69b   :  { %1052 = vrot.lane.b32.xlu1 %v4878_v38, %s5318_s3  ;;  %v4888_v17 = vpop.eup %4887  ;;  %v972_v6 = vadd.f32 1.0, %v4886_v14  ;;  %v1012_v14 = vrot.slane %v5631_v4, 7 }
 0x69c   :  { %4893 = vrcp.f32 %v970_v5  ;;  %v4890_v44 = vpop.eup %4889  ;;  %v973_v21 = vadd.f32 1.0, %v4888_v17  ;;  %v1010_v5 = vrot.slane %v5638_v47, 7  ;;  %v1013_v17 = vrot.slane %v5641_v11, 7 }
 0x69d   :  { %4895 = vpow2.f32 %v4150_v35  ;;  %v4892_v15 = vpop.eup %4891  ;;  %v971_v56 = vadd.f32 1.0, %v4890_v44 }
 0x69e   :  { %1054 = vrot.lane.b32.xlu0 %v4880_v60, %s5318_s3  ;;  %4897 = vpow2.f32 %v4151_v19  ;;  %v974_v16 = vadd.f32 1.0, %v4892_v15  ;;  %v1011_v15 = vrot.slane %v5628_v1, 7  ;;  %v1015_v1 = vrot.slane %v5651_v25, 7 }
 0x69f   :  { %1056 = vrot.lane.b32.xlu1 %v4882_v63, %s5318_s3  ;;  %4899 = vpow2.f32 %v4152_v13 }
 0x6a0   :  { %4901 = vrcp.f32 %v972_v6 }
 0x6a1   :  { %4903 = vrcp.f32 %v973_v21 }
 0x6a2   :  { %4905 = vrcp.f32 %v971_v56  ;;  %v1014_v56 = vrot.slane %v5648_v18, 7  ;;  %v1016_v18 = vrot.slane %v5657_v36, 7 }
 0x6a3   :  { %4907 = vrcp.f32 %v974_v16 }
 0x6a6   :  { %v5713_v26 = vpop.eup %4893 }
 0x6a7   :  { %v4896_v29 = vpop.eup %4895  ;;  %v1026_v35 = vmul.f32 %v5713_v26, %v1010_v5 }
 0x6a8   :  { %v4898_v40 = vpop.eup %4897  ;;  %v975_v22 = vadd.f32 1.0, %v4896_v29 }
 0x6a9   :  { %v4900_v45 = vpop.eup %4899  ;;  %v976_v50 = vadd.f32 1.0, %v4898_v40 }
 0x6aa   :  { %4909 = vrcp.f32 %v975_v22  ;;  %v977_v51 = vadd.f32 1.0, %v4900_v45  ;;  %v5717_v52 = vpop.eup %4901 }
 0x6ab   :  { %4911 = vrcp.f32 %v976_v50  ;;  %v5719_v28 = vpop.eup %4903  ;;  %v1028_v6 = vmul.f32 %v5717_v52, %v1012_v14 }
 0x6ac   :  { %4913 = vrcp.f32 %v977_v51  ;;  %v5724_v20 = vpop.eup %4905  ;;  %v1029_v21 = vmul.f32 %v5719_v28, %v1013_v17 }
 0x6ad   :  { %v5727_v62 = vpop.eup %4907  ;;  %v1027_v4 = vmul.f32 %v5724_v20, %v1011_v15 }
 0x6ae   :  { %v1030_v16 = vmul.f32 %v5727_v62, %v1014_v56 }
 0x6b4   :  { %v5732_v38 = vpop.eup %4909 }
 0x6b5   :  { %v5735_v63 = vpop.eup %4911  ;;  %v1031_v50 = vmul.f32 %v5732_v38, %v1015_v1 }
 0x6b6   :  { %v5740_v23 = vpop.eup %4913 }
 0x704   :  { %v1043_v54 = vpop.permute.xlu0 %1042 }
 0x705   :  { %v1066_v32 = vmul.f32 %v5713_v26, %v1043_v54  ;;  %v1047_v55 = vpop.permute.xlu1 %1046 }
 0x706   :  { %v1068_v58 = vmul.f32 %v5717_v52, %v1047_v55  ;;  %v1032_v55 = vmul.f32 %v5735_v63, %v1016_v18 }
 0x707   :  { %1082 = vrot.lane.b32.xlu0 %v1066_v32, %s5318_s3 }
 0x708   :  { %v1049_v59 = vpop.permute.xlu0 %1048  ;;  %1086 = vrot.lane.b32.xlu1 %v1068_v58, %s5318_s3  ;;  %v1017_v58 = vrot.slane %v5659_v42, 7 }
 0x709   :  { %v1069_v33 = vmul.f32 %v5719_v28, %v1049_v59  ;;  %v1045_v61 = vpop.permute.xlu1 %1044 }
 0x70a   :  { %v1067_v0 = vmul.f32 %v5724_v20, %v1045_v61  ;;  %v1033_v36 = vmul.f32 %v5740_v23, %v1017_v58 }
 0x70b   :  { %1088 = vrot.lane.b32.xlu0 %v1069_v33, %s5318_s3 }
 0x70c   :  { %v1051_v37 = vpop.permute.xlu0 %1050  ;;  %1084 = vrot.lane.b32.xlu1 %v1067_v0, %s5318_s3 }
 0x70d   :  { %v1070_v3 = vmul.f32 %v5727_v62, %v1051_v37  ;;  %v1053_v60 = vpop.permute.xlu1 %1052 }
 0x70e   :  { %v1071_v8 = vmul.f32 %v5732_v38, %v1053_v60 }
 0x70f   :  { %1090 = vrot.lane.b32.xlu0 %v1070_v3, %s5318_s3 }
 0x710   :  { %v1055_v9 = vpop.permute.xlu0 %1054  ;;  %1092 = vrot.lane.b32.xlu1 %v1071_v8, %s5318_s3 }
 0x711   :  { %v1072_v57 = vmul.f32 %v5735_v63, %v1055_v9  ;;  %v1057_v31 = vpop.permute.xlu1 %1056 }
 0x712   :  { %v1073_v53 = vmul.f32 %v5740_v23, %v1057_v31 }
 0x713   :  { %1094 = vrot.lane.b32.xlu0 %v1072_v57, %s5318_s3 }
 0x714   :  { %1096 = vrot.lane.b32.xlu1 %v1073_v53, %s5318_s3 }
 0x779   :  { %v1083_v19 = vpop.permute.xlu0 %1082 }
 0x77a   :  { %v5747_v13 = vadd.f32 %v1083_v19, %v1026_v35  ;;  %v1087_v44 = vpop.permute.xlu1 %1086 }
 0x77b   :  { %v5755_v54 = vadd.f32 %v1087_v44, %v1028_v6 }
 0x77c   :  { %4915 = vtanh.f32 %v5747_v13 }
 0x77d   :  { %v1089_v47 = vpop.permute.xlu0 %1088  ;;  %4917 = vtanh.f32 %v5755_v54 }
 0x77e   :  { %v5758_v29 = vadd.f32 %v1089_v47, %v1029_v21  ;;  %v1085_v11 = vpop.permute.xlu1 %1084 }
 0x77f   :  { %v5766_v40 = vadd.f32 %v1085_v11, %v1027_v4 }
 0x780   :  { %4919 = vtanh.f32 %v5758_v29 }
 0x781   :  { %v1091_v22 = vpop.permute.xlu0 %1090  ;;  %4921 = vtanh.f32 %v5766_v40 }
 0x782   :  { %v5769_v45 = vadd.f32 %v1091_v22, %v1030_v16  ;;  %v1093_v51 = vpop.permute.xlu1 %1092 }
 0x783   :  { %v5776_v59 = vadd.f32 %v1093_v51, %v1031_v50 }
 0x784   :  { %4923 = vtanh.f32 %v5769_v45 }
 0x785   :  { %v1095_v25 = vpop.permute.xlu0 %1094  ;;  %4925 = vtanh.f32 %v5776_v59 }
 0x786   :  { %v4916_v32 = vpop.eup %4915  ;;  %v5778_v33 = vadd.f32 %v1095_v25, %v1032_v55  ;;  %v1097_v61 = vpop.permute.xlu1 %1096 }
 0x787   :  { %1130 = vrot.lane.b32.xlu0 %v4916_v32, %s5318_s3  ;;  %v4918_v0 = vpop.eup %4917  ;;  %v5783_v37 = vadd.f32 %v1097_v61, %v1033_v36 }
 0x788   :  { %4927 = vtanh.f32 %v5778_v33  ;;  %1134 = vrot.lane.b32.xlu1 %v4918_v0, %s5318_s3 }
 0x789   :  { %4929 = vtanh.f32 %v5783_v37 }
 0x78a   :  { %v4920_v3 = vpop.eup %4919 }
 0x78b   :  { %1136 = vrot.lane.b32.xlu0 %v4920_v3, %s5318_s3  ;;  %v4922_v42 = vpop.eup %4921 }
 0x78c   :  { %1132 = vrot.lane.b32.xlu1 %v4922_v42, %s5318_s3 }
 0x78e   :  { %v4924_v60 = vpop.eup %4923 }
 0x78f   :  { %1138 = vrot.lane.b32.xlu0 %v4924_v60, %s5318_s3  ;;  %v4926_v8 = vpop.eup %4925 }
 0x790   :  { %1140 = vrot.lane.b32.xlu1 %v4926_v8, %s5318_s3 }
 0x792   :  { %v4928_v9 = vpop.eup %4927 }
 0x793   :  { %1142 = vrot.lane.b32.xlu0 %v4928_v9, %s5318_s3  ;;  %v4930_v57 = vpop.eup %4929 }
 0x794   :  { %1144 = vrot.lane.b32.xlu1 %v4930_v57, %s5318_s3 }
 0x7f9   :  { %v1131_v31 = vpop.permute.xlu0 %1130 }
 0x7fa   :  { %v1135_v53 = vpop.permute.xlu1 %1134  ;;  %v1154_v35 = vmul.f32 %v5713_v26, %v1131_v31 }
 0x7fb   :  { %v1156_v32 = vmul.f32 %v5717_v52, %v1135_v53 }
 0x7fc   :  { %v1170_v21 = vrot.slane %v1154_v35, 2 }
 0x7fd   :  { %v1137_v5 = vpop.permute.xlu0 %1136 }
 0x7fe   :  { %v1157_v19 = vmul.f32 %v5719_v28, %v1137_v5  ;;  %v1133_v14 = vpop.permute.xlu1 %1132 }
 0x7ff   :  { %v1155_v17 = vmul.f32 %v5724_v20, %v1133_v14 }
 0x800   :  { %v1174_v56 = vrot.slane %v1157_v19, 7 }
 0x801   :  { %v1139_v6 = vpop.permute.xlu0 %1138  ;;  %v1171_v15 = vrot.slane %v1155_v17, 1  ;;  %v4208_v47 = vrot.slane %v1155_v17, 9 }
 0x802   :  { %v1158_v44 = vmul.f32 %v5727_v62, %v1139_v6  ;;  %v1141_v4 = vpop.permute.xlu1 %1140 }
 0x803   :  { %v1172_v16 = vsel %vm492_vm3, %v1171_v15, %v1170_v21  ;;  %v3021_v26 = vsel %vm492_vm3, %v4208_v47, %v1170_v21  ;;  %v1159_v28 = vmul.f32 %v5732_v38, %v1141_v4 }
 0x804   :  { %v1176_v11 = vrot.slane %v1158_v44, 6  ;;  %v1173_v20 = vsel %vm495_vm4, %v1156_v32, %v1172_v16  ;;  %v3023_v22 = vsel %vm495_vm4, %v1156_v32, %v3021_v26 }
 0x805   :  { %v1143_v1 = vpop.permute.xlu0 %1142  ;;  %v1175_v18 = vsel %vm498_vm5, %v1174_v56, %v1173_v20  ;;  %v3025_v50 = vsel %vm498_vm5, %v1174_v56, %v3023_v22  ;;  %v1178_v52 = vrot.slane %v1159_v28, 5 }
 0x806   :  { %v1160_v62 = vmul.f32 %v5735_v63, %v1143_v1  ;;  %v1177_v51 = vsel %vm501_vm6, %v1176_v11, %v1175_v18  ;;  %v3027_v55 = vsel %vm501_vm6, %v1176_v11, %v3025_v50  ;;  %v1145_v58 = vpop.permute.xlu1 %1144 }
 0x807   :  { %v1161_v38 = vmul.f32 %v5740_v23, %v1145_v58  ;;  %v1179_v36 = vsel %vm504_vm7, %v1178_v52, %v1177_v51  ;;  %v3029_v61 = vsel %vm504_vm7, %v1178_v52, %v3027_v55 }
 0x808   :  { %v1180_v25 = vrot.slane %v1160_v62, 4 }
 0x809   :  { %v1182_v3 = vrot.slane %v1161_v38, 3 }
 0x80a   :  { %v1181_v0 = vsel %vm507_vm8, %v1180_v25, %v1179_v36  ;;  %v3031_v63 = vsel %vm507_vm8, %v1180_v25, %v3029_v61 }
 0x80b   :  { %v1183_v42 = vsel %vm510_vm9, %v1182_v3, %v1181_v0  ;;  %v5815_v60 = vsel %vm510_vm9, %v1182_v3, %v3031_v63 }
 0x80c   :  { %1184 = vrot.lane.b32.xlu0 %v1183_v42, %s5319_s13 }
 0x87e   :  { %v1185_v8 = vpop.permute.xlu0 %1184 }
 0x87f   :  { %4442 = vmatmul.mubr.msk.f32.vlgmr.msra.gmra.mrb[4].mxu1 %vm193_vm10, %v1185_v8 }
 0x880   :  { %4650 = vmatpush3.bf16.msra.mxu1 %v5390_v7  ;;  %4463 = vmatprep.mubr.msk.f32.mxu1 %vm5316_vm2, %v5317_v10 }
 0x881   :  { %4651 = vmatprep.subr.bf16.mxu1 %v5315_v2 }
 0x884   :  { %4653 = vmatpush3.bf16.msra.mxu1 %v5407_v12 }
 0x885   :  { %4660 = vmatprep.subr.bf16.mxu1 %v5315_v2 }
 0x952   :  { %v1254_v23 = vpop.f32.mrb[4].mxu1 }
 0x953   :  { %v4443_v9 = vpop.f32.mrb[5].mxu1  ;;  %v1260_v57 = vrot.slane %v1254_v23, 6  ;;  %v1262_v31 = vrot.slane %v1254_v23, 1  ;;  %v1259_v5 = vrot.slane %v1254_v23, 5  ;;  %v1277_v35 = vadd.f32 %v1254_v23, %v5449_v30 }
 0x954   :  { %v1263_v19 = vrot.slane %v1254_v23, 2  ;;  %v1261_v17 = vrot.slane %v1254_v23, 7  ;;  %v1265_v44 = vrot.slane %v1254_v23, 4  ;;  %v1264_v15 = vrot.slane %v1254_v23, 3 }
 0x955   :  { %v1275_v53 = vadd.f32 %v1260_v57, %v5447_v27  ;;  %v1278_v14 = vadd.f32 %v1262_v31, %v5459_v41  ;;  %v1274_v6 = vadd.f32 %v1259_v5, %v5445_v24  ;;  %v4157_v18 = vmul.f32 -1.442695, %v1277_v35 }
 0x956   :  { %v1279_v21 = vadd.f32 %v1263_v19, %v5456_v39  ;;  %v1276_v47 = vadd.f32 %v1261_v17, %v5452_v34  ;;  %v1281_v56 = vadd.f32 %v1265_v44, %v5461_v43  ;;  %v1280_v4 = vadd.f32 %v1264_v15, %v5464_v46 }
 0x957   :  { %4931 = vtanh.f32 %v1275_v53  ;;  %v4155_v62 = vmul.f32 -1.442695, %v1275_v53  ;;  %v4158_v50 = vmul.f32 -1.442695, %v1278_v14  ;;  %v4154_v52 = vmul.f32 -1.442695, %v1274_v6 }
 0x958   :  { %4933 = vtanh.f32 %v1277_v35  ;;  %v4159_v51 = vmul.f32 -1.442695, %v1279_v21  ;;  %v4156_v55 = vmul.f32 -1.442695, %v1276_v47  ;;  %v4161_v58 = vmul.f32 -1.442695, %v1281_v56 }
 0x959   :  { %4935 = vtanh.f32 %v1278_v14  ;;  %v4160_v38 = vmul.f32 -1.442695, %v1280_v4 }
 0x95a   :  { %4937 = vtanh.f32 %v1274_v6 }
 0x95b   :  { %4939 = vtanh.f32 %v1279_v21 }
 0x95c   :  { %4941 = vtanh.f32 %v1276_v47 }
 0x95d   :  { %4943 = vtanh.f32 %v1281_v56 }
 0x95e   :  { %4945 = vtanh.f32 %v1280_v4 }
 0x95f   :  { %4947 = vpow2.f32 %v4155_v62 }
 0x960   :  { %4949 = vpow2.f32 %v4157_v18 }
 0x961   :  { %v4932_v32 = vpop.eup %4931  ;;  %4951 = vpow2.f32 %v4158_v50 }
 0x962   :  { %1380 = vrot.lane.b32.xlu0 %v4932_v32, %s5318_s3  ;;  %v4934_v11 = vpop.eup %4933  ;;  %4953 = vpow2.f32 %v4154_v52 }
 0x963   :  { %1384 = vrot.lane.b32.xlu1 %v4934_v11, %s5318_s3  ;;  %v4936_v16 = vpop.eup %4935  ;;  %4955 = vpow2.f32 %v4159_v51 }
 0x964   :  { %v4938_v26 = vpop.eup %4937  ;;  %4957 = vpow2.f32 %v4156_v55 }
 0x965   :  { %v4940_v28 = vpop.eup %4939  ;;  %4959 = vpow2.f32 %v4161_v58 }
 0x966   :  { %1386 = vrot.lane.b32.xlu0 %v4936_v16, %s5318_s3  ;;  %v4942_v1 = vpop.eup %4941  ;;  %4961 = vpow2.f32 %v4160_v38  ;;  %v1349_v38 = vrot.slane %v5758_v29, 7  ;;  %v1351_v29 = vrot.slane %v5776_v59, 7 }
 0x967   :  { %1378 = vrot.lane.b32.xlu1 %v4938_v26, %s5318_s3  ;;  %v4944_v20 = vpop.eup %4943 }
 0x968   :  { %v4946_v22 = vpop.eup %4945 }
 0x969   :  { %v4948_v25 = vpop.eup %4947 }
 0x96a   :  { %1388 = vrot.lane.b32.xlu0 %v4940_v28, %s5318_s3  ;;  %v4950_v36 = vpop.eup %4949  ;;  %v1307_v61 = vadd.f32 1.0, %v4948_v25  ;;  %v1347_v25 = vrot.slane %v5766_v40, 7 }
 0x96b   :  { %1382 = vrot.lane.b32.xlu1 %v4942_v1, %s5318_s3  ;;  %v4952_v0 = vpop.eup %4951  ;;  %v1309_v63 = vadd.f32 1.0, %v4950_v36 }
 0x96c   :  { %v4954_v3 = vpop.eup %4953  ;;  %4963 = vrcp.f32 %v1307_v61  ;;  %v1310_v42 = vadd.f32 1.0, %v4952_v0  ;;  %v1350_v0 = vrot.slane %v5769_v45, 7 }
 0x96d   :  { %v4956_v8 = vpop.eup %4955  ;;  %4965 = vrcp.f32 %v1309_v63  ;;  %v1306_v23 = vadd.f32 1.0, %v4954_v3 }
 0x96e   :  { %1392 = vrot.lane.b32.xlu0 %v4944_v20, %s5318_s3  ;;  %v4958_v9 = vpop.eup %4957  ;;  %4967 = vrcp.f32 %v1310_v42  ;;  %v1311_v57 = vadd.f32 1.0, %v4956_v8  ;;  %v1346_v8 = vrot.slane %v5747_v13, 7 }
 0x96f   :  { %1390 = vrot.lane.b32.xlu1 %v4946_v22, %s5318_s3  ;;  %v4960_v31 = vpop.eup %4959  ;;  %4969 = vrcp.f32 %v1306_v23  ;;  %v1308_v53 = vadd.f32 1.0, %v4958_v9 }
 0x970   :  { %v4962_v5 = vpop.eup %4961  ;;  %4971 = vrcp.f32 %v1311_v57  ;;  %v1313_v35 = vadd.f32 1.0, %v4960_v31 }
 0x971   :  { %4973 = vrcp.f32 %v1308_v53  ;;  %v1312_v17 = vadd.f32 1.0, %v4962_v5  ;;  %v1348_v53 = vrot.slane %v5755_v54, 7 }
 0x972   :  { %4975 = vrcp.f32 %v1313_v35 }
 0x973   :  { %4977 = vrcp.f32 %v1312_v17 }
 0x976   :  { %v5841_v19 = vpop.eup %4963 }
 0x977   :  { %v5844_v44 = vpop.eup %4965  ;;  %v1363_v36 = vmul.f32 %v5841_v19, %v1347_v25 }
 0x978   :  { %v5848_v47 = vpop.eup %4967  ;;  %v1365_v63 = vmul.f32 %v5844_v44, %v1349_v38 }
 0x979   :  { %v5852_v4 = vpop.eup %4969  ;;  %v1366_v40 = vmul.f32 %v5848_v47, %v1350_v0 }
 0x97a   :  { %v5856_v26 = vpop.eup %4971  ;;  %v1362_v45 = vmul.f32 %v5852_v4, %v1346_v8 }
 0x97b   :  { %v5860_v20 = vpop.eup %4973  ;;  %v1367_v13 = vmul.f32 %v5856_v26, %v1351_v29 }
 0x97c   :  { %v5864_v18 = vpop.eup %4975  ;;  %v1364_v59 = vmul.f32 %v5860_v20, %v1348_v53 }
 0x97d   :  { %v5868_v51 = vpop.eup %4977 }
 0x9d4   :  { %v1381_v14 = vpop.permute.xlu0 %1380 }
 0x9d5   :  { %v1403_v6 = vmul.f32 %v5841_v19, %v1381_v14  ;;  %v1385_v21 = vpop.permute.xlu1 %1384  ;;  %v1353_v14 = vrot.slane %v5783_v37, 7 }
 0x9d6   :  { %v1405_v15 = vmul.f32 %v5844_v44, %v1385_v21  ;;  %v1352_v21 = vrot.slane %v5778_v33, 7 }
 0x9d7   :  { %1420 = vrot.lane.b32.xlu0 %v1403_v6, %s5318_s3  ;;  %v1369_v54 = vmul.f32 %v5864_v18, %v1353_v14 }
 0x9d8   :  { %v1387_v56 = vpop.permute.xlu0 %1386  ;;  %1424 = vrot.lane.b32.xlu1 %v1405_v15, %s5318_s3  ;;  %v1368_v37 = vmul.f32 %v5868_v51, %v1352_v21 }
 0x9d9   :  { %v1406_v32 = vmul.f32 %v5848_v47, %v1387_v56  ;;  %v1379_v11 = vpop.permute.xlu1 %1378 }
 0x9da   :  { %v1402_v16 = vmul.f32 %v5852_v4, %v1379_v11 }
 0x9db   :  { %1426 = vrot.lane.b32.xlu0 %v1406_v32, %s5318_s3 }
 0x9dc   :  { %v1389_v28 = vpop.permute.xlu0 %1388  ;;  %1418 = vrot.lane.b32.xlu1 %v1402_v16, %s5318_s3 }
 0x9dd   :  { %v1407_v1 = vmul.f32 %v5856_v26, %v1389_v28  ;;  %v1383_v22 = vpop.permute.xlu1 %1382 }
 0x9de   :  { %v1404_v62 = vmul.f32 %v5860_v20, %v1383_v22 }
 0x9df   :  { %1428 = vrot.lane.b32.xlu0 %v1407_v1, %s5318_s3 }
 0x9e0   :  { %v1393_v50 = vpop.permute.xlu0 %1392  ;;  %1422 = vrot.lane.b32.xlu1 %v1404_v62, %s5318_s3 }
 0x9e1   :  { %v1409_v52 = vmul.f32 %v5864_v18, %v1393_v50  ;;  %v1391_v55 = vpop.permute.xlu1 %1390 }
 0x9e2   :  { %v1408_v58 = vmul.f32 %v5868_v51, %v1391_v55 }
 0x9e3   :  { %1432 = vrot.lane.b32.xlu0 %v1409_v52, %s5318_s3 }
 0x9e4   :  { %1430 = vrot.lane.b32.xlu1 %v1408_v58, %s5318_s3 }
 0xa49   :  { %v1421_v61 = vpop.permute.xlu0 %1420 }
 0xa4a   :  { %v5878_v3 = vadd.f32 %v1421_v61, %v1363_v36  ;;  %v1425_v42 = vpop.permute.xlu1 %1424 }
 0xa4b   :  { %v5881_v23 = vadd.f32 %v1425_v42, %v1365_v63 }
 0xa4c   :  { %4979 = vtanh.f32 %v5878_v3 }
 0xa4d   :  { %v1427_v9 = vpop.permute.xlu0 %1426  ;;  %4981 = vtanh.f32 %v5881_v23 }
 0xa4e   :  { %v5888_v57 = vadd.f32 %v1427_v9, %v1366_v40  ;;  %v1419_v31 = vpop.permute.xlu1 %1418 }
 0xa4f   :  { %v5891_v5 = vadd.f32 %v1419_v31, %v1362_v45 }
 0xa50   :  { %4983 = vtanh.f32 %v5888_v57 }
 0xa51   :  { %v1429_v35 = vpop.permute.xlu0 %1428  ;;  %4985 = vtanh.f32 %v5891_v5 }
 0xa52   :  { %v5898_v17 = vadd.f32 %v1429_v35, %v1367_v13  ;;  %v1423_v6 = vpop.permute.xlu1 %1422 }
 0xa53   :  { %v5901_v15 = vadd.f32 %v1423_v6, %v1364_v59 }
 0xa54   :  { %4987 = vtanh.f32 %v5898_v17 }
 0xa55   :  { %v1433_v56 = vpop.permute.xlu0 %1432  ;;  %4989 = vtanh.f32 %v5901_v15 }
 0xa56   :  { %v4980_v32 = vpop.eup %4979  ;;  %v5907_v11 = vadd.f32 %v1433_v56, %v1369_v54  ;;  %v1431_v16 = vpop.permute.xlu1 %1430 }
 0xa57   :  { %1468 = vrot.lane.b32.xlu0 %v4980_v32, %s5318_s3  ;;  %v4982_v28 = vpop.eup %4981  ;;  %v5910_v1 = vadd.f32 %v1431_v16, %v1368_v37 }
 0xa58   :  { %4991 = vtanh.f32 %v5907_v11  ;;  %1472 = vrot.lane.b32.xlu1 %v4982_v28, %s5318_s3 }
 0xa59   :  { %4993 = vtanh.f32 %v5910_v1 }
 0xa5a   :  { %v4984_v33 = vpop.eup %4983 }
 0xa5b   :  { %1474 = vrot.lane.b32.xlu0 %v4984_v33, %s5318_s3  ;;  %v4986_v22 = vpop.eup %4985 }
 0xa5c   :  { %1466 = vrot.lane.b32.xlu1 %v4986_v22, %s5318_s3 }
 0xa5e   :  { %v4988_v62 = vpop.eup %4987 }
 0xa5f   :  { %1476 = vrot.lane.b32.xlu0 %v4988_v62, %s5318_s3  ;;  %v4990_v50 = vpop.eup %4989 }
 0xa60   :  { %1470 = vrot.lane.b32.xlu1 %v4990_v50, %s5318_s3 }
 0xa62   :  { %v4992_v52 = vpop.eup %4991 }
 0xa63   :  { %1480 = vrot.lane.b32.xlu0 %v4992_v52, %s5318_s3  ;;  %v4994_v55 = vpop.eup %4993 }
 0xa64   :  { %1478 = vrot.lane.b32.xlu1 %v4994_v55, %s5318_s3 }
 0xac9   :  { %v1469_v58 = vpop.permute.xlu0 %1468 }
 0xaca   :  { %v1473_v25 = vpop.permute.xlu1 %1472  ;;  %v1491_v36 = vmul.f32 %v5841_v19, %v1469_v58 }
 0xacc   :  { %v4215_v42 = vrot.slane %v1491_v36, 10  ;;  %v1507_v53 = vrot.slane %v1491_v36, 2 }
 0xacd   :  { %v1475_v38 = vpop.permute.xlu0 %1474 }
 0xace   :  { %v1467_v61 = vpop.permute.xlu1 %1466  ;;  %v1494_v45 = vmul.f32 %v5848_v47, %v1475_v38 }
 0xacf   :  { %v1490_v0 = vmul.f32 %v5852_v4, %v1467_v61  ;;  %v1493_v4 = vmul.f32 %v5844_v44, %v1473_v25 }
 0xad0   :  { %v1512_v54 = vrot.slane %v1494_v45, 7 }
 0xad1   :  { %v1477_v63 = vpop.permute.xlu0 %1476  ;;  %v1506_v8 = vrot.slane %v1490_v0, 3 }
 0xad2   :  { %v1471_v40 = vpop.permute.xlu1 %1470  ;;  %v1495_v9 = vmul.f32 %v5856_v26, %v1477_v63 }
 0xad3   :  { %v3035_v29 = vsel %vm492_vm3, %v4215_v42, %v1506_v8  ;;  %v1492_v31 = vmul.f32 %v5860_v20, %v1471_v40  ;;  %v1508_v59 = vsel %vm492_vm3, %v1507_v53, %v1506_v8 }
 0xad4   :  { %v1514_v6 = vrot.slane %v1495_v9, 6 }
 0xad5   :  { %v1481_v13 = vpop.permute.xlu0 %1480  ;;  %v1509_v35 = vrot.slane %v1492_v31, 1  ;;  %v4216_v14 = vrot.slane %v1492_v31, 9 }
 0xad6   :  { %v1497_v19 = vmul.f32 %v5864_v18, %v1481_v13  ;;  %v1479_v21 = vpop.permute.xlu1 %1478 }
 0xad7   :  { %v1510_v26 = vsel %vm495_vm4, %v1509_v35, %v1508_v59  ;;  %v3037_v56 = vsel %vm495_vm4, %v4216_v14, %v3035_v29  ;;  %v1496_v47 = vmul.f32 %v5868_v51, %v1479_v21 }
 0xad8   :  { %v1511_v20 = vsel %vm498_vm5, %v1493_v4, %v1510_v26  ;;  %v3039_v32 = vsel %vm498_vm5, %v1493_v4, %v3037_v56  ;;  %v1518_v37 = vrot.slane %v1497_v19, 4 }
 0xad9   :  { %v1513_v18 = vsel %vm501_vm6, %v1512_v54, %v1511_v20  ;;  %v3041_v44 = vsel %vm501_vm6, %v1512_v54, %v3039_v32  ;;  %v1516_v16 = vrot.slane %v1496_v47, 5 }
 0xada   :  { %v1515_v28 = vsel %vm504_vm7, %v1514_v6, %v1513_v18  ;;  %v3043_v33 = vsel %vm504_vm7, %v1514_v6, %v3041_v44 }
 0xadb   :  { %v1517_v22 = vsel %vm507_vm8, %v1516_v16, %v1515_v28  ;;  %v3045_v62 = vsel %vm507_vm8, %v1516_v16, %v3043_v33 }
 0xadc   :  { %v1519_v51 = vsel %vm510_vm9, %v1518_v37, %v1517_v22  ;;  %v5943_v50 = vsel %vm510_vm9, %v1518_v37, %v3045_v62 }
 0xadd   :  { %1520 = vrot.lane.b32.xlu1 %v1519_v51, %s5319_s13 }
 0xb4f   :  { %v1521_v52 = vpop.permute.xlu1 %1520 }
 0xb50   :  { %4453 = vmatmul.mubr.msk.f32.vlgmr.msra.gmra.mrb[10].mxu0 %vm193_vm10, %v1521_v52 }
 0xb51   :  { %4656 = vmatpush3.bf16.msra.mxu0 %v5390_v7  ;;  %4474 = vmatprep.mubr.msk.f32.mxu0 %vm5316_vm2, %v5317_v10 }
 0xb52   :  { %4657 = vmatprep.subr.bf16.mxu0 %v5315_v2 }
 0xb55   :  { %4659 = vmatpush3.bf16.msra.mxu0 %v5407_v12 }
 0xb56   :  { %4666 = vmatprep.subr.bf16.mxu0 %v5315_v2 }
 0xc23   :  { %v1590_v55 = vpop.f32.mrb[10].mxu0 }
 0xc24   :  { %v1595_v58 = vrot.slane %v1590_v55, 4  ;;  %v4454_v25 = vpop.f32.mrb[11].mxu0  ;;  %v1597_v36 = vrot.slane %v1590_v55, 6  ;;  %v1599_v61 = vrot.slane %v1590_v55, 1  ;;  %v1596_v63 = vrot.slane %v1590_v55, 5 }
 0xc25   :  { %v1614_v42 = vadd.f32 %v1590_v55, %v5459_v41  ;;  %v1600_v40 = vrot.slane %v1590_v55, 2  ;;  %v1598_v29 = vrot.slane %v1590_v55, 7  ;;  %v1601_v53 = vrot.slane %v1590_v55, 3 }
 0xc26   :  { %v1610_v38 = vadd.f32 %v1595_v58, %v5445_v24  ;;  %v1612_v0 = vadd.f32 %v1597_v36, %v5452_v34  ;;  %v1615_v9 = vadd.f32 %v1599_v61, %v5456_v39  ;;  %v1611_v45 = vadd.f32 %v1596_v63, %v5447_v27 }
 0xc27   :  { %v1616_v31 = vadd.f32 %v1600_v40, %v5464_v46  ;;  %v1613_v13 = vadd.f32 %v1598_v29, %v5449_v30  ;;  %v1617_v14 = vadd.f32 %v1601_v53, %v5461_v43  ;;  %v4167_v47 = vmul.f32 -1.442695, %v1614_v42 }
 0xc28   :  { %4995 = vtanh.f32 %v1610_v38  ;;  %v4163_v26 = vmul.f32 -1.442695, %v1610_v38  ;;  %v4165_v56 = vmul.f32 -1.442695, %v1612_v0  ;;  %v4168_v32 = vmul.f32 -1.442695, %v1615_v9 }
 0xc29   :  { %4997 = vtanh.f32 %v1612_v0  ;;  %v4164_v37 = vmul.f32 -1.442695, %v1611_v45  ;;  %v4169_v44 = vmul.f32 -1.442695, %v1616_v31  ;;  %v4166_v16 = vmul.f32 -1.442695, %v1613_v13 }
 0xc2a   :  { %4999 = vtanh.f32 %v1614_v42  ;;  %v4170_v33 = vmul.f32 -1.442695, %v1617_v14 }
 0xc2b   :  { %5001 = vtanh.f32 %v1615_v9 }
 0xc2c   :  { %5003 = vtanh.f32 %v1611_v45 }
 0xc2d   :  { %5005 = vtanh.f32 %v1616_v31 }
 0xc2e   :  { %5007 = vtanh.f32 %v1613_v13 }
 0xc2f   :  { %5009 = vtanh.f32 %v1617_v14 }
 0xc30   :  { %5011 = vpow2.f32 %v4163_v26 }
 0xc31   :  { %5013 = vpow2.f32 %v4165_v56 }
 0xc32   :  { %v4996_v8 = vpop.eup %4995  ;;  %5015 = vpow2.f32 %v4167_v47 }
 0xc33   :  { %1714 = vrot.lane.b32.xlu0 %v4996_v8, %s5318_s3  ;;  %v4998_v35 = vpop.eup %4997  ;;  %5017 = vpow2.f32 %v4168_v32 }
 0xc34   :  { %v5000_v19 = vpop.eup %4999  ;;  %5019 = vpow2.f32 %v4164_v37 }
 0xc35   :  { %1722 = vrot.lane.b32.xlu1 %v5000_v19, %s5318_s3  ;;  %v5002_v4 = vpop.eup %5001 }
 0xc36   :  { %v5004_v59 = vpop.eup %5003 }
 0xc37   :  { %1718 = vrot.lane.b32.xlu0 %v4998_v35, %s5318_s3  ;;  %v5006_v6 = vpop.eup %5005 }
 0xc38   :  { %v5008_v21 = vpop.eup %5007 }
 0xc39   :  { %1716 = vrot.lane.b32.xlu1 %v5004_v59, %s5318_s3  ;;  %v5010_v54 = vpop.eup %5009 }
 0xc3a   :  { %v5012_v20 = vpop.eup %5011 }
 0xc3b   :  { %1724 = vrot.lane.b32.xlu0 %v5002_v4, %s5318_s3  ;;  %v1642_v18 = vadd.f32 1.0, %v5012_v20  ;;  %v5014_v28 = vpop.eup %5013 }
 0xc3c   :  { %v5016_v22 = vpop.eup %5015  ;;  %v1644_v62 = vadd.f32 1.0, %v5014_v28 }
 0xc3d   :  { %1720 = vrot.lane.b32.xlu1 %v5008_v21, %s5318_s3  ;;  %5021 = vrcp.f32 %v1642_v18  ;;  %v5018_v51 = vpop.eup %5017  ;;  %v1646_v52 = vadd.f32 1.0, %v5016_v22 }
 0xc3e   :  { %5023 = vpow2.f32 %v4169_v44  ;;  %v5020_v55 = vpop.eup %5019  ;;  %v1647_v38 = vadd.f32 1.0, %v5018_v51  ;;  %v1686_v51 = vrot.slane %v5888_v57, 7 }
 0xc3f   :  { %1726 = vrot.lane.b32.xlu0 %v5006_v6, %s5318_s3  ;;  %5025 = vpow2.f32 %v4166_v16  ;;  %v1643_v0 = vadd.f32 1.0, %v5020_v55  ;;  %v1682_v16 = vrot.slane %v5891_v5, 7 }
 0xc40   :  { %5027 = vpow2.f32 %v4170_v33 }
 0xc41   :  { %1728 = vrot.lane.b32.xlu1 %v5010_v54, %s5318_s3  ;;  %5029 = vrcp.f32 %v1644_v62  ;;  %v1684_v62 = vrot.slane %v5901_v15, 7 }
 0xc42   :  { %5031 = vrcp.f32 %v1646_v52 }
 0xc43   :  { %5033 = vrcp.f32 %v1647_v38 }
 0xc44   :  { %5035 = vrcp.f32 %v1643_v0  ;;  %v1683_v0 = vrot.slane %v5878_v3, 7  ;;  %v1685_v3 = vrot.slane %v5881_v23, 7 }
 0xc47   :  { %v5969_v58 = vpop.eup %5021 }
 0xc48   :  { %v5024_v36 = vpop.eup %5023  ;;  %v1698_v28 = vmul.f32 %v5969_v58, %v1682_v16 }
 0xc49   :  { %v5026_v63 = vpop.eup %5025  ;;  %v1648_v42 = vadd.f32 1.0, %v5024_v36 }
 0xc4a   :  { %v1645_v8 = vadd.f32 1.0, %v5026_v63  ;;  %v5028_v40 = vpop.eup %5027 }
 0xc4b   :  { %5037 = vrcp.f32 %v1648_v42  ;;  %v5973_v9 = vpop.eup %5029  ;;  %v1649_v45 = vadd.f32 1.0, %v5028_v40  ;;  %v1688_v42 = vrot.slane %v5910_v1, 7 }
 0xc4c   :  { %5039 = vrcp.f32 %v1645_v8  ;;  %v5976_v53 = vpop.eup %5031  ;;  %v1700_v52 = vmul.f32 %v5973_v9, %v1684_v62 }
 0xc4d   :  { %v5980_v14 = vpop.eup %5033  ;;  %5041 = vrcp.f32 %v1649_v45  ;;  %v1702_v38 = vmul.f32 %v5976_v53, %v1686_v51 }
 0xc4e   :  { %v5984_v59 = vpop.eup %5035 }
 0xc55   :  { %v5988_v54 = vpop.eup %5037 }
 0xc56   :  { %v5992_v47 = vpop.eup %5039  ;;  %v1704_v45 = vmul.f32 %v5988_v54, %v1688_v42 }
 0xc57   :  { %v5997_v37 = vpop.eup %5041  ;;  %v1701_v1 = vmul.f32 %v5992_v47, %v1685_v3 }
 0xca5   :  { %v1715_v25 = vpop.permute.xlu0 %1714 }
 0xca6   :  { %v1738_v61 = vmul.f32 %v5969_v58, %v1715_v25  ;;  %v1687_v25 = vrot.slane %v5898_v17, 7  ;;  %v1699_v17 = vmul.f32 %v5984_v59, %v1683_v0 }
 0xca7   :  { %v1723_v13 = vpop.permute.xlu1 %1722 }
 0xca8   :  { %1754 = vrot.lane.b32.xlu0 %v1738_v61, %s5318_s3  ;;  %v1742_v35 = vmul.f32 %v5976_v53, %v1723_v13  ;;  %v1703_v15 = vmul.f32 %v5980_v14, %v1687_v25 }
 0xca9   :  { %v1719_v29 = vpop.permute.xlu0 %1718 }
 0xcaa   :  { %v1740_v31 = vmul.f32 %v5973_v9, %v1719_v29  ;;  %1762 = vrot.lane.b32.xlu1 %v1742_v35, %s5318_s3 }
 0xcab   :  { %v1717_v6 = vpop.permute.xlu1 %1716 }
 0xcac   :  { %1758 = vrot.lane.b32.xlu0 %v1740_v31, %s5318_s3  ;;  %v1739_v21 = vmul.f32 %v5984_v59, %v1717_v6 }
 0xcad   :  { %v1725_v19 = vpop.permute.xlu0 %1724 }
 0xcae   :  { %v1743_v4 = vmul.f32 %v5980_v14, %v1725_v19  ;;  %1756 = vrot.lane.b32.xlu1 %v1739_v21, %s5318_s3  ;;  %v1689_v19 = vrot.slane %v5907_v11, 7 }
 0xcaf   :  { %v1721_v20 = vpop.permute.xlu1 %1720 }
 0xcb0   :  { %1764 = vrot.lane.b32.xlu0 %v1743_v4, %s5318_s3  ;;  %v1741_v32 = vmul.f32 %v5992_v47, %v1721_v20  ;;  %v1705_v6 = vmul.f32 %v5997_v37, %v1689_v19 }
 0xcb1   :  { %v1727_v26 = vpop.permute.xlu0 %1726 }
 0xcb2   :  { %v1744_v56 = vmul.f32 %v5988_v54, %v1727_v26  ;;  %1760 = vrot.lane.b32.xlu1 %v1741_v32, %s5318_s3 }
 0xcb3   :  { %v1729_v18 = vpop.permute.xlu1 %1728 }
 0xcb4   :  { %1766 = vrot.lane.b32.xlu0 %v1744_v56, %s5318_s3  ;;  %v1745_v44 = vmul.f32 %v5997_v37, %v1729_v18 }
 0xcb6   :  { %1768 = vrot.lane.b32.xlu1 %v1745_v44, %s5318_s3 }
 0xd1a   :  { %v1755_v33 = vpop.permute.xlu0 %1754 }
 0xd1b   :  { %v6003_v22 = vadd.f32 %v1755_v33, %v1698_v28 }
 0xd1c   :  { %v1763_v5 = vpop.permute.xlu1 %1762 }
 0xd1d   :  { %5043 = vtanh.f32 %v6003_v22  ;;  %v6014_v63 = vadd.f32 %v1763_v5, %v1702_v38 }
 0xd1e   :  { %v1759_v55 = vpop.permute.xlu0 %1758 }
 0xd1f   :  { %v6011_v36 = vadd.f32 %v1759_v55, %v1700_v52 }
 0xd20   :  { %v1757_v40 = vpop.permute.xlu1 %1756 }
 0xd21   :  { %5045 = vtanh.f32 %v6011_v36  ;;  %v6025_v29 = vadd.f32 %v1757_v40, %v1699_v17 }
 0xd22   :  { %v1765_v57 = vpop.permute.xlu0 %1764  ;;  %5047 = vtanh.f32 %v6014_v63 }
 0xd23   :  { %v6022_v8 = vadd.f32 %v1765_v57, %v1703_v15 }
 0xd24   :  { %v1761_v35 = vpop.permute.xlu1 %1760 }
 0xd25   :  { %5049 = vtanh.f32 %v6022_v8  ;;  %v6034_v4 = vadd.f32 %v1761_v35, %v1701_v1 }
 0xd26   :  { %v1767_v31 = vpop.permute.xlu0 %1766  ;;  %5051 = vtanh.f32 %v6025_v29 }
 0xd27   :  { %v5044_v61 = vpop.eup %5043  ;;  %v6031_v13 = vadd.f32 %v1767_v31, %v1704_v45 }
 0xd28   :  { %1802 = vrot.lane.b32.xlu0 %v5044_v61, %s5318_s3  ;;  %v1769_v21 = vpop.permute.xlu1 %1768 }
 0xd29   :  { %5053 = vtanh.f32 %v6031_v13  ;;  %v6040_v56 = vadd.f32 %v1769_v21, %v1705_v6 }
 0xd2a   :  { %5055 = vtanh.f32 %v6034_v4 }
 0xd2b   :  { %v5046_v23 = vpop.eup %5045  ;;  %5057 = vtanh.f32 %v6040_v56 }
 0xd2c   :  { %1806 = vrot.lane.b32.xlu0 %v5046_v23, %s5318_s3  ;;  %v5048_v26 = vpop.eup %5047 }
 0xd2d   :  { %1810 = vrot.lane.b32.xlu1 %v5048_v26, %s5318_s3 }
 0xd2f   :  { %v5050_v20 = vpop.eup %5049 }
 0xd30   :  { %1812 = vrot.lane.b32.xlu0 %v5050_v20, %s5318_s3  ;;  %v5052_v11 = vpop.eup %5051 }
 0xd31   :  { %1804 = vrot.lane.b32.xlu1 %v5052_v11, %s5318_s3 }
 0xd33   :  { %v5054_v32 = vpop.eup %5053 }
 0xd34   :  { %1814 = vrot.lane.b32.xlu0 %v5054_v32, %s5318_s3  ;;  %v5056_v18 = vpop.eup %5055 }
 0xd35   :  { %1808 = vrot.lane.b32.xlu1 %v5056_v18, %s5318_s3  ;;  %v5058_v44 = vpop.eup %5057 }
 0xd39   :  { %1816 = vrot.lane.b32.xlu1 %v5058_v44, %s5318_s3 }
 0xd9a   :  { %v1803_v16 = vpop.permute.xlu0 %1802 }
 0xd9b   :  { %v1826_v52 = vmul.f32 %v5969_v58, %v1803_v16 }
 0xd9d   :  { %v1842_v0 = vrot.slane %v1826_v52, 4 }
 0xd9e   :  { %v1807_v28 = vpop.permute.xlu0 %1806 }
 0xd9f   :  { %v1811_v33 = vpop.permute.xlu1 %1810  ;;  %v1828_v62 = vmul.f32 %v5973_v9, %v1807_v28 }
 0xda0   :  { %v1830_v19 = vmul.f32 %v5976_v53, %v1811_v33 }
 0xda1   :  { %v1845_v38 = vrot.slane %v1828_v62, 2  ;;  %v4223_v5 = vrot.slane %v1828_v62, 10 }
 0xda2   :  { %v1813_v51 = vpop.permute.xlu0 %1812 }
 0xda3   :  { %v1805_v55 = vpop.permute.xlu1 %1804  ;;  %v1831_v42 = vmul.f32 %v5980_v14, %v1813_v51 }
 0xda4   :  { %v1827_v25 = vmul.f32 %v5984_v59, %v1805_v55 }
 0xda5   :  { %v1850_v35 = vrot.slane %v1831_v42, 7 }
 0xda6   :  { %v1815_v61 = vpop.permute.xlu0 %1814  ;;  %v1843_v15 = vrot.slane %v1827_v25, 3  ;;  %v4222_v57 = vrot.slane %v1827_v25, 11 }
 0xda7   :  { %v1809_v17 = vpop.permute.xlu1 %1808  ;;  %v1832_v40 = vmul.f32 %v5988_v54, %v1815_v61 }
 0xda8   :  { %v1844_v3 = vsel %vm492_vm3, %v1843_v15, %v1842_v0  ;;  %v3049_v9 = vsel %vm492_vm3, %v4222_v57, %v1842_v0  ;;  %v1829_v58 = vmul.f32 %v5992_v47, %v1809_v17 }
 0xda9   :  { %v1846_v45 = vsel %vm495_vm4, %v1845_v38, %v1844_v3  ;;  %v3051_v59 = vsel %vm495_vm4, %v4223_v5, %v3049_v9  ;;  %v1852_v14 = vrot.slane %v1832_v40, 6 }
 0xdaa   :  { %v1847_v31 = vrot.slane %v1829_v58, 1  ;;  %v4224_v1 = vrot.slane %v1829_v58, 9 }
 0xdab   :  { %v1817_v23 = vpop.permute.xlu1 %1816 }
 0xdac   :  { %v1848_v6 = vsel %vm498_vm5, %v1847_v31, %v1846_v45  ;;  %v3053_v54 = vsel %vm498_vm5, %v4224_v1, %v3051_v59  ;;  %v1833_v21 = vmul.f32 %v5997_v37, %v1817_v23 }
 0xdad   :  { %v1849_v26 = vsel %vm501_vm6, %v1830_v19, %v1848_v6  ;;  %v3055_v47 = vsel %vm501_vm6, %v1830_v19, %v3053_v54 }
 0xdae   :  { %v1851_v20 = vsel %vm504_vm7, %v1850_v35, %v1849_v26  ;;  %v3057_v11 = vsel %vm504_vm7, %v1850_v35, %v3055_v47  ;;  %v1854_v32 = vrot.slane %v1833_v21, 5 }
 0xdaf   :  { %v1853_v18 = vsel %vm507_vm8, %v1852_v14, %v1851_v20  ;;  %v3059_v53 = vsel %vm507_vm8, %v1852_v14, %v3057_v11 }
 0xdb0   :  { %v1855_v44 = vsel %vm510_vm9, %v1854_v32, %v1853_v18  ;;  %v6071_v16 = vsel %vm510_vm9, %v1854_v32, %v3059_v53 }
 0xdb1   :  { %1856 = vrot.lane.b32.xlu0 %v1855_v44, %s5319_s13 }
 0xe23   :  { %v1857_v37 = vpop.permute.xlu0 %1856 }
 0xe24   :  { %4464 = vmatmul.mubr.msk.f32.vlgmr.msra.gmra.mrb[6].mxu1 %vm193_vm10, %v1857_v37 }
 0xe25   :  { %4662 = vmatpush3.bf16.msra.mxu1 %v5390_v7  ;;  %4485 = vmatprep.mubr.msk.f32.mxu1 %vm5316_vm2, %v5317_v10 }
 0xe26   :  { %4663 = vmatprep.subr.bf16.mxu1 %v5315_v2 }
 0xe29   :  { %4665 = vmatpush3.bf16.msra.mxu1 %v5407_v12 }
 0xef7   :  { %v1926_v28 = vpop.f32.mrb[6].mxu1 }
 0xef8   :  { %v1931_v33 = vrot.slane %v1926_v28, 3  ;;  %v4465_v62 = vpop.f32.mrb[7].mxu1  ;;  %v1932_v52 = vrot.slane %v1926_v28, 4  ;;  %v1933_v55 = vrot.slane %v1926_v28, 5  ;;  %v1934_v25 = vrot.slane %v1926_v28, 6 }
 0xef9   :  { %v1935_v5 = vrot.slane %v1926_v28, 7  ;;  %v1936_v61 = vrot.slane %v1926_v28, 1  ;;  %v1937_v57 = vrot.slane %v1926_v28, 2  ;;  %v1951_v17 = vadd.f32 %v1926_v28, %v5456_v39 }
 0xefa   :  { %v1946_v51 = vadd.f32 %v1931_v33, %v5445_v24  ;;  %v1947_v38 = vadd.f32 %v1932_v52, %v5447_v27  ;;  %v1948_v7 = vadd.f32 %v1933_v55, %v5452_v34  ;;  %v1949_v0 = vadd.f32 %v1934_v25, %v5449_v30 }
 0xefb   :  { %v1950_v12 = vadd.f32 %v1935_v5, %v5459_v41  ;;  %v1952_v42 = vadd.f32 %v1936_v61, %v5464_v46  ;;  %v1953_v40 = vadd.f32 %v1937_v57, %v5461_v43  ;;  %v4177_v47 = vmul.f32 -1.442695, %v1951_v17 }
 0xefc   :  { %5059 = vtanh.f32 %v1946_v51  ;;  %v4172_v35 = vmul.f32 -1.442695, %v1946_v51  ;;  %v4173_v19 = vmul.f32 -1.442695, %v1947_v38  ;;  %v4174_v23 = vmul.f32 -1.442695, %v1948_v7 }
 0xefd   :  { %5061 = vtanh.f32 %v1947_v38  ;;  %v4175_v14 = vmul.f32 -1.442695, %v1949_v0  ;;  %v4176_v54 = vmul.f32 -1.442695, %v1950_v12  ;;  %v4178_v21 = vmul.f32 -1.442695, %v1952_v42 }
 0xefe   :  { %5063 = vtanh.f32 %v1948_v7  ;;  %v4179_v20 = vmul.f32 -1.442695, %v1953_v40 }
 0xeff   :  { %5065 = vtanh.f32 %v1949_v0 }
 0xf00   :  { %5067 = vtanh.f32 %v1950_v12 }
 0xf01   :  { %5069 = vtanh.f32 %v1952_v42 }
 0xf02   :  { %5071 = vtanh.f32 %v1951_v17 }
 0xf03   :  { %5073 = vtanh.f32 %v1953_v40 }
 0xf04   :  { %5075 = vpow2.f32 %v4172_v35 }
 0xf05   :  { %5077 = vpow2.f32 %v4173_v19 }
 0xf06   :  { %v5060_v15 = vpop.eup %5059  ;;  %5079 = vpow2.f32 %v4174_v23 }
 0xf07   :  { %2050 = vrot.lane.b32.xlu1 %v5060_v15, %s5318_s3  ;;  %v5062_v3 = vpop.eup %5061  ;;  %5081 = vpow2.f32 %v4175_v14 }
 0xf08   :  { %v5064_v9 = vpop.eup %5063  ;;  %2052 = vrot.lane.b32.xlu0 %v5062_v3, %s5318_s3  ;;  %5083 = vpow2.f32 %v4176_v54 }
 0xf09   :  { %v5066_v58 = vpop.eup %5065  ;;  %5085 = vpow2.f32 %v4178_v21 }
 0xf0a   :  { %v5068_v45 = vpop.eup %5067 }
 0xf0b   :  { %2054 = vrot.lane.b32.xlu1 %v5064_v9, %s5318_s3  ;;  %v5070_v59 = vpop.eup %5069 }
 0xf0c   :  { %2056 = vrot.lane.b32.xlu0 %v5066_v58, %s5318_s3  ;;  %v5072_v31 = vpop.eup %5071 }
 0xf0d   :  { %v5074_v1 = vpop.eup %5073 }
 0xf0e   :  { %v5076_v6 = vpop.eup %5075 }
 0xf0f   :  { %2058 = vrot.lane.b32.xlu1 %v5068_v45, %s5318_s3  ;;  %v1978_v26 = vadd.f32 1.0, %v5076_v6  ;;  %v5078_v11 = vpop.eup %5077 }
 0xf10   :  { %2062 = vrot.lane.b32.xlu0 %v5070_v59, %s5318_s3  ;;  %v5080_v32 = vpop.eup %5079  ;;  %v1979_v18 = vadd.f32 1.0, %v5078_v11 }
 0xf11   :  { %5087 = vrcp.f32 %v1978_v26  ;;  %v5082_v53 = vpop.eup %5081  ;;  %v1980_v44 = vadd.f32 1.0, %v5080_v32  ;;  %v2018_v26 = vrot.slane %v6003_v22, 7  ;;  %v2019_v32 = vrot.slane %v6025_v29, 7 }
 0xf12   :  { %5089 = vpow2.f32 %v4177_v47  ;;  %v5084_v37 = vpop.eup %5083  ;;  %v1981_v33 = vadd.f32 1.0, %v5082_v53 }
 0xf13   :  { %2060 = vrot.lane.b32.xlu1 %v5072_v31, %s5318_s3  ;;  %5091 = vpow2.f32 %v4179_v20  ;;  %v5086_v28 = vpop.eup %5085  ;;  %v1982_v52 = vadd.f32 1.0, %v5084_v37 }
 0xf14   :  { %2064 = vrot.lane.b32.xlu0 %v5074_v1, %s5318_s3  ;;  %5093 = vrcp.f32 %v1979_v18  ;;  %v1984_v38 = vadd.f32 1.0, %v5086_v28  ;;  %v2020_v18 = vrot.slane %v6011_v36, 7  ;;  %v2021_v28 = vrot.slane %v6034_v4, 7 }
 0xf15   :  { %5095 = vrcp.f32 %v1980_v44 }
 0xf16   :  { %5097 = vrcp.f32 %v1981_v33 }
 0xf17   :  { %5099 = vrcp.f32 %v1982_v52 }
 0xf18   :  { %5101 = vrcp.f32 %v1984_v38  ;;  %v2024_v38 = vrot.slane %v6031_v13, 7  ;;  %v2025_v13 = vrot.slane %v6040_v56, 7 }
 0xf1b   :  { %v6096_v62 = vpop.eup %5087 }
 0xf1c   :  { %v5090_v55 = vpop.eup %5089  ;;  %v2034_v47 = vmul.f32 %v6096_v62, %v2018_v26 }
 0xf1d   :  { %v5092_v5 = vpop.eup %5091  ;;  %v1983_v7 = vadd.f32 1.0, %v5090_v55 }
 0xf1e   :  { %v1985_v61 = vadd.f32 1.0, %v5092_v5  ;;  %v6100_v0 = vpop.eup %5093 }
 0xf1f   :  { %5103 = vrcp.f32 %v1983_v7  ;;  %v6102_v12 = vpop.eup %5095  ;;  %v2035_v53 = vmul.f32 %v6100_v0, %v2019_v32 }
 0xf20   :  { %5105 = vrcp.f32 %v1985_v61  ;;  %v6107_v40 = vpop.eup %5097  ;;  %v2036_v37 = vmul.f32 %v6102_v12, %v2020_v18 }
 0xf21   :  { %v6110_v9 = vpop.eup %5099  ;;  %v2037_v29 = vmul.f32 %v6107_v40, %v2021_v28 }
 0xf22   :  { %v6115_v31 = vpop.eup %5101 }
 0xf23   :  { %v2040_v61 = vmul.f32 %v6115_v31, %v2024_v38 }
 0xf29   :  { %v6118_v35 = vpop.eup %5103 }
 0xf2a   :  { %v6123_v6 = vpop.eup %5105 }
 0xf79   :  { %v2051_v51 = vpop.permute.xlu1 %2050 }
 0xf7a   :  { %v2074_v25 = vmul.f32 %v6096_v62, %v2051_v51  ;;  %v2053_v15 = vpop.permute.xlu0 %2052  ;;  %v2022_v51 = vrot.slane %v6014_v63, 7  ;;  %v2023_v63 = vrot.slane %v6022_v8, 7  ;;  %v2041_v8 = vmul.f32 %v6123_v6, %v2025_v13 }
 0xf7b   :  { %v2075_v57 = vmul.f32 %v6100_v0, %v2053_v15 }
 0xf7c   :  { %2090 = vrot.lane.b32.xlu1 %v2074_v25, %s5318_s3  ;;  %v2038_v25 = vmul.f32 %v6110_v9, %v2022_v51 }
 0xf7d   :  { %v2055_v42 = vpop.permute.xlu1 %2054  ;;  %2092 = vrot.lane.b32.xlu0 %v2075_v57, %s5318_s3  ;;  %v2039_v57 = vmul.f32 %v6118_v35, %v2023_v63 }
 0xf7e   :  { %v2076_v17 = vmul.f32 %v6102_v12, %v2055_v42  ;;  %v2057_v3 = vpop.permute.xlu0 %2056 }
 0xf7f   :  { %v2077_v58 = vmul.f32 %v6107_v40, %v2057_v3 }
 0xf80   :  { %2094 = vrot.lane.b32.xlu1 %v2076_v17, %s5318_s3 }
 0xf81   :  { %v2059_v45 = vpop.permute.xlu1 %2058  ;;  %2096 = vrot.lane.b32.xlu0 %v2077_v58, %s5318_s3 }
 0xf82   :  { %v2078_v59 = vmul.f32 %v6110_v9, %v2059_v45  ;;  %v2063_v1 = vpop.permute.xlu0 %2062 }
 0xf83   :  { %v2080_v19 = vmul.f32 %v6115_v31, %v2063_v1 }
 0xf84   :  { %2098 = vrot.lane.b32.xlu1 %v2078_v59, %s5318_s3 }
 0xf85   :  { %v2061_v23 = vpop.permute.xlu1 %2060  ;;  %2102 = vrot.lane.b32.xlu0 %v2080_v19, %s5318_s3 }
 0xf86   :  { %v2079_v14 = vmul.f32 %v6118_v35, %v2061_v23  ;;  %v2065_v54 = vpop.permute.xlu0 %2064 }
 0xf87   :  { %v2081_v21 = vmul.f32 %v6123_v6, %v2065_v54 }
 0xf88   :  { %2100 = vrot.lane.b32.xlu1 %v2079_v14, %s5318_s3 }
 0xf89   :  { %2104 = vrot.lane.b32.xlu0 %v2081_v21, %s5318_s3 }
 0xfee   :  { %v2091_v20 = vpop.permute.xlu1 %2090 }
 0xfef   :  { %v6130_v11 = vadd.f32 %v2091_v20, %v2034_v47  ;;  %v2093_v44 = vpop.permute.xlu0 %2092 }
 0xff0   :  { %v6138_v33 = vadd.f32 %v2093_v44, %v2035_v53 }
 0xff1   :  { %5107 = vtanh.f32 %v6130_v11 }
 0xff2   :  { %v2095_v22 = vpop.permute.xlu1 %2094  ;;  %5109 = vtanh.f32 %v6138_v33 }
 0xff3   :  { %v6141_v52 = vadd.f32 %v2095_v22, %v2036_v37  ;;  %v2097_v36 = vpop.permute.xlu0 %2096 }
 0xff4   :  { %v6148_v4 = vadd.f32 %v2097_v36, %v2037_v29 }
 0xff5   :  { %5111 = vtanh.f32 %v6141_v52 }
 0xff6   :  { %v2099_v5 = vpop.permute.xlu1 %2098  ;;  %5113 = vtanh.f32 %v6148_v4 }
 0xff7   :  { %v6152_v7 = vadd.f32 %v2099_v5, %v2038_v25  ;;  %v2103_v15 = vpop.permute.xlu0 %2102 }
 0xff8   :  { %v6159_v42 = vadd.f32 %v2103_v15, %v2040_v61 }
 0xff9   :  { %5115 = vtanh.f32 %v6152_v7 }
 0xffa   :  { %v2101_v17 = vpop.permute.xlu1 %2100  ;;  %5117 = vtanh.f32 %v6159_v42 }
 0xffb   :  { %v5108_v55 = vpop.eup %5107  ;;  %v6161_v3 = vadd.f32 %v2101_v17, %v2039_v57  ;;  %v2105_v58 = vpop.permute.xlu0 %2104 }
 0xffc   :  { %2138 = vrot.lane.b32.xlu1 %v5108_v55, %s5318_s3  ;;  %v5110_v45 = vpop.eup %5109  ;;  %v6166_v59 = vadd.f32 %v2105_v58, %v2041_v8 }
 0xffd   :  { %5119 = vtanh.f32 %v6161_v3  ;;  %2140 = vrot.lane.b32.xlu0 %v5110_v45, %s5318_s3 }
 0xffe   :  { %5121 = vtanh.f32 %v6166_v59 }
 0xfff   :  { %v5112_v1 = vpop.eup %5111 }
0x1000   :  { %2142 = vrot.lane.b32.xlu1 %v5112_v1, %s5318_s3  ;;  %v5114_v56 = vpop.eup %5113 }
0x1001   :  { %2144 = vrot.lane.b32.xlu0 %v5114_v56, %s5318_s3 }
0x1003   :  { %v5116_v19 = vpop.eup %5115 }
0x1004   :  { %2146 = vrot.lane.b32.xlu1 %v5116_v19, %s5318_s3  ;;  %v5118_v23 = vpop.eup %5117 }
0x1005   :  { %2150 = vrot.lane.b32.xlu0 %v5118_v23, %s5318_s3 }
0x1007   :  { %v5120_v14 = vpop.eup %5119 }
0x1008   :  { %2148 = vrot.lane.b32.xlu1 %v5120_v14, %s5318_s3  ;;  %v5122_v54 = vpop.eup %5121 }
0x1009   :  { %2152 = vrot.lane.b32.xlu0 %v5122_v54, %s5318_s3 }
0x106e   :  { %v2139_v21 = vpop.permute.xlu1 %2138 }
0x106f   :  { %v2162_v26 = vmul.f32 %v6096_v62, %v2139_v21  ;;  %v2141_v47 = vpop.permute.xlu0 %2140 }
0x1070   :  { %v2163_v20 = vmul.f32 %v6100_v0, %v2141_v47 }
0x1071   :  { %v2178_v32 = vrot.slane %v2162_v26, 5 }
0x1072   :  { %v2143_v18 = vpop.permute.xlu1 %2142  ;;  %v2179_v44 = vrot.slane %v2163_v20, 4  ;;  %v4229_v37 = vrot.slane %v2163_v20, 12 }
0x1073   :  { %v2164_v53 = vmul.f32 %v6102_v12, %v2143_v18  ;;  %v2145_v28 = vpop.permute.xlu0 %2144 }
0x1074   :  { %v2180_v29 = vsel %vm492_vm3, %v2179_v44, %v2178_v32  ;;  %v3063_v55 = vsel %vm492_vm3, %v4229_v37, %v2178_v32  ;;  %v2165_v36 = vmul.f32 %v6107_v40, %v2145_v28 }
0x1075   :  { %v2181_v22 = vrot.slane %v2164_v53, 3  ;;  %v4230_v51 = vrot.slane %v2164_v53, 11 }
0x1076   :  { %v2147_v25 = vpop.permute.xlu1 %2146  ;;  %v2183_v5 = vrot.slane %v2165_v36, 2  ;;  %v4231_v12 = vrot.slane %v2165_v36, 10 }
0x1077   :  { %v2182_v62 = vsel %vm495_vm4, %v2181_v22, %v2180_v29  ;;  %v3065_v0 = vsel %vm495_vm4, %v4230_v51, %v3063_v55  ;;  %v2166_v38 = vmul.f32 %v6110_v9, %v2147_v25  ;;  %v2151_v63 = vpop.permute.xlu0 %2150 }
0x1078   :  { %v2168_v57 = vmul.f32 %v6115_v31, %v2151_v63  ;;  %v2184_v13 = vsel %vm498_vm5, %v2183_v5, %v2182_v62  ;;  %v3067_v17 = vsel %vm498_vm5, %v4231_v12, %v3065_v0 }
0x1079   :  { %v2185_v61 = vrot.slane %v2166_v38, 1  ;;  %v4232_v15 = vrot.slane %v2166_v38, 9 }
0x107a   :  { %v2149_v8 = vpop.permute.xlu1 %2148  ;;  %v2188_v1 = vrot.slane %v2168_v57, 7 }
0x107b   :  { %v2186_v40 = vsel %vm501_vm6, %v2185_v61, %v2184_v13  ;;  %v3069_v58 = vsel %vm501_vm6, %v4232_v15, %v3067_v17  ;;  %v2167_v45 = vmul.f32 %v6118_v35, %v2149_v8  ;;  %v2153_v9 = vpop.permute.xlu0 %2152 }
0x107c   :  { %v2169_v23 = vmul.f32 %v6123_v6, %v2153_v9 }
0x107d   :  { %v2187_v56 = vsel %vm504_vm7, %v2167_v45, %v2186_v40  ;;  %v3071_v19 = vsel %vm504_vm7, %v2167_v45, %v3069_v58 }
0x107e   :  { %v3073_v31 = vsel %vm507_vm8, %v2188_v1, %v3071_v19  ;;  %v2189_v14 = vsel %vm507_vm8, %v2188_v1, %v2187_v56  ;;  %v2190_v54 = vrot.slane %v2169_v23, 6 }
0x1080   :  { %v2191_v21 = vsel %vm510_vm9, %v2190_v54, %v2189_v14  ;;  %v6198_v26 = vsel %vm510_vm9, %v2190_v54, %v3073_v31 }
0x1081   :  { %2192 = vrot.lane.b32.xlu1 %v2191_v21, %s5319_s13 }
0x10f3   :  { %v2193_v35 = vpop.permute.xlu1 %2192 }
0x10f4   :  { %4475 = vmatmul.mubr.msk.f32.vlgmr.msra.gmra.mrb[12].mxu0 %vm193_vm10, %v2193_v35 }
0x10f5   :  { %4496 = vmatprep.mubr.msk.f32.mxu0 %vm5316_vm2, %v5317_v10 }
0x11c7   :  { %v2262_v47 = vpop.f32.mrb[12].mxu0 }
0x11c8   :  { %v2267_v6 = vrot.slane %v2262_v47, 2  ;;  %v4476_v20 = vpop.f32.mrb[13].mxu0  ;;  %v2268_v18 = vrot.slane %v2262_v47, 3  ;;  %v2269_v53 = vrot.slane %v2262_v47, 4  ;;  %v2270_v44 = vrot.slane %v2262_v47, 5 }
0x11c9   :  { %v2271_v28 = vrot.slane %v2262_v47, 6  ;;  %v2272_v51 = vrot.slane %v2262_v47, 7  ;;  %v2273_v36 = vrot.slane %v2262_v47, 1  ;;  %v2288_v38 = vadd.f32 %v2262_v47, %v5464_v46 }
0x11ca   :  { %v2282_v32 = vadd.f32 %v2267_v6, %v5445_v24  ;;  %v2283_v37 = vadd.f32 %v2268_v18, %v5447_v27  ;;  %v2284_v22 = vadd.f32 %v2269_v53, %v5452_v34  ;;  %v2285_v29 = vadd.f32 %v2270_v44, %v5449_v30 }
0x11cb   :  { %v2286_v25 = vadd.f32 %v2271_v28, %v5459_v41  ;;  %v2287_v62 = vadd.f32 %v2272_v51, %v5456_v39  ;;  %v2289_v0 = vadd.f32 %v2273_v36, %v5461_v43  ;;  %v4187_v23 = vmul.f32 -1.442695, %v2288_v38 }
0x11cc   :  { %5123 = vtanh.f32 %v2282_v32  ;;  %v4181_v17 = vmul.f32 -1.442695, %v2282_v32  ;;  %v4182_v8 = vmul.f32 -1.442695, %v2283_v37  ;;  %v4183_v40 = vmul.f32 -1.442695, %v2284_v22 }
0x11cd   :  { %5125 = vtanh.f32 %v2283_v37  ;;  %v4184_v58 = vmul.f32 -1.442695, %v2285_v29  ;;  %v4185_v1 = vmul.f32 -1.442695, %v2286_v25  ;;  %v4186_v9 = vmul.f32 -1.442695, %v2287_v62 }
0x11ce   :  { %5127 = vtanh.f32 %v2284_v22  ;;  %v4188_v19 = vmul.f32 -1.442695, %v2289_v0 }
0x11cf   :  { %5129 = vtanh.f32 %v2285_v29 }
0x11d0   :  { %5131 = vtanh.f32 %v2286_v25 }
0x11d1   :  { %5133 = vtanh.f32 %v2287_v62 }
0x11d2   :  { %5135 = vtanh.f32 %v2289_v0 }
0x11d3   :  { %5137 = vtanh.f32 %v2288_v38 }
0x11d4   :  { %5139 = vpow2.f32 %v4181_v17 }
0x11d5   :  { %5141 = vpow2.f32 %v4182_v8 }
0x11d6   :  { %v5124_v55 = vpop.eup %5123  ;;  %5143 = vpow2.f32 %v4183_v40 }
0x11d7   :  { %2386 = vrot.lane.b32.xlu0 %v5124_v55, %s5318_s3  ;;  %v5126_v5 = vpop.eup %5125  ;;  %5145 = vpow2.f32 %v4184_v58 }
0x11d8   :  { %v5128_v12 = vpop.eup %5127  ;;  %2388 = vrot.lane.b32.xlu1 %v5126_v5, %s5318_s3  ;;  %5147 = vpow2.f32 %v4185_v1 }
0x11d9   :  { %v5130_v63 = vpop.eup %5129  ;;  %5149 = vpow2.f32 %v4186_v9 }
0x11da   :  { %v5132_v61 = vpop.eup %5131 }
0x11db   :  { %2390 = vrot.lane.b32.xlu0 %v5128_v12, %s5318_s3  ;;  %v5134_v15 = vpop.eup %5133 }
0x11dc   :  { %2392 = vrot.lane.b32.xlu1 %v5130_v63, %s5318_s3  ;;  %v5136_v57 = vpop.eup %5135 }
0x11dd   :  { %v5138_v13 = vpop.eup %5137 }
0x11de   :  { %v5140_v45 = vpop.eup %5139 }
0x11df   :  { %2394 = vrot.lane.b32.xlu0 %v5132_v61, %s5318_s3  ;;  %v2314_v56 = vadd.f32 1.0, %v5140_v45  ;;  %v5142_v31 = vpop.eup %5141 }
0x11e0   :  { %2396 = vrot.lane.b32.xlu1 %v5134_v15, %s5318_s3  ;;  %v5144_v14 = vpop.eup %5143  ;;  %v2315_v54 = vadd.f32 1.0, %v5142_v31 }
0x11e1   :  { %5151 = vrcp.f32 %v2314_v56  ;;  %v5146_v21 = vpop.eup %5145  ;;  %v2316_v35 = vadd.f32 1.0, %v5144_v14 }
0x11e2   :  { %5153 = vpow2.f32 %v4188_v19  ;;  %v5148_v47 = vpop.eup %5147  ;;  %v2317_v20 = vadd.f32 1.0, %v5146_v21  ;;  %v2354_v19 = vrot.slane %v6130_v11, 7  ;;  %v2356_v21 = vrot.slane %v6141_v52, 7 }
0x11e3   :  { %2400 = vrot.lane.b32.xlu0 %v5136_v57, %s5318_s3  ;;  %5155 = vpow2.f32 %v4187_v23  ;;  %v5150_v6 = vpop.eup %5149  ;;  %v2318_v53 = vadd.f32 1.0, %v5148_v47 }
0x11e4   :  { %2398 = vrot.lane.b32.xlu1 %v5138_v13, %s5318_s3  ;;  %5157 = vrcp.f32 %v2315_v54  ;;  %v2319_v28 = vadd.f32 1.0, %v5150_v6  ;;  %v2355_v54 = vrot.slane %v6138_v33, 7 }
0x11e5   :  { %5159 = vrcp.f32 %v2316_v35 }
0x11e6   :  { %5161 = vrcp.f32 %v2317_v20  ;;  %v2357_v20 = vrot.slane %v6148_v4, 7 }
0x11e7   :  { %5163 = vrcp.f32 %v2318_v53  ;;  %v2358_v53 = vrot.slane %v6152_v7, 7  ;;  %v2361_v7 = vrot.slane %v6166_v59, 7 }
0x11e8   :  { %5165 = vrcp.f32 %v2319_v28 }
0x11eb   :  { %v6220_v32 = vpop.eup %5151 }
0x11ec   :  { %v5154_v44 = vpop.eup %5153  ;;  %v2370_v23 = vmul.f32 %v6220_v32, %v2354_v19 }
0x11ed   :  { %v5156_v22 = vpop.eup %5155  ;;  %v2321_v51 = vadd.f32 1.0, %v5154_v44 }
0x11ee   :  { %v2320_v29 = vadd.f32 1.0, %v5156_v22  ;;  %v6224_v55 = vpop.eup %5157  ;;  %v2359_v22 = vrot.slane %v6161_v3, 7  ;;  %v2360_v3 = vrot.slane %v6159_v42, 7 }
0x11ef   :  { %5167 = vrcp.f32 %v2321_v51  ;;  %v6226_v25 = vpop.eup %5159  ;;  %v2371_v35 = vmul.f32 %v6224_v55, %v2355_v54 }
0x11f0   :  { %5169 = vrcp.f32 %v2320_v29  ;;  %v6231_v5 = vpop.eup %5161  ;;  %v2372_v6 = vmul.f32 %v6226_v25, %v2356_v21 }
0x11f1   :  { %v6234_v63 = vpop.eup %5163  ;;  %v2373_v33 = vmul.f32 %v6231_v5, %v2357_v20 }
0x11f2   :  { %v6239_v13 = vpop.eup %5165  ;;  %v2374_v28 = vmul.f32 %v6234_v63, %v2358_v53 }
0x11f9   :  { %v6242_v8 = vpop.eup %5167 }
0x11fa   :  { %v6247_v1 = vpop.eup %5169 }
0x11fb   :  { %v2376_v59 = vmul.f32 %v6247_v1, %v2360_v3 }
0x1249   :  { %v2387_v18 = vpop.permute.xlu0 %2386 }
0x124a   :  { %v2410_v37 = vmul.f32 %v6220_v32, %v2387_v18  ;;  %v2389_v36 = vpop.permute.xlu1 %2388 }
0x124b   :  { %v2411_v62 = vmul.f32 %v6224_v55, %v2389_v36  ;;  %v2375_v36 = vmul.f32 %v6239_v13, %v2359_v22 }
0x124c   :  { %2426 = vrot.lane.b32.xlu0 %v2410_v37, %s5318_s3 }
0x124d   :  { %v2391_v0 = vpop.permute.xlu0 %2390  ;;  %2428 = vrot.lane.b32.xlu1 %v2411_v62, %s5318_s3 }
0x124e   :  { %v2412_v38 = vmul.f32 %v6226_v25, %v2391_v0  ;;  %v2393_v12 = vpop.permute.xlu1 %2392  ;;  %v2377_v0 = vmul.f32 %v6242_v8, %v2361_v7 }
0x124f   :  { %v2413_v61 = vmul.f32 %v6231_v5, %v2393_v12 }
0x1250   :  { %2430 = vrot.lane.b32.xlu0 %v2412_v38, %s5318_s3 }
0x1251   :  { %v2395_v15 = vpop.permute.xlu0 %2394  ;;  %2432 = vrot.lane.b32.xlu1 %v2413_v61, %s5318_s3 }
0x1252   :  { %v2414_v57 = vmul.f32 %v6234_v63, %v2395_v15  ;;  %v2397_v17 = vpop.permute.xlu1 %2396 }
0x1253   :  { %v2415_v40 = vmul.f32 %v6239_v13, %v2397_v17 }
0x1254   :  { %2434 = vrot.lane.b32.xlu0 %v2414_v57, %s5318_s3 }
0x1255   :  { %v2401_v58 = vpop.permute.xlu0 %2400  ;;  %2436 = vrot.lane.b32.xlu1 %v2415_v40, %s5318_s3 }
0x1256   :  { %v2417_v45 = vmul.f32 %v6242_v8, %v2401_v58  ;;  %v2399_v9 = vpop.permute.xlu1 %2398 }
0x1257   :  { %v2416_v56 = vmul.f32 %v6247_v1, %v2399_v9 }
0x1258   :  { %2440 = vrot.lane.b32.xlu0 %v2417_v45, %s5318_s3 }
0x1259   :  { %2438 = vrot.lane.b32.xlu1 %v2416_v56, %s5318_s3 }
0x12be   :  { %v2427_v31 = vpop.permute.xlu0 %2426 }
0x12bf   :  { %v6254_v14 = vadd.f32 %v2427_v31, %v2370_v23  ;;  %v2429_v47 = vpop.permute.xlu1 %2428 }
0x12c0   :  { %v6262_v18 = vadd.f32 %v2429_v47, %v2371_v35 }
0x12c1   :  { %5171 = vtanh.f32 %v6254_v14 }
0x12c2   :  { %v2431_v11 = vpop.permute.xlu0 %2430  ;;  %5173 = vtanh.f32 %v6262_v18 }
0x12c3   :  { %v6265_v44 = vadd.f32 %v2431_v11, %v2372_v6  ;;  %v2433_v52 = vpop.permute.xlu1 %2432 }
0x12c4   :  { %v6272_v4 = vadd.f32 %v2433_v52, %v2373_v33 }
0x12c5   :  { %5175 = vtanh.f32 %v6265_v44 }
0x12c6   :  { %v2435_v51 = vpop.permute.xlu0 %2434  ;;  %5177 = vtanh.f32 %v6272_v4 }
0x12c7   :  { %v6276_v29 = vadd.f32 %v2435_v51, %v2374_v28  ;;  %v2437_v62 = vpop.permute.xlu1 %2436 }
0x12c8   :  { %v6283_v38 = vadd.f32 %v2437_v62, %v2375_v36 }
0x12c9   :  { %5179 = vtanh.f32 %v6276_v29 }
0x12ca   :  { %v2441_v12 = vpop.permute.xlu0 %2440  ;;  %5181 = vtanh.f32 %v6283_v38 }
0x12cb   :  { %v5172_v37 = vpop.eup %5171  ;;  %v6285_v61 = vadd.f32 %v2441_v12, %v2377_v0  ;;  %v2439_v15 = vpop.permute.xlu1 %2438 }
0x12cc   :  { %2474 = vrot.lane.b32.xlu0 %v5172_v37, %s5318_s3  ;;  %v5174_v57 = vpop.eup %5173  ;;  %v6290_v17 = vadd.f32 %v2439_v15, %v2376_v59 }
0x12cd   :  { %5183 = vtanh.f32 %v6285_v61  ;;  %2476 = vrot.lane.b32.xlu1 %v5174_v57, %s5318_s3 }
0x12ce   :  { %5185 = vtanh.f32 %v6290_v17 }
0x12cf   :  { %v5176_v40 = vpop.eup %5175 }
0x12d0   :  { %2478 = vrot.lane.b32.xlu0 %v5176_v40, %s5318_s3  ;;  %v5178_v42 = vpop.eup %5177 }
0x12d1   :  { %2480 = vrot.lane.b32.xlu1 %v5178_v42, %s5318_s3 }
0x12d3   :  { %v5180_v58 = vpop.eup %5179 }
0x12d4   :  { %2482 = vrot.lane.b32.xlu0 %v5180_v58, %s5318_s3  ;;  %v5182_v45 = vpop.eup %5181 }
0x12d5   :  { %2484 = vrot.lane.b32.xlu1 %v5182_v45, %s5318_s3 }
0x12d7   :  { %v5184_v9 = vpop.eup %5183 }
0x12d8   :  { %2488 = vrot.lane.b32.xlu0 %v5184_v9, %s5318_s3  ;;  %v5186_v56 = vpop.eup %5185 }
0x12d9   :  { %2486 = vrot.lane.b32.xlu1 %v5186_v56, %s5318_s3 }
0x133e   :  { %v2475_v19 = vpop.permute.xlu0 %2474 }
0x133f   :  { %v2498_v23 = vmul.f32 %v6220_v32, %v2475_v19  ;;  %v2477_v31 = vpop.permute.xlu1 %2476 }
0x1340   :  { %v2499_v54 = vmul.f32 %v6224_v55, %v2477_v31 }
0x1341   :  { %v2514_v21 = vrot.slane %v2498_v23, 6 }
0x1342   :  { %v2479_v35 = vpop.permute.xlu0 %2478  ;;  %v2515_v6 = vrot.slane %v2499_v54, 5  ;;  %v4236_v20 = vrot.slane %v2499_v54, 13 }
0x1343   :  { %v2500_v47 = vmul.f32 %v6226_v25, %v2479_v35  ;;  %v2481_v11 = vpop.permute.xlu1 %2480 }
0x1344   :  { %v2516_v37 = vsel %vm492_vm3, %v2515_v6, %v2514_v21  ;;  %v3077_v52 = vsel %vm492_vm3, %v4236_v20, %v2514_v21  ;;  %v2501_v28 = vmul.f32 %v6231_v5, %v2481_v11 }
0x1345   :  { %v2517_v53 = vrot.slane %v2500_v47, 4  ;;  %v4237_v33 = vrot.slane %v2500_v47, 12 }
0x1346   :  { %v2483_v22 = vpop.permute.xlu0 %2482  ;;  %v2519_v7 = vrot.slane %v2501_v28, 3  ;;  %v4238_v25 = vrot.slane %v2501_v28, 11 }
0x1347   :  { %v2518_v32 = vsel %vm495_vm4, %v2517_v53, %v2516_v37  ;;  %v3079_v55 = vsel %vm495_vm4, %v4237_v33, %v3077_v52  ;;  %v2502_v51 = vmul.f32 %v6234_v63, %v2483_v22  ;;  %v2485_v36 = vpop.permute.xlu1 %2484 }
0x1348   :  { %v2503_v3 = vmul.f32 %v6239_v13, %v2485_v36  ;;  %v2520_v12 = vsel %vm498_vm5, %v2519_v7, %v2518_v32  ;;  %v3081_v59 = vsel %vm498_vm5, %v4238_v25, %v3079_v55 }
0x1349   :  { %v2521_v62 = vrot.slane %v2502_v51, 2  ;;  %v4239_v0 = vrot.slane %v2502_v51, 10 }
0x134a   :  { %v2489_v15 = vpop.permute.xlu0 %2488  ;;  %v2523_v42 = vrot.slane %v2503_v3, 1  ;;  %v4240_v63 = vrot.slane %v2503_v3, 9 }
0x134b   :  { %v2522_v5 = vsel %vm501_vm6, %v2521_v62, %v2520_v12  ;;  %v3083_v57 = vsel %vm501_vm6, %v4239_v0, %v3081_v59  ;;  %v2505_v40 = vmul.f32 %v6242_v8, %v2489_v15  ;;  %v2487_v58 = vpop.permute.xlu1 %2486 }
0x134c   :  { %v2504_v9 = vmul.f32 %v6247_v1, %v2487_v58  ;;  %v2524_v56 = vsel %vm504_vm7, %v2523_v42, %v2522_v5  ;;  %v3085_v13 = vsel %vm504_vm7, %v4240_v63, %v3083_v57 }
0x134d   :  { %v2526_v45 = vrot.slane %v2505_v40, 7 }
0x134e   :  { %v2525_v19 = vsel %vm507_vm8, %v2504_v9, %v2524_v56  ;;  %v3087_v23 = vsel %vm507_vm8, %v2504_v9, %v3085_v13 }
0x134f   :  { %v2527_v31 = vsel %vm510_vm9, %v2526_v45, %v2525_v19  ;;  %v6322_v54 = vsel %vm510_vm9, %v2526_v45, %v3087_v23 }
0x1350   :  { %2528 = vrot.lane.b32.xlu0 %v2527_v31, %s5319_s13 }
0x13c2   :  { %v2529_v8 = vpop.permute.xlu0 %2528 }
0x13c3   :  { %4486 = vmatmul.mubr.msk.f32.vlgmr.msra.gmra.mrb[8].mxu1 %vm193_vm10, %v2529_v8 }
0x13c4   :  { %4507 = vmatprep.mubr.msk.f32.mxu1 %vm193_vm10, %v5565_v48 }
0x1496   :  { %v2598_v1 = vpop.f32.mrb[8].mxu1 }
0x1497   :  { %v2603_v21 = vrot.slane %v2598_v1, 1  ;;  %v4487_v35 = vpop.f32.mrb[9].mxu1  ;;  %v2604_v6 = vrot.slane %v2598_v1, 2  ;;  %v2605_v20 = vrot.slane %v2598_v1, 3  ;;  %v2606_v11 = vrot.slane %v2598_v1, 4 }
0x1498   :  { %v2607_v33 = vrot.slane %v2598_v1, 5  ;;  %v2608_v52 = vrot.slane %v2598_v1, 6  ;;  %v2609_v48 = vrot.slane %v2598_v1, 7 }
0x1499   :  { %v2618_v47 = vadd.f32 %v2603_v21, %v5445_v24  ;;  %v2619_v53 = vadd.f32 %v2604_v6, %v5447_v27  ;;  %v2620_v37 = vadd.f32 %v2605_v20, %v5452_v34  ;;  %v2621_v28 = vadd.f32 %v2606_v11, %v5449_v30 }
0x149a   :  { %v2622_v32 = vadd.f32 %v2607_v33, %v5459_v41  ;;  %v2623_v24 = vadd.f32 %v2608_v52, %v5456_v39  ;;  %v2624_v55 = vadd.f32 %v2609_v48, %v5464_v46  ;;  %v2625_v27 = vadd.f32 %v2598_v1, %v5461_v43 }
0x149b   :  { %5187 = vtanh.f32 %v2618_v47  ;;  %v4190_v7 = vmul.f32 -1.442695, %v2618_v47  ;;  %v4191_v25 = vmul.f32 -1.442695, %v2619_v53  ;;  %v4192_v36 = vmul.f32 -1.442695, %v2620_v37 }
0x149c   :  { %5189 = vtanh.f32 %v2619_v53  ;;  %v4193_v62 = vmul.f32 -1.442695, %v2621_v28  ;;  %v4194_v3 = vmul.f32 -1.442695, %v2622_v32  ;;  %v4195_v12 = vmul.f32 -1.442695, %v2623_v24 }
0x149d   :  { %5191 = vtanh.f32 %v2620_v37  ;;  %v4196_v15 = vmul.f32 -1.442695, %v2624_v55  ;;  %v4197_v5 = vmul.f32 -1.442695, %v2625_v27 }
0x149e   :  { %5193 = vtanh.f32 %v2621_v28 }
0x149f   :  { %5195 = vtanh.f32 %v2622_v32 }
0x14a0   :  { %5197 = vtanh.f32 %v2623_v24 }
0x14a1   :  { %5199 = vtanh.f32 %v2624_v55 }
0x14a2   :  { %5201 = vtanh.f32 %v2625_v27 }
0x14a3   :  { %5203 = vpow2.f32 %v4190_v7  ;;  %v2690_v7 = vrot.slane %v6254_v14, 7  ;;  %v2694_v14 = vrot.slane %v6276_v29, 7 }
0x14a4   :  { %5205 = vpow2.f32 %v4191_v25 }
0x14a5   :  { %v5188_v22 = vpop.eup %5187  ;;  %5207 = vpow2.f32 %v4192_v36 }
0x14a6   :  { %2722 = vrot.lane.b32.xlu1 %v5188_v22, %s5318_s3  ;;  %v5190_v34 = vpop.eup %5189  ;;  %5209 = vpow2.f32 %v4193_v62 }
0x14a7   :  { %v5192_v30 = vpop.eup %5191  ;;  %2724 = vrot.lane.b32.xlu0 %v5190_v34, %s5318_s3  ;;  %5211 = vpow2.f32 %v4194_v3  ;;  %v2692_v3 = vrot.slane %v6265_v44, 7  ;;  %v2695_v44 = vrot.slane %v6283_v38, 7 }
0x14a8   :  { %v5194_v41 = vpop.eup %5193  ;;  %5213 = vpow2.f32 %v4195_v12 }
0x14a9   :  { %v5196_v51 = vpop.eup %5195 }
0x14aa   :  { %2726 = vrot.lane.b32.xlu1 %v5192_v30, %s5318_s3  ;;  %v5198_v39 = vpop.eup %5197 }
0x14ab   :  { %2728 = vrot.lane.b32.xlu0 %v5194_v41, %s5318_s3  ;;  %v5200_v46 = vpop.eup %5199 }
0x14ac   :  { %v5202_v43 = vpop.eup %5201 }
0x14ad   :  { %v5204_v0 = vpop.eup %5203 }
0x14ae   :  { %2730 = vrot.lane.b32.xlu1 %v5196_v51, %s5318_s3  ;;  %v2650_v59 = vadd.f32 1.0, %v5204_v0  ;;  %v5206_v57 = vpop.eup %5205  ;;  %v2691_v0 = vrot.slane %v6262_v18, 7 }
0x14af   :  { %2732 = vrot.lane.b32.xlu0 %v5198_v39, %s5318_s3  ;;  %v5208_v40 = vpop.eup %5207  ;;  %v2651_v42 = vadd.f32 1.0, %v5206_v57 }
0x14b0   :  { %5215 = vrcp.f32 %v2650_v59  ;;  %v5210_v63 = vpop.eup %5209  ;;  %v2652_v58 = vadd.f32 1.0, %v5208_v40 }
0x14b1   :  { %5217 = vpow2.f32 %v4196_v15  ;;  %v5212_v45 = vpop.eup %5211  ;;  %v2653_v56 = vadd.f32 1.0, %v5210_v63 }
0x14b2   :  { %2734 = vrot.lane.b32.xlu1 %v5200_v46, %s5318_s3  ;;  %5219 = vpow2.f32 %v4197_v5  ;;  %v5214_v9 = vpop.eup %5213  ;;  %v2654_v23 = vadd.f32 1.0, %v5212_v45  ;;  %v2693_v5 = vrot.slane %v6272_v4, 7  ;;  %v2696_v4 = vrot.slane %v6290_v17, 7  ;;  %v2995_v17 = vld [vmem:[%s6633_s4] sm:$0xff] }
0x14b3   :  { %2736 = vrot.lane.b32.xlu0 %v5202_v43, %s5318_s3  ;;  %5221 = vrcp.f32 %v2651_v42  ;;  %v2655_v1 = vadd.f32 1.0, %v5214_v9 }
0x14b4   :  { %5223 = vrcp.f32 %v2652_v58 }
0x14b5   :  { %5225 = vrcp.f32 %v2653_v56 }
0x14b6   :  { %5227 = vrcp.f32 %v2654_v23 }
0x14b7   :  { %5229 = vrcp.f32 %v2655_v1 }
0x14ba   :  { %v6344_v13 = vpop.eup %5215 }
0x14bb   :  { %v5218_v31 = vpop.eup %5217  ;;  %v2706_v25 = vmul.f32 %v6344_v13, %v2690_v7 }
0x14bc   :  { %v5220_v21 = vpop.eup %5219  ;;  %v2656_v35 = vadd.f32 1.0, %v5218_v31 }
0x14bd   :  { %v2657_v47 = vadd.f32 1.0, %v5220_v21  ;;  %v6348_v6 = vpop.eup %5221 }
0x14be   :  { %5231 = vrcp.f32 %v2656_v35  ;;  %v6350_v11 = vpop.eup %5223  ;;  %v2707_v12 = vmul.f32 %v6348_v6, %v2691_v0 }
0x14bf   :  { %5233 = vrcp.f32 %v2657_v47  ;;  %v6355_v52 = vpop.eup %5225  ;;  %v2708_v15 = vmul.f32 %v6350_v11, %v2692_v3 }
0x14c0   :  { %v6358_v22 = vpop.eup %5227  ;;  %v2709_v63 = vmul.f32 %v6355_v52, %v2693_v5 }
0x14c1   :  { %v6363_v55 = vpop.eup %5229  ;;  %v2710_v18 = vmul.f32 %v6358_v22, %v2694_v14 }
0x14c2   :  { %v2711_v29 = vmul.f32 %v6363_v55, %v2695_v44 }
0x14c8   :  { %v6366_v34 = vpop.eup %5231 }
0x14c9   :  { %v6371_v39 = vpop.eup %5233  ;;  %v2712_v31 = vmul.f32 %v6366_v34, %v2696_v4 }
0x1518   :  { %v2723_v19 = vpop.permute.xlu1 %2722 }
0x1519   :  { %v2746_v8 = vmul.f32 %v6344_v13, %v2723_v19  ;;  %v2725_v20 = vpop.permute.xlu0 %2724 }
0x151a   :  { %v2747_v53 = vmul.f32 %v6348_v6, %v2725_v20  ;;  %v2996_v20 = vld [vmem:[%s6633_s4 + $0x8] sm:$0xff] }
0x151b   :  { %2762 = vrot.lane.b32.xlu1 %v2746_v8, %s5318_s3  ;;  %v2697_v8 = vrot.slane %v6285_v61, 7  ;;  %v2997_v61 = vld [vmem:[%s6633_s4 + $0x10] sm:$0xff] }
0x151c   :  { %v2727_v33 = vpop.permute.xlu1 %2726  ;;  %2764 = vrot.lane.b32.xlu0 %v2747_v53, %s5318_s3 }
0x151d   :  { %v2748_v37 = vmul.f32 %v6350_v11, %v2727_v33  ;;  %v2729_v28 = vpop.permute.xlu0 %2728  ;;  %v2713_v38 = vmul.f32 %v6371_v39, %v2697_v8 }
0x151e   :  { %v2749_v48 = vmul.f32 %v6355_v52, %v2729_v28  ;;  %v2998_v28 = vld [vmem:[%s6633_s4 + $0x18] sm:$0xff] }
0x151f   :  { %2766 = vrot.lane.b32.xlu1 %v2748_v37, %s5318_s3  ;;  %v4672_v37 = vpack.c.bf16 %v2996_v20, %v2995_v17 }
0x1520   :  { %v2731_v32 = vpop.permute.xlu1 %2730  ;;  %2768 = vrot.lane.b32.xlu0 %v2749_v48, %s5318_s3 }
0x1521   :  { %v2750_v24 = vmul.f32 %v6358_v22, %v2731_v32  ;;  %v2733_v27 = vpop.permute.xlu0 %2732  ;;  %v4676_v32 = vpack.c.bf16 %v2998_v28, %v2997_v61  ;;  %4673 = vmatprep.subr.bf16.mxu1 %v4672_v37 }
0x1522   :  { %v2751_v30 = vmul.f32 %v6363_v55, %v2733_v27  ;;  %4675 = vmatpush3.bf16.msra.mxu1 %v4672_v37  ;;  %v3238_v37 = vld [vmem:[%s6635_s5 + $0x8] sm:$0xff] }
0x1523   :  { %2770 = vrot.lane.b32.xlu1 %v2750_v24, %s5318_s3  ;;  %4677 = vmatprep.subr.bf16.mxu1 %v4676_v32 }
0x1524   :  { %v2735_v41 = vpop.permute.xlu1 %2734  ;;  %2772 = vrot.lane.b32.xlu0 %v2751_v30, %s5318_s3  ;;  %v34_v30 = vld [vmem:[%s6634_s7] sm:$0xff] }
0x1525   :  { %v2752_v51 = vmul.f32 %v6366_v34, %v2735_v41  ;;  %v2737_v46 = vpop.permute.xlu0 %2736  ;;  %v35_v41 = vld [vmem:[%s6634_s7 + $0x8] sm:$0xff] }
0x1526   :  { %v2753_v43 = vmul.f32 %v6371_v39, %v2737_v46  ;;  %v6418_v46 = vpack.c.bf16 %v35_v41, %v34_v30  ;;  %4679 = vmatpush3.bf16.msra.mxu1 %v4676_v32  ;;  %v3240_v30 = vld [vmem:[%s6635_s5 + $0x18] sm:$0xff] }
0x1527   :  { %2774 = vrot.lane.b32.xlu1 %v2752_v51, %s5318_s3  ;;  %v36_v51 = vld [vmem:[%s6634_s7 + $0x10] sm:$0xff]  ;;  %4692 = vmatprep.subr.bf16.mxu1 %v5315_v2 }
0x1528   :  { %2776 = vrot.lane.b32.xlu0 %v2753_v43, %s5318_s3  ;;  %v37_v43 = vld [vmem:[%s6634_s7 + $0x18] sm:$0xff]  ;;  %4668 = vmatpush3.bf16.msra.mxu0 %v6418_v46 }
0x1529   :  { %4669 = vmatprep.subr.bf16.mxu0 %v5315_v2 }
0x158d   :  { %v2763_v36 = vpop.permute.xlu1 %2762 }
0x158e   :  { %v2786_v62 = vadd.f32 %v2763_v36, %v2706_v25  ;;  %v2765_v59 = vpop.permute.xlu0 %2764  ;;  %v6424_v25 = vpack.c.bf16 %v37_v43, %v36_v51  ;;  %v14_v51 = vstv %s6636_s8 }
0x158f   :  { %v2787_v57 = vadd.f32 %v2765_v59, %v2707_v12  ;;  %15 = vst [vmem:[#allocation2] sm:$0x1] %v14_v51 }
0x1590   :  { %5235 = vtanh.f32 %v2786_v62  ;;  %4671 = vmatpush3.bf16.msra.mxu0 %v6424_v25 }
0x1591   :  { %v2767_v40 = vpop.permute.xlu1 %2766  ;;  %5237 = vtanh.f32 %v2787_v57  ;;  %4680 = vmatprep.subr.bf16.mxu0 %v5315_v2 }
0x1592   :  { %v2788_v42 = vadd.f32 %v2767_v40, %v2708_v15  ;;  %v2769_v45 = vpop.permute.xlu0 %2768 }
0x1593   :  { %v2789_v9 = vadd.f32 %v2769_v45, %v2709_v63 }
0x1594   :  { %5239 = vtanh.f32 %v2788_v42 }
0x1595   :  { %v2771_v56 = vpop.permute.xlu1 %2770  ;;  %5241 = vtanh.f32 %v2789_v9 }
0x1596   :  { %v2790_v19 = vadd.f32 %v2771_v56, %v2710_v18  ;;  %v2773_v23 = vpop.permute.xlu0 %2772 }
0x1597   :  { %v2791_v1 = vadd.f32 %v2773_v23, %v2711_v29 }
0x1598   :  { %5243 = vtanh.f32 %v2790_v19 }
0x1599   :  { %v2775_v21 = vpop.permute.xlu1 %2774  ;;  %5245 = vtanh.f32 %v2791_v1 }
0x159a   :  { %v5236_v58 = vpop.eup %5235  ;;  %v2792_v35 = vadd.f32 %v2775_v21, %v2712_v31  ;;  %v2777_v47 = vpop.permute.xlu0 %2776 }
0x159b   :  { %2810 = vrot.lane.b32.xlu1 %v5236_v58, %s5318_s3  ;;  %v5238_v53 = vpop.eup %5237  ;;  %v2793_v33 = vadd.f32 %v2777_v47, %v2713_v38 }
0x159c   :  { %5247 = vtanh.f32 %v2792_v35  ;;  %2812 = vrot.lane.b32.xlu0 %v5238_v53, %s5318_s3 }
0x159d   :  { %5249 = vtanh.f32 %v2793_v33  ;;  %v3237_v33 = vld [vmem:[%s6635_s5] sm:$0xff] }
0x159e   :  { %v5240_v48 = vpop.eup %5239 }
0x159f   :  { %2814 = vrot.lane.b32.xlu1 %v5240_v48, %s5318_s3  ;;  %v5242_v24 = vpop.eup %5241 }
0x15a0   :  { %2816 = vrot.lane.b32.xlu0 %v5242_v24, %s5318_s3  ;;  %v6466_v24 = vpack.c.bf16 %v3238_v37, %v3237_v33 }
0x15a2   :  { %v5244_v27 = vpop.eup %5243 }
0x15a3   :  { %2818 = vrot.lane.b32.xlu1 %v5244_v27, %s5318_s3  ;;  %v5246_v7 = vpop.eup %5245  ;;  %v3239_v27 = vld [vmem:[%s6635_s5 + $0x10] sm:$0xff] }
0x15a4   :  { %2820 = vrot.lane.b32.xlu0 %v5246_v7, %s5318_s3  ;;  %v6477_v41 = vpack.c.bf16 %v3240_v30, %v3239_v27 }
0x15a6   :  { %v5248_v36 = vpop.eup %5247 }
0x15a7   :  { %2822 = vrot.lane.b32.xlu1 %v5248_v36, %s5318_s3  ;;  %v5250_v62 = vpop.eup %5249 }
0x15a8   :  { %2824 = vrot.lane.b32.xlu0 %v5250_v62, %s5318_s3  ;;  %v6498_v62 = vld [vmem:[#allocation2] ss:$0 sm:$0xff] }
0x15ac   :  { %3104 = vrot.lane.b32.xlu0 %v5686_v49, %s5319_s13 }
0x160d   :  { %v2811_v0 = vpop.permute.xlu1 %2810 }
0x160e   :  { %v2834_v3 = vmul.f32 %v6344_v13, %v2811_v0  ;;  %v2813_v12 = vpop.permute.xlu0 %2812 }
0x160f   :  { %v2835_v59 = vmul.f32 %v6348_v6, %v2813_v12 }
0x1610   :  { %v2856_v15 = vrot.slane %v2834_v3, 7 }
0x1611   :  { %v2815_v5 = vpop.permute.xlu1 %2814  ;;  %v2857_v40 = vrot.slane %v2835_v59, 6  ;;  %v4243_v14 = vrot.slane %v2835_v59, 14  ;;  %v6508_v59 = vld [vmem:[%s6638_s6] ss:$0 sm:$0xff] }
0x1612   :  { %v2836_v57 = vmul.f32 %v6350_v11, %v2815_v5  ;;  %v2817_v42 = vpop.permute.xlu0 %2816 }
0x1613   :  { %v2858_v45 = vsel %vm492_vm3, %v2857_v40, %v2856_v15  ;;  %v3091_v18 = vsel %vm492_vm3, %v4243_v14, %v2856_v15  ;;  %v2837_v49 = vmul.f32 %v6355_v52, %v2817_v42 }
0x1614   :  { %v2859_v63 = vrot.slane %v2836_v57, 5  ;;  %v4244_v58 = vrot.slane %v2836_v57, 13 }
0x1615   :  { %v2819_v44 = vpop.permute.xlu1 %2818  ;;  %v2861_v56 = vrot.slane %v2837_v49, 4  ;;  %v4245_v11 = vrot.slane %v2837_v49, 12 }
0x1616   :  { %v2860_v13 = vsel %vm495_vm4, %v2859_v63, %v2858_v45  ;;  %v3093_v6 = vsel %vm495_vm4, %v4244_v58, %v3091_v18  ;;  %v2838_v9 = vmul.f32 %v6358_v22, %v2819_v44  ;;  %v2821_v4 = vpop.permute.xlu0 %2820 }
0x1617   :  { %v2839_v23 = vmul.f32 %v6363_v55, %v2821_v4  ;;  %v2862_v31 = vsel %vm498_vm5, %v2861_v56, %v2860_v13  ;;  %v3095_v8 = vsel %vm498_vm5, %v4245_v11, %v3093_v6 }
0x1618   :  { %v2863_v19 = vrot.slane %v2838_v9, 3  ;;  %v4246_v29 = vrot.slane %v2838_v9, 11 }
0x1619   :  { %v2823_v1 = vpop.permute.xlu1 %2822  ;;  %v2865_v38 = vrot.slane %v2839_v23, 2  ;;  %v4247_v22 = vrot.slane %v2839_v23, 10 }
0x161a   :  { %v2864_v52 = vsel %vm501_vm6, %v2863_v19, %v2862_v31  ;;  %v3097_v21 = vsel %vm501_vm6, %v4246_v29, %v3095_v8  ;;  %v2840_v35 = vmul.f32 %v6366_v34, %v2823_v1  ;;  %v2825_v47 = vpop.permute.xlu0 %2824 }
0x161b   :  { %v2841_v53 = vmul.f32 %v6371_v39, %v2825_v47  ;;  %v2866_v55 = vsel %vm504_vm7, %v2865_v38, %v2864_v52  ;;  %v3099_v61 = vsel %vm504_vm7, %v4247_v22, %v3097_v21 }
0x161c   :  { %v2867_v17 = vrot.slane %v2840_v35, 1  ;;  %v4248_v20 = vrot.slane %v2840_v35, 9 }
0x161e   :  { %v2868_v34 = vsel %vm507_vm8, %v2867_v17, %v2866_v55  ;;  %v3101_v28 = vsel %vm507_vm8, %v4248_v20, %v3099_v61  ;;  %v3105_v32 = vpop.permute.xlu0 %3104 }
0x161f   :  { %v2869_v48 = vsel %vm510_vm9, %v2841_v53, %v2868_v34  ;;  %v6463_v39 = vsel %vm510_vm9, %v2841_v53, %v3101_v28  ;;  %4508 = vmatmul.mubr.msk.f32.vlgmr.msra.gmra.mrb[10].mxu1 %vm193_vm10, %v3105_v32 }
0x1620   :  { %2870 = vrot.lane.b32.xlu1 %v2869_v48, %s5319_s13  ;;  %4694 = vmatpush3.bf16.msra.mxu1 %v6466_v24 }
0x1621   :  { %4695 = vmatprep.subr.bf16.mxu1 %v5315_v2 }
0x1624   :  { %4697 = vmatpush3.bf16.msra.mxu1 %v6477_v41 }
0x1625   :  { %4704 = vmatprep.subr.bf16.mxu1 %v5315_v2 }
0x1692   :  { %v2871_v43 = vpop.permute.xlu1 %2870 }
0x1693   :  { %4497 = vmatmul.mubr.msk.f32.vlgmr.msra.gmra.mrb[14].mxu0 %vm193_vm10, %v2871_v43 }
0x1694   :  { %4682 = vmatpush3.bf16.msra.mxu0 %v6466_v24  ;;  %4527 = vmatprep.mubr.msk.f32.mxu0 %vm5316_vm2, %v5317_v10 }
0x1695   :  { %4683 = vmatprep.subr.bf16.mxu0 %v5315_v2 }
0x1698   :  { %4685 = vmatpush3.bf16.msra.mxu0 %v6477_v41 }
0x1699   :  { %4686 = vmatprep.subr.bf16.mxu0 %v5315_v2 }
0x169b   :  { %4528 = vmatmul.mubr.f32.vlgmr.msra.gmra.mrb[16].mxu0 %v5317_v10 }
0x169c   :  { %4688 = vmatpush3.bf16.msra.mxu0 %v6466_v24  ;;  %4538 = vmatprep.mubr.msk.f32.mxu0 %vm5316_vm2, %v5317_v10 }
0x169d   :  { %4689 = vmatprep.subr.bf16.mxu0 %v5315_v2 }
0x16a0   :  { %4691 = vmatpush3.bf16.msra.mxu0 %v6477_v41 }
0x16a1   :  { %4698 = vmatprep.subr.bf16.mxu0 %v5315_v2 }
0x16f2   :  { %v4509_v7 = vpop.f32.mrb[10].mxu1 }
0x16f3   :  { %v3198_v36 = vpop.f32.mrb[11].mxu1  ;;  %v3204_v19 = vadd.f32 %v4509_v7, %v6508_v59 }
0x16f4   :  { %v3199_v15 = vadd.f32 %v6508_v59, %v3198_v36 }
0x1766   :  { %v2940_v0 = vpop.f32.mrb[14].mxu0 }
0x1767   :  { %v2941_v3 = vadd.f32 %v6498_v62, %v2940_v0  ;;  %v4498_v12 = vpop.f32.mrb[15].mxu0 }
0x1769   :  { %2945 = vst.msk [vmem:[%s6637_s9] sm:$0xff] %vm2944_vm11, %v2941_v3 }
0x176e   :  { %v3307_v5 = vpop.f32.mrb[16].mxu0 }
0x176f   :  { %v3311_v57 = vadd.f32 %v3307_v5, %v3199_v15  ;;  %v4529_v40 = vpop.f32.mrb[17].mxu0 }
0x1771   :  { %5251 = vtanh.f32 %v3311_v57  ;;  %v4258_v42 = vmul.f32 -1.442695, %v3311_v57 }
0x1773   :  { %5253 = vpow2.f32 %v4258_v42 }
0x177b   :  { %v5252_v14 = vpop.eup %5251 }
0x177c   :  { %3321 = vrot.lane.b32.xlu1 %v5252_v14, %s5318_s3 }
0x177d   :  { %v5254_v63 = vpop.eup %5253 }
0x177e   :  { %v3315_v58 = vadd.f32 1.0, %v5254_v63 }
0x1780   :  { %5255 = vrcp.f32 %v3315_v58 }
0x178a   :  { %v5256_v45 = vpop.eup %5255 }
0x178b   :  { %v3319_v44 = vmul.f32 0.0, %v5256_v45 }
0x17ee   :  { %v3322_v18 = vpop.permute.xlu1 %3321 }
0x17ef   :  { %v3324_v49 = vmul.f32 %v5256_v45, %v3322_v18 }
0x17f1   :  { %3326 = vrot.lane.b32.xlu0 %v3324_v49, %s5318_s3 }
0x1863   :  { %v3327_v13 = vpop.permute.xlu0 %3326 }
0x1864   :  { %v3329_v6 = vadd.f32 %v3327_v13, %v3319_v44 }
0x1866   :  { %5257 = vtanh.f32 %v3329_v6 }
0x1870   :  { %v5258_v9 = vpop.eup %5257 }
0x1871   :  { %3332 = vrot.lane.b32.xlu1 %v5258_v9, %s5318_s3 }
0x18e3   :  { %v3333_v56 = vpop.permute.xlu1 %3332 }
0x18e4   :  { %v3335_v11 = vmul.f32 %v5256_v45, %v3333_v56 }
0x18e6   :  { %3337 = vrot.lane.b32.xlu0 %v3335_v11, %s5319_s13 }
0x1958   :  { %v3338_v4 = vpop.permute.xlu0 %3337 }
0x1959   :  { %4539 = vmatmul.mubr.msk.f32.vlgmr.msra.gmra.mrb[18].mxu0 %vm193_vm10, %v3338_v4 }
0x195a   :  { %4700 = vmatpush3.bf16.msra.mxu0 %v6466_v24  ;;  %4560 = vmatprep.mubr.msk.f32.mxu0 %vm5316_vm2, %v5317_v10 }
0x195b   :  { %4701 = vmatprep.subr.bf16.mxu0 %v5315_v2 }
0x195e   :  { %4703 = vmatpush3.bf16.msra.mxu0 %v6477_v41 }
0x195f   :  { %4710 = vmatprep.subr.bf16.mxu0 %v5315_v2 }
0x1a2c   :  { %v3407_v29 = vpop.f32.mrb[18].mxu0 }
0x1a2d   :  { %v3411_v23 = vadd.f32 %v3407_v29, %v3204_v19  ;;  %v4540_v31 = vpop.f32.mrb[19].mxu0 }
0x1a2f   :  { %5259 = vtanh.f32 %v3411_v23  ;;  %v4260_v1 = vmul.f32 -1.442695, %v3411_v23 }
0x1a31   :  { %5261 = vpow2.f32 %v4260_v1 }
0x1a39   :  { %v5260_v8 = vpop.eup %5259 }
0x1a3a   :  { %3421 = vrot.lane.b32.xlu1 %v5260_v8, %s5318_s3 }
0x1a3b   :  { %v5262_v52 = vpop.eup %5261 }
0x1a3c   :  { %v3415_v21 = vadd.f32 1.0, %v5262_v52 }
0x1a3e   :  { %5263 = vrcp.f32 %v3415_v21 }
0x1a48   :  { %v5264_v35 = vpop.eup %5263 }
0x1a49   :  { %v3419_v47 = vmul.f32 %v5264_v35, %v3329_v6 }
0x1aac   :  { %v3422_v38 = vpop.permute.xlu1 %3421 }
0x1aad   :  { %v3424_v22 = vmul.f32 %v5264_v35, %v3422_v38 }
0x1aaf   :  { %3426 = vrot.lane.b32.xlu0 %v3424_v22, %s5318_s3 }
0x1ab3   :  { %3106 = vrot.lane.b32.xlu0 %v5815_v60, %s5319_s13 }
0x1ab7   :  { %3110 = vrot.lane.b32.xlu0 %v6071_v16, %s5319_s13 }
0x1abb   :  { %3114 = vrot.lane.b32.xlu0 %v6322_v54, %s5319_s13 }
0x1b21   :  { %v3427_v17 = vpop.permute.xlu0 %3426 }
0x1b22   :  { %v3429_v20 = vadd.f32 %v3427_v17, %v3419_v47 }
0x1b24   :  { %5265 = vtanh.f32 %v3429_v20 }
0x1b25   :  { %v3107_v53 = vpop.permute.xlu0 %3106 }
0x1b26   :  { %4510 = vmatprep.mubr.msk.f32.mxu1 %vm193_vm10, %v3107_v53 }
0x1b29   :  { %v3111_v54 = vpop.permute.xlu0 %3110 }
0x1b2d   :  { %v3115_v61 = vpop.permute.xlu0 %3114 }
0x1b2e   :  { %v5266_v55 = vpop.eup %5265 }
0x1b2f   :  { %3432 = vrot.lane.b32.xlu1 %v5266_v55, %s5318_s3 }
0x1b33   :  { %3108 = vrot.lane.b32.xlu1 %v5943_v50, %s5319_s13 }
0x1b37   :  { %3112 = vrot.lane.b32.xlu1 %v6198_v26, %s5319_s13 }
0x1b3b   :  { %3116 = vrot.lane.b32.xlu1 %v6463_v39, %s5319_s13 }
0x1ba1   :  { %v3433_v60 = vpop.permute.xlu1 %3432 }
0x1ba2   :  { %v3435_v16 = vmul.f32 %v5264_v35, %v3433_v60 }
0x1ba4   :  { %3437 = vrot.lane.b32.xlu0 %v3435_v16, %s5319_s13 }
0x1ba5   :  { %v3109_v33 = vpop.permute.xlu1 %3108 }
0x1ba6   :  { %4511 = vmatmul.mubr.msk.f32.gmra.mrb[12].mxu1 %vm193_vm10, %v3109_v33 }
0x1ba7   :  { %4513 = vmatprep.mubr.msk.f32.mxu1 %vm193_vm10, %v3111_v54 }
0x1ba9   :  { %v3113_v37 = vpop.permute.xlu1 %3112 }
0x1baa   :  { %4514 = vmatmul.mubr.msk.f32.gmra.mrb[14].mxu1 %vm193_vm10, %v3113_v37 }
0x1bab   :  { %4516 = vmatprep.mubr.msk.f32.mxu1 %vm193_vm10, %v3115_v61 }
0x1bad   :  { %v3117_v50 = vpop.permute.xlu1 %3116 }
0x1bae   :  { %4517 = vmatmul.mubr.msk.f32.gmra.mrb[16].mxu1 %vm193_vm10, %v3117_v50 }
0x1baf   :  { %4549 = vmatprep.mubr.msk.f32.mxu1 %vm5316_vm2, %v5317_v10 }
0x1c16   :  { %v3438_v26 = vpop.permute.xlu0 %3437 }
0x1c17   :  { %4550 = vmatmul.mubr.msk.f32.vlgmr.msra.gmra.mrb[18].mxu1 %vm193_vm10, %v3438_v26 }
0x1c18   :  { %4706 = vmatpush3.bf16.msra.mxu1 %v6466_v24  ;;  %4571 = vmatprep.mubr.msk.f32.mxu1 %vm5316_vm2, %v5317_v10 }
0x1c19   :  { %4707 = vmatprep.subr.bf16.mxu1 %v5315_v2 }
0x1c1c   :  { %4709 = vmatpush3.bf16.msra.mxu1 %v6477_v41 }
0x1c1d   :  { %4716 = vmatprep.subr.bf16.mxu1 %v5315_v2 }
0x1c79   :  { %v4512_v34 = vpop.f32.mrb[12].mxu1 }
0x1c7a   :  { %v3208_v28 = vpop.f32.mrb[13].mxu1  ;;  %v3214_v49 = vadd.f32 %v4512_v34, %v6508_v59 }
0x1c7b   :  { %v3209_v30 = vadd.f32 %v6508_v59, %v3208_v28 }
0x1c7d   :  { %v6554_v48 = vpop.f32.mrb[14].mxu1 }
0x1c7e   :  { %v6556_v39 = vpop.f32.mrb[15].mxu1 }
0x1c7f   :  { %v3219_v22 = vadd.f32 %v6508_v59, %v6556_v39 }
0x1c81   :  { %v6558_v32 = vpop.f32.mrb[16].mxu1 }
0x1c82   :  { %v6560_v27 = vpop.f32.mrb[17].mxu1 }
0x1cea   :  { %v3507_v51 = vpop.f32.mrb[18].mxu1 }
0x1ceb   :  { %v3511_v43 = vadd.f32 %v3507_v51, %v3209_v30  ;;  %v4551_v7 = vpop.f32.mrb[19].mxu1  ;;  %v3224_v51 = vadd.f32 %v6554_v48, %v6508_v59 }
0x1ced   :  { %5267 = vtanh.f32 %v3511_v43  ;;  %v4262_v0 = vmul.f32 -1.442695, %v3511_v43 }
0x1cef   :  { %5269 = vpow2.f32 %v4262_v0 }
0x1cf7   :  { %v5268_v36 = vpop.eup %5267 }
0x1cf8   :  { %3521 = vrot.lane.b32.xlu1 %v5268_v36, %s5318_s3 }
0x1cf9   :  { %v5270_v3 = vpop.eup %5269 }
0x1cfa   :  { %v3515_v12 = vadd.f32 1.0, %v5270_v3 }
0x1cfc   :  { %5271 = vrcp.f32 %v3515_v12 }
0x1d06   :  { %v5272_v15 = vpop.eup %5271 }
0x1d07   :  { %v3519_v40 = vmul.f32 %v5272_v15, %v3429_v20 }
0x1d6a   :  { %v3522_v5 = vpop.permute.xlu1 %3521 }
0x1d6b   :  { %v3524_v57 = vmul.f32 %v5272_v15, %v3522_v5 }
0x1d6d   :  { %3526 = vrot.lane.b32.xlu0 %v3524_v57, %s5318_s3 }
0x1ddf   :  { %v3527_v14 = vpop.permute.xlu0 %3526 }
0x1de0   :  { %v3529_v42 = vadd.f32 %v3527_v14, %v3519_v40 }
0x1de2   :  { %5273 = vtanh.f32 %v3529_v42 }
0x1dec   :  { %v5274_v63 = vpop.eup %5273 }
0x1ded   :  { %3532 = vrot.lane.b32.xlu1 %v5274_v63, %s5318_s3 }
0x1e5f   :  { %v3533_v58 = vpop.permute.xlu1 %3532 }
0x1e60   :  { %v3535_v45 = vmul.f32 %v5272_v15, %v3533_v58 }
0x1e62   :  { %3537 = vrot.lane.b32.xlu0 %v3535_v45, %s5319_s13  ;;  %v3229_v45 = vadd.f32 %v6508_v59, %v6560_v27 }
0x1ed4   :  { %v3538_v18 = vpop.permute.xlu0 %3537 }
0x1ed5   :  { %4561 = vmatmul.mubr.msk.f32.vlgmr.msra.gmra.mrb[20].mxu0 %vm193_vm10, %v3538_v18 }
0x1ed6   :  { %4712 = vmatpush3.bf16.msra.mxu0 %v6466_v24  ;;  %4582 = vmatprep.mubr.msk.f32.mxu0 %vm5316_vm2, %v5317_v10 }
0x1ed7   :  { %4713 = vmatprep.subr.bf16.mxu0 %v5315_v2 }
0x1eda   :  { %4715 = vmatpush3.bf16.msra.mxu0 %v6477_v41 }
0x1edb   :  { %4722 = vmatprep.subr.bf16.mxu0 %v5315_v2 }
0x1fa8   :  { %v3607_v44 = vpop.f32.mrb[20].mxu0 }
0x1fa9   :  { %v3611_v13 = vadd.f32 %v3607_v44, %v3214_v49  ;;  %v4562_v6 = vpop.f32.mrb[21].mxu0 }
0x1fab   :  { %5275 = vtanh.f32 %v3611_v13  ;;  %v4264_v56 = vmul.f32 -1.442695, %v3611_v13 }
0x1fad   :  { %5277 = vpow2.f32 %v4264_v56 }
0x1fb5   :  { %v5276_v9 = vpop.eup %5275 }
0x1fb6   :  { %3621 = vrot.lane.b32.xlu1 %v5276_v9, %s5318_s3 }
0x1fb7   :  { %v5278_v11 = vpop.eup %5277 }
0x1fb8   :  { %v3615_v4 = vadd.f32 1.0, %v5278_v11 }
0x1fba   :  { %5279 = vrcp.f32 %v3615_v4 }
0x1fc4   :  { %v5280_v19 = vpop.eup %5279 }
0x1fc5   :  { %v3619_v31 = vmul.f32 %v5280_v19, %v3529_v42 }
0x2028   :  { %v3622_v29 = vpop.permute.xlu1 %3621 }
0x2029   :  { %v3624_v23 = vmul.f32 %v5280_v19, %v3622_v29 }
0x202b   :  { %3626 = vrot.lane.b32.xlu0 %v3624_v23, %s5318_s3 }
0x209d   :  { %v3627_v8 = vpop.permute.xlu0 %3626 }
0x209e   :  { %v3629_v1 = vadd.f32 %v3627_v8, %v3619_v31  ;;  %v3234_v31 = vadd.f32 %v6558_v32, %v6508_v59 }
0x20a0   :  { %5281 = vtanh.f32 %v3629_v1 }
0x20aa   :  { %v5282_v52 = vpop.eup %5281 }
0x20ab   :  { %3632 = vrot.lane.b32.xlu1 %v5282_v52, %s5318_s3 }
0x211d   :  { %v3633_v21 = vpop.permute.xlu1 %3632 }
0x211e   :  { %v3635_v35 = vmul.f32 %v5280_v19, %v3633_v21 }
0x2120   :  { %3637 = vrot.lane.b32.xlu0 %v3635_v35, %s5319_s13 }
0x2192   :  { %v3638_v38 = vpop.permute.xlu0 %3637 }
0x2193   :  { %4572 = vmatmul.mubr.msk.f32.vlgmr.msra.gmra.mrb[20].mxu1 %vm193_vm10, %v3638_v38 }
0x2194   :  { %4718 = vmatpush3.bf16.msra.mxu1 %v6466_v24  ;;  %4593 = vmatprep.mubr.msk.f32.mxu1 %vm5316_vm2, %v5317_v10 }
0x2195   :  { %4719 = vmatprep.subr.bf16.mxu1 %v5315_v2 }
0x2198   :  { %4721 = vmatpush3.bf16.msra.mxu1 %v6477_v41 }
0x2199   :  { %4728 = vmatprep.subr.bf16.mxu1 %v5315_v2 }
0x2266   :  { %v3707_v47 = vpop.f32.mrb[20].mxu1 }
0x2267   :  { %v3711_v17 = vadd.f32 %v3707_v47, %v3219_v22  ;;  %v4573_v20 = vpop.f32.mrb[21].mxu1 }
0x2269   :  { %5283 = vtanh.f32 %v3711_v17  ;;  %v4266_v55 = vmul.f32 -1.442695, %v3711_v17 }
0x226b   :  { %5285 = vpow2.f32 %v4266_v55 }
0x2273   :  { %v5284_v53 = vpop.eup %5283 }
0x2274   :  { %3721 = vrot.lane.b32.xlu1 %v5284_v53, %s5318_s3 }
0x2275   :  { %v5286_v60 = vpop.eup %5285 }
0x2276   :  { %v3715_v16 = vadd.f32 1.0, %v5286_v60 }
0x2278   :  { %5287 = vrcp.f32 %v3715_v16 }
0x2282   :  { %v5288_v54 = vpop.eup %5287 }
0x2283   :  { %v3719_v61 = vmul.f32 %v5288_v54, %v3629_v1 }
0x22e6   :  { %v3722_v33 = vpop.permute.xlu1 %3721 }
0x22e7   :  { %v3724_v37 = vmul.f32 %v5288_v54, %v3722_v33 }
0x22e9   :  { %3726 = vrot.lane.b32.xlu0 %v3724_v37, %s5318_s3 }
0x235b   :  { %v3727_v50 = vpop.permute.xlu0 %3726 }
0x235c   :  { %v3729_v26 = vadd.f32 %v3727_v50, %v3719_v61 }
0x235e   :  { %5289 = vtanh.f32 %v3729_v26 }
0x2368   :  { %v5290_v34 = vpop.eup %5289 }
0x2369   :  { %3732 = vrot.lane.b32.xlu1 %v5290_v34, %s5318_s3 }
0x23db   :  { %v3733_v28 = vpop.permute.xlu1 %3732 }
0x23dc   :  { %v3735_v39 = vmul.f32 %v5288_v54, %v3733_v28 }
0x23de   :  { %3737 = vrot.lane.b32.xlu0 %v3735_v39, %s5319_s13 }
0x2450   :  { %v3738_v30 = vpop.permute.xlu0 %3737 }
0x2451   :  { %4583 = vmatmul.mubr.msk.f32.vlgmr.msra.gmra.mrb[22].mxu0 %vm193_vm10, %v3738_v30 }
0x2452   :  { %4724 = vmatpush3.bf16.msra.mxu0 %v6466_v24  ;;  %4604 = vmatprep.mubr.msk.f32.mxu0 %vm5316_vm2, %v5317_v10 }
0x2453   :  { %4725 = vmatprep.subr.bf16.mxu0 %v5315_v2 }
0x2456   :  { %4727 = vmatpush3.bf16.msra.mxu0 %v6477_v41 }
0x2524   :  { %v3807_v43 = vpop.f32.mrb[22].mxu0 }
0x2525   :  { %v3811_v7 = vadd.f32 %v3807_v43, %v3224_v51  ;;  %v4584_v36 = vpop.f32.mrb[23].mxu0 }
0x2527   :  { %5291 = vtanh.f32 %v3811_v7  ;;  %v4268_v3 = vmul.f32 -1.442695, %v3811_v7 }
0x2529   :  { %5293 = vpow2.f32 %v4268_v3 }
0x2531   :  { %v5292_v0 = vpop.eup %5291 }
0x2532   :  { %3821 = vrot.lane.b32.xlu1 %v5292_v0, %s5318_s3 }
0x2533   :  { %v5294_v24 = vpop.eup %5293 }
0x2534   :  { %v3815_v12 = vadd.f32 1.0, %v5294_v24 }
0x2536   :  { %5295 = vrcp.f32 %v3815_v12 }
0x2540   :  { %v5296_v15 = vpop.eup %5295 }
0x2541   :  { %v3819_v41 = vmul.f32 %v5296_v15, %v3729_v26 }
0x25a4   :  { %v3822_v5 = vpop.permute.xlu1 %3821 }
0x25a5   :  { %v3824_v57 = vmul.f32 %v5296_v15, %v3822_v5 }
0x25a7   :  { %3826 = vrot.lane.b32.xlu0 %v3824_v57, %s5318_s3 }
0x2619   :  { %v3827_v40 = vpop.permute.xlu0 %3826 }
0x261a   :  { %v3829_v48 = vadd.f32 %v3827_v40, %v3819_v41 }
0x261c   :  { %5297 = vtanh.f32 %v3829_v48 }
0x2626   :  { %v5298_v14 = vpop.eup %5297 }
0x2627   :  { %3832 = vrot.lane.b32.xlu1 %v5298_v14, %s5318_s3 }
0x2699   :  { %v3833_v42 = vpop.permute.xlu1 %3832 }
0x269a   :  { %v3835_v63 = vmul.f32 %v5296_v15, %v3833_v42 }
0x269c   :  { %3837 = vrot.lane.b32.xlu0 %v3835_v63, %s5319_s13 }
0x270e   :  { %v3838_v58 = vpop.permute.xlu0 %3837 }
0x270f   :  { %4594 = vmatmul.mubr.msk.f32.vlgmr.msra.gmra.mrb[22].mxu1 %vm193_vm10, %v3838_v58 }
0x2710   :  { %4730 = vmatpush3.bf16.msra.mxu1 %v6418_v46  ;;  %4615 = vmatprep.mubr.msk.f32.mxu1 %vm5316_vm2, %v5317_v10 }
0x2711   :  { %4731 = vmatprep.subr.bf16.mxu1 %v5315_v2 }
0x2714   :  { %4733 = vmatpush3.bf16.msra.mxu1 %v6424_v25 }
0x27e2   :  { %v3907_v18 = vpop.f32.mrb[22].mxu1 }
0x27e3   :  { %v3911_v49 = vadd.f32 %v3907_v18, %v3229_v45  ;;  %v4595_v44 = vpop.f32.mrb[23].mxu1 }
0x27e5   :  { %5299 = vtanh.f32 %v3911_v49  ;;  %v4270_v6 = vmul.f32 -1.442695, %v3911_v49 }
0x27e7   :  { %5301 = vpow2.f32 %v4270_v6 }
0x27ef   :  { %v5300_v13 = vpop.eup %5299 }
0x27f0   :  { %3921 = vrot.lane.b32.xlu1 %v5300_v13, %s5318_s3 }
0x27f1   :  { %v5302_v46 = vpop.eup %5301 }
0x27f2   :  { %v3915_v9 = vadd.f32 1.0, %v5302_v46 }
0x27f4   :  { %5303 = vrcp.f32 %v3915_v9 }
0x27fe   :  { %v5304_v10 = vpop.eup %5303 }
0x27ff   :  { %v3919_v25 = vmul.f32 %v5304_v10, %v3829_v48 }
0x2862   :  { %v3922_v56 = vpop.permute.xlu1 %3921 }
0x2863   :  { %v3924_v2 = vmul.f32 %v5304_v10, %v3922_v56 }
0x2865   :  { %3926 = vrot.lane.b32.xlu0 %v3924_v2, %s5318_s3 }
0x28d7   :  { %v3927_v11 = vpop.permute.xlu0 %3926 }
0x28d8   :  { %v3929_v27 = vadd.f32 %v3927_v11, %v3919_v25 }
0x28da   :  { %5305 = vtanh.f32 %v3929_v27 }
0x28e4   :  { %v5306_v4 = vpop.eup %5305 }
0x28e5   :  { %3932 = vrot.lane.b32.xlu1 %v5306_v4, %s5318_s3 }
0x2957   :  { %v3933_v19 = vpop.permute.xlu1 %3932 }
0x2958   :  { %v3935_v29 = vmul.f32 %v5304_v10, %v3933_v19 }
0x295a   :  { %3937 = vrot.lane.b32.xlu0 %v3935_v29, %s5319_s13 }
0x29cc   :  { %v3938_v23 = vpop.permute.xlu0 %3937 }
0x29cd   :  { %4605 = vmatmul.mubr.msk.f32.vlgmr.msra.gmra.mrb[24].mxu0 %vm193_vm10, %v3938_v23 }
0x2aa0   :  { %v4007_v8 = vpop.f32.mrb[24].mxu0 }
0x2aa1   :  { %v4011_v1 = vadd.f32 %v4007_v8, %v3234_v31  ;;  %v4606_v52 = vpop.f32.mrb[25].mxu0 }
0x2aa3   :  { %5307 = vtanh.f32 %v4011_v1  ;;  %v4272_v35 = vmul.f32 -1.442695, %v4011_v1 }
0x2aa5   :  { %5309 = vpow2.f32 %v4272_v35 }
0x2aad   :  { %v5308_v21 = vpop.eup %5307 }
0x2aae   :  { %4021 = vrot.lane.b32.xlu1 %v5308_v21, %s5318_s3 }
0x2aaf   :  { %v5310_v38 = vpop.eup %5309 }
0x2ab0   :  { %v4015_v22 = vadd.f32 1.0, %v5310_v38 }
0x2ab2   :  { %5311 = vrcp.f32 %v4015_v22 }
0x2abc   :  { %v5312_v47 = vpop.eup %5311 }
0x2abd   :  { %v4019_v53 = vmul.f32 %v5312_v47, %v3929_v27 }
0x2b20   :  { %v4022_v17 = vpop.permute.xlu1 %4021 }
0x2b21   :  { %v4024_v20 = vmul.f32 %v5312_v47, %v4022_v17 }
0x2b23   :  { %4026 = vrot.lane.b32.xlu0 %v4024_v20, %s5318_s3 }
0x2b95   :  { %v4027_v55 = vpop.permute.xlu0 %4026 }
0x2b96   :  { %v4029_v59 = vadd.f32 %v4027_v55, %v4019_v53 }
0x2b98   :  { %5313 = vtanh.f32 %v4029_v59 }
0x2ba2   :  { %v5314_v32 = vpop.eup %5313 }
0x2ba3   :  { %4032 = vrot.lane.b32.xlu1 %v5314_v32, %s5318_s3 }
0x2c15   :  { %v4033_v60 = vpop.permute.xlu1 %4032 }
0x2c16   :  { %v4035_v16 = vmul.f32 %v5312_v47, %v4033_v60 }
0x2c18   :  { %4037 = vrot.lane.b32.xlu0 %v4035_v16, %s5319_s13 }
0x2c8a   :  { %v4038_v54 = vpop.permute.xlu0 %4037 }
0x2c8b   :  { %4616 = vmatmul.mubr.msk.f32.vlgmr.msra.gmra.mrb[24].mxu1 %vm193_vm10, %v4038_v54 }
0x2d5e   :  { %v4107_v33 = vpop.f32.mrb[24].mxu1 }
0x2d5f   :  { %v4108_v37 = vadd.f32 %v6498_v62, %v4107_v33  ;;  %v4617_v61 = vpop.f32.mrb[25].mxu1 }
0x2d61   :  { %4274 = vst.msk [vmem:[%s6637_s9 + $0x8] sm:$0xff] %vm2944_vm11, %v4108_v37 }

</bundles_post_ra>
